<compile_context>
chip_gen: v7x
topology: tpu7x:2x2x1
jax: 0.10.0
libtpu: 0.0.40
codegen_flags: <defaults>
</compile_context>

<pallas_src>
import functools
import numpy as np

import jax
import jax.numpy as jnp
from jax.experimental import pallas as pl
from jax.experimental.pallas import tpu as pltpu

# ---- small config (BaseMambaConfig-equivalent) ----
D_MODEL = 32          # config.d_model
N_LAYER = 2           # config.n_layer
D_STATE = 16          # config.d_state
D_CONV = 4            # config.d_conv
EXPAND = 2            # config.expand
D_INNER = EXPAND * D_MODEL            # 64
DT_RANK = max(1, D_MODEL // 16)       # 2
EPS = 1e-5            # config.norm_epsilon ; config.rms_norm = True
BATCH = 2
SEQLEN = 8

BD = BATCH * D_MODEL                  # 64  : residual-stream lane width
BDI = BATCH * D_INNER                 # 128 : mixer lane width (lane-full)

HIGHEST = jax.lax.Precision.HIGHEST


# ---------------------------------------------------------------------------
# Fused Pallas kernel: N_LAYER Mamba blocks + final RMSNorm, whole batch at once
# ---------------------------------------------------------------------------
def mamba_encoder_kernel(h_ref, rmsw_ref, w_in_ref, w_xp_ref, w_out_ref,
                         wdt_ref, a_ref, vec_ref, out_ref):
    """Batch packed along lanes.

    h_ref/out_ref : (L, B*D_MODEL)                         f32
    rmsw_ref      : (N_LAYER+1, 1, B*D_MODEL)              f32 (per-layer + final norm)
    w_in_ref      : (N_LAYER, B*D, 2*B*D_INNER)            bf16 block-diag [x_b0,x_b1,z_b0,z_b1]
    w_xp_ref      : (N_LAYER, B*D_INNER, B*DT_RANK+2*B*D_STATE) bf16 block-diag
                    columns grouped [dt_b0,dt_b1,B_b0,B_b1,C_b0,C_b1]
    w_out_ref     : (N_LAYER, B*D_INNER, B*D)              bf16 block-diag
    wdt_ref       : (N_LAYER, B*DT_RANK, B*D_INNER)        f32 block-diag (exact dt_proj)
    a_ref         : (N_LAYER, L*D_STATE, B*D_INNER)        f32, -exp(A_log) pre-tiled
    vec_ref       : (N_LAYER, 3+D_CONV, B*D_INNER)         f32 [conv_b, dt_b, D_skip, conv_w...]
    """
    L = h_ref.shape[0]
    h = h_ref[...]                                                   # (L, BD) f32

    # Shared iotas: conv shift mask rows; (t,s)->s lane-selection mask for B/C.
    conv_rows = jax.lax.broadcasted_iota(jnp.int32, (L, BDI), 0)
    sel_row_s = jax.lax.broadcasted_iota(
        jnp.int32, (L * D_STATE, D_STATE), 0) % D_STATE
    sel_lane = jax.lax.broadcasted_iota(jnp.int32, (L * D_STATE, D_STATE), 1)
    sel_mask = sel_lane == sel_row_s                                 # (L*S, S)

    def rmsnorm(x, w):
        # per-batch RMSNorm over each D_MODEL lane block
        parts = []
        for b in range(BATCH):
            xb = x[:, b * D_MODEL:(b + 1) * D_MODEL]
            var = jnp.mean(xb * xb, axis=-1, keepdims=True)
            parts.append(xb * jax.lax.rsqrt(var + EPS))
        return jnp.concatenate(parts, axis=-1) * w

    b_off = BATCH * DT_RANK
    c_off = b_off + BATCH * D_STATE

    for l in range(N_LAYER):                                         # N_LAYER=2 -> unrolled
        vecs = vec_ref[l]                                            # (3+d_conv, BDI)
        wdt_w = wdt_ref[l]                                           # (B*dt_rank, BDI)

        # --- per-block RMSNorm + in_proj (single lane-full bf16 dot) ---
        xn = rmsnorm(h, rmsw_ref[l])                                 # (L, BD)
        xz = jnp.dot(xn.astype(jnp.bfloat16), w_in_ref[l],
                     preferred_element_type=jnp.float32)             # (L, 2*BDI)
        x = xz[:, :BDI]                                              # (L, BDI)
        z = xz[:, BDI:]                                              # (L, BDI)

        # --- causal depthwise conv1d, fully in registers (roll + mask) ---
        conv = vecs[0:1, :]                                          # conv bias (1, BDI)
        for k in range(D_CONV):
            shift = D_CONV - 1 - k
            if shift == 0:
                xs = x
            else:
                xs = jnp.where(conv_rows >= shift,
                               pltpu.roll(x, shift=shift, axis=0), 0.0)
            conv = conv + xs * vecs[3 + k:4 + k, :]
        xc = conv * jax.nn.sigmoid(conv)                             # SiLU, (L, BDI)

        # --- x_proj (block-diag bf16 dot): [dt_b*, B_b*, C_b*] ---
        xdbl = jnp.dot(xc.astype(jnp.bfloat16), w_xp_ref[l],
                       preferred_element_type=jnp.float32)           # (L, 2*dt_rank+4*d_state)

        # --- dt_proj (exact f32, block-diag rows) + softplus ---
        dt_pre = vecs[1:2, :]                                        # dt bias (1, BDI)
        for k in range(BATCH * DT_RANK):
            dt_pre = dt_pre + xdbl[:, k:k + 1] * wdt_w[k:k + 1, :]
        dt = jnp.where(dt_pre > 20.0, dt_pre,
                       jnp.log1p(jnp.exp(jnp.minimum(dt_pre, 20.0))))  # (L, BDI)

        # --- batched scan setup: everything hoisted off the serial chain ---
        dtx = dt * xc                                                # (L, BDI)
        # row-repeat (L, BDI) -> (L*d_state, BDI); axis inserted at the sublane
        # position only (minor dim untouched), then leading dims merged.
        dt_rep = jnp.broadcast_to(dt[:, None, :],
                                  (L, D_STATE, BDI)).reshape(L * D_STATE, BDI)
        dtx_rep = jnp.broadcast_to(dtx[:, None, :],
                                   (L, D_STATE, BDI)).reshape(L * D_STATE, BDI)
        dA_all = jnp.exp(dt_rep * a_ref[l])                          # one EUP batch (L*S, BDI)

        dBx_parts, c_cols = [], []
        for b in range(BATCH):
            Bm_b = xdbl[:, b_off + b * D_STATE: b_off + (b + 1) * D_STATE]   # (L, S)
            Cm_b = xdbl[:, c_off + b * D_STATE: c_off + (b + 1) * D_STATE]   # (L, S)
            B_rep = jnp.broadcast_to(Bm_b[:, None, :],
                                     (L, D_STATE, D_STATE)).reshape(L * D_STATE, D_STATE)
            C_rep = jnp.broadcast_to(Cm_b[:, None, :],
                                     (L, D_STATE, D_STATE)).reshape(L * D_STATE, D_STATE)
            # lane s = row % d_state -> column vector, one masked lane-reduction each
            b_col = jnp.sum(jnp.where(sel_mask, B_rep, 0.0), axis=-1, keepdims=True)
            c_col = jnp.sum(jnp.where(sel_mask, C_rep, 0.0), axis=-1, keepdims=True)
            dBx_parts.append(dtx_rep[:, b * D_INNER:(b + 1) * D_INNER] * b_col)
            c_cols.append(c_col)
        dBx_all = jnp.concatenate(dBx_parts, axis=-1)                # (L*S, BDI)

        # --- the ONLY serial part: one FMA per timestep on (d_state, B*d_inner) ---
        st = jnp.zeros((D_STATE, BDI), jnp.float32)
        states = []
        for t in range(L):
            lo = t * D_STATE
            st = dA_all[lo:lo + D_STATE, :] * st + dBx_all[lo:lo + D_STATE, :]
            states.append(st)
        s_all = jnp.concatenate(states, axis=0)                      # (L*S, BDI)

        # --- y from stacked states: batched multiply + sublane reductions + concat ---
        prod = jnp.concatenate(
            [s_all[:, b * D_INNER:(b + 1) * D_INNER] * c_cols[b] for b in range(BATCH)],
            axis=-1)                                                 # (L*S, BDI)
        y = jnp.concatenate(
            [jnp.sum(prod[t * D_STATE:(t + 1) * D_STATE, :], axis=0, keepdims=True)
             for t in range(L)], axis=0)                             # (L, BDI)

        # --- D skip, SiLU(z) gate, out_proj, residual ---
        y = y + xc * vecs[2:3, :]
        y = y * (z * jax.nn.sigmoid(z))
        out = jnp.dot(y.astype(jnp.bfloat16), w_out_ref[l],
                      preferred_element_type=jnp.float32)            # (L, BD)
        h = h + out

    # --- final encoder RMSNorm, fused into the same kernel ---
    out_ref[...] = rmsnorm(h, rmsw_ref[N_LAYER]).astype(out_ref.dtype)


# ---------------------------------------------------------------------------
# Wrapper: batch-block-diagonal / pre-cast / packed weights, then one pallas_call
# ---------------------------------------------------------------------------
def pack_params(layer_params, norm_w):
    """Stack per-layer weights, make MXU weights block-diagonal over the lane-packed
    batch, pre-cast them to bf16, and pack the small per-channel vectors."""
    rmsw_l, w_in_l, w_xp_l, w_out_l, wdt_l, a_l, vec_l = [], [], [], [], [], [], []
    n_xp = BATCH * DT_RANK + 2 * BATCH * D_STATE
    for (rms_w, w_in_t, conv_w, conv_b, w_xp_t, w_dt, b_dt,
         a_log_t, d_skip, w_out_t) in layer_params:
        rmsw_l.append(jnp.tile(rms_w, (1, BATCH)))                   # (1, BD)

        w_x, w_z = w_in_t[:, :D_INNER], w_in_t[:, D_INNER:]
        w_in_bd = jnp.zeros((BD, 2 * BDI), jnp.float32)
        w_xp_bd = jnp.zeros((BDI, n_xp), jnp.float32)
        w_out_bd = jnp.zeros((BDI, BD), jnp.float32)
        wdt_bd = jnp.zeros((BATCH * DT_RANK, BDI), jnp.float32)
        for b in range(BATCH):
            rd = slice(b * D_MODEL, (b + 1) * D_MODEL)
            ri = slice(b * D_INNER, (b + 1) * D_INNER)
            w_in_bd = w_in_bd.at[rd, b * D_INNER:(b + 1) * D_INNER].set(w_x)
            w_in_bd = w_in_bd.at[rd, BDI + b * D_INNER: BDI + (b + 1) * D_INNER].set(w_z)
            w_xp_bd = w_xp_bd.at[ri, b * DT_RANK:(b + 1) * DT_RANK].set(
                w_xp_t[:, :DT_RANK])
            w_xp_bd = w_xp_bd.at[ri, BATCH * DT_RANK + b * D_STATE:
                                 BATCH * DT_RANK + (b + 1) * D_STATE].set(
                w_xp_t[:, DT_RANK:DT_RANK + D_STATE])
            w_xp_bd = w_xp_bd.at[ri, BATCH * (DT_RANK + D_STATE) + b * D_STATE:
                                 BATCH * (DT_RANK + D_STATE) + (b + 1) * D_STATE].set(
                w_xp_t[:, DT_RANK + D_STATE:])
            w_out_bd = w_out_bd.at[ri, rd].set(w_out_t)
            wdt_bd = wdt_bd.at[b * DT_RANK:(b + 1) * DT_RANK, ri].set(w_dt)
        w_in_l.append(w_in_bd.astype(jnp.bfloat16))
        w_xp_l.append(w_xp_bd.astype(jnp.bfloat16))
        w_out_l.append(w_out_bd.astype(jnp.bfloat16))
        wdt_l.append(wdt_bd)

        a_l.append(jnp.tile(-jnp.exp(a_log_t), (SEQLEN, BATCH)))     # (L*S, BDI)
        vec_l.append(jnp.concatenate(
            [jnp.tile(conv_b, (1, BATCH)), jnp.tile(b_dt, (1, BATCH)),
             jnp.tile(d_skip, (1, BATCH)), jnp.tile(conv_w, (1, BATCH))], axis=0))

    rmsw_l.append(jnp.tile(norm_w, (1, BATCH)))
    return (jnp.stack(rmsw_l), jnp.stack(w_in_l), jnp.stack(w_xp_l),
            jnp.stack(w_out_l), jnp.stack(wdt_l), jnp.stack(a_l), jnp.stack(vec_l))


def mamba_encoder_forward(h, packed_params):
    B, L, D = h.shape
    # pack batch along lanes: row t = [h[0, t, :], h[1, t, :], ...]
    h_packed = jnp.transpose(h, (1, 0, 2)).reshape(L, B * D)
    out_packed = pl.pallas_call(
        mamba_encoder_kernel,
        out_shape=jax.ShapeDtypeStruct((L, B * D), h.dtype),
    )(h_packed, *packed_params)
    return jnp.transpose(out_packed.reshape(L, B, D), (1, 0, 2))


# ---------------------------------------------------------------------------
# Deterministic synthetic parameter init (shapes follow the module's __init__)
# ---------------------------------------------------------------------------
def init_params(key):
    layers = []
    for l in range(N_LAYER):
        ks = jax.random.split(jax.random.fold_in(key, l), 6)
        rms_w = jnp.ones((1, D_MODEL), jnp.float32)
        w_in_t = 0.1 * jax.random.normal(ks[0], (D_MODEL, 2 * D_INNER), jnp.float32)
        conv_w = 0.2 * jax.random.normal(ks[1], (D_CONV, D_INNER), jnp.float32)
        conv_b = 0.05 * jax.random.normal(ks[2], (1, D_INNER), jnp.float32)
        w_xp_t = 0.1 * jax.random.normal(ks[3], (D_INNER, DT_RANK + 2 * D_STATE), jnp.float32)
        w_dt = 0.3 * jax.random.normal(ks[4], (DT_RANK, D_INNER), jnp.float32)
        b_dt = jnp.full((1, D_INNER), float(np.log(np.expm1(0.05))), jnp.float32)
        a = jnp.tile(jnp.arange(1, D_STATE + 1, dtype=jnp.float32)[:, None], (1, D_INNER))
        a_log_t = jnp.log(a)                                         # (d_state, d_inner)
        d_skip = jnp.ones((1, D_INNER), jnp.float32)
        w_out_t = 0.1 * jax.random.normal(ks[5], (D_INNER, D_MODEL), jnp.float32)
        layers.append((rms_w, w_in_t, conv_w, conv_b, w_xp_t, w_dt, b_dt,
                       a_log_t, d_skip, w_out_t))
    norm_w = jnp.ones((1, D_MODEL), jnp.float32)
    return layers, norm_w


# ---------------------------------------------------------------------------
# Pure-JAX reference (same math, incl. the bf16 matmul operands) for correctness
# ---------------------------------------------------------------------------
def _bf16_dot(a, b):
    return jnp.dot(a.astype(jnp.bfloat16), b.astype(jnp.bfloat16),
                   preferred_element_type=jnp.float32)


def _ref_block_single(h, p):
    (rms_w, w_in_t, conv_w, conv_b, w_xp_t, w_dt, b_dt,
     a_log_t, d_skip, w_out_t) = p
    L = h.shape[0]
    var = jnp.mean(h * h, axis=-1, keepdims=True)
    xn = h * jax.lax.rsqrt(var + EPS) * rms_w
    xz = _bf16_dot(xn, w_in_t)
    x, z = xz[:, :D_INNER], xz[:, D_INNER:]
    xp = jnp.concatenate([jnp.zeros((D_CONV - 1, D_INNER), jnp.float32), x], axis=0)
    conv = conv_b
    for k in range(D_CONV):
        conv = conv + xp[k:k + L, :] * conv_w[k:k + 1, :]
    xc = conv * jax.nn.sigmoid(conv)
    xdbl = _bf16_dot(xc, w_xp_t)
    dtp = xdbl[:, :DT_RANK]
    Bm = xdbl[:, DT_RANK:DT_RANK + D_STATE]
    Cm = xdbl[:, DT_RANK + D_STATE:]
    dt = jax.nn.softplus(jnp.dot(dtp, w_dt, precision=HIGHEST) + b_dt)
    A = -jnp.exp(a_log_t.T)                                          # (d_inner, d_state)

    def step(s, inp):
        dt_t, b_t, c_t, x_t = inp
        dA = jnp.exp(dt_t[:, None] * A)
        dBx = dt_t[:, None] * b_t[None, :] * x_t[:, None]
        s = dA * s + dBx
        return s, jnp.sum(s * c_t[None, :], axis=-1)

    _, ys = jax.lax.scan(step, jnp.zeros((D_INNER, D_STATE), jnp.float32),
                         (dt, Bm, Cm, xc))
    y = ys + xc * d_skip
    y = y * (z * jax.nn.sigmoid(z))
    return h + _bf16_dot(y, w_out_t)


def ref_encoder(h, layer_params, norm_w):
    for p in layer_params:
        h = jax.vmap(functools.partial(_ref_block_single, p=p))(h)
    var = jnp.mean(h * h, axis=-1, keepdims=True)
    return h * jax.lax.rsqrt(var + EPS) * norm_w


# ---------------------------------------------------------------------------
if __name__ == "__main__":
    key = jax.random.PRNGKey(0)
    k_in, k_par = jax.random.split(key)
    layer_params, norm_w = init_params(k_par)
    packed_params = pack_params(layer_params, norm_w)
    hidden_states = jax.random.normal(k_in, (BATCH, SEQLEN, D_MODEL), jnp.float32)

    out = jax.block_until_ready(mamba_encoder_forward(hidden_states, packed_params))
    ref = jax.block_until_ready(ref_encoder(hidden_states, layer_params, norm_w))
    if not np.allclose(np.asarray(out), np.asarray(ref), atol=3e-3, rtol=3e-3):
        raise AssertionError("Pallas kernel output mismatches JAX reference")

    print("KERNEL_OK")
</pallas_src>

<mosaic_0001>
module attributes {stable_mosaic.version = 11 : i64} {
  func.func @mamba_encoder_kernel(%arg0: memref<8x64xf32, #tpu.memory_space<vmem>>, %arg1: memref<3x1x64xf32, #tpu.memory_space<vmem>>, %arg2: memref<2x64x256xbf16, #tpu.memory_space<vmem>>, %arg3: memref<2x128x68xbf16, #tpu.memory_space<vmem>>, %arg4: memref<2x128x64xbf16, #tpu.memory_space<vmem>>, %arg5: memref<2x4x128xf32, #tpu.memory_space<vmem>>, %arg6: memref<2x128x128xf32, #tpu.memory_space<vmem>>, %arg7: memref<2x7x128xf32, #tpu.memory_space<vmem>>, %arg8: memref<8x64xf32, #tpu.memory_space<vmem>>) attributes {dimension_semantics = [], scalar_prefetch = 0 : i64, scratch_operands = 0 : i64, tpu.core_type = #tpu.core_type<tc>} {
    %c0 = arith.constant 0 : index
    %c0_0 = arith.constant 0 : index
    %0 = vector.load %arg0[%c0, %c0_0] : memref<8x64xf32, #tpu.memory_space<vmem>>, vector<8x64xf32>
    %1 = tpu.iota {dimensions = array<i32: 0>} : vector<8x128xi32>
    %2 = tpu.iota {dimensions = array<i32: 0>} : vector<128x16xi32>
    %c16_i32 = arith.constant 16 : i32
    %c0_i32 = arith.constant 0 : i32
    %3 = arith.cmpi eq, %c16_i32, %c0_i32 : i32
    %c1_i32 = arith.constant 1 : i32
    %4 = arith.select %3, %c1_i32, %c16_i32 : i32
    %5 = vector.broadcast %4 : i32 to vector<128x16xi32>
    %6 = arith.remsi %2, %5 : vector<128x16xi32>
    %c0_i32_1 = arith.constant 0 : i32
    %7 = vector.broadcast %c0_i32_1 : i32 to vector<128x16xi32>
    %8 = arith.cmpi ne, %6, %7 : vector<128x16xi32>
    %c0_i32_2 = arith.constant 0 : i32
    %9 = vector.broadcast %c0_i32_2 : i32 to vector<128x16xi32>
    %10 = arith.cmpi slt, %6, %9 : vector<128x16xi32>
    %c0_i32_3 = arith.constant 0 : i32
    %11 = arith.cmpi slt, %4, %c0_i32_3 : i32
    %12 = vector.broadcast %11 : i1 to vector<128x16xi1>
    %13 = vector.broadcast %12 : vector<128x16xi1> to vector<128x16xi1>
    %14 = arith.xori %10, %13 : vector<128x16xi1>
    %15 = arith.andi %14, %8 : vector<128x16xi1>
    %16 = vector.broadcast %4 : i32 to vector<128x16xi32>
    %17 = arith.addi %6, %16 : vector<128x16xi32>
    %18 = arith.select %15, %17, %6 : vector<128x16xi1>, vector<128x16xi32>
    %19 = tpu.iota {dimensions = array<i32: 1>} : vector<128x16xi32>
    %20 = arith.cmpi eq, %19, %18 : vector<128x16xi32>
    %c0_4 = arith.constant 0 : index
    %c0_5 = arith.constant 0 : index
    %c0_6 = arith.constant 0 : index
    %21 = vector.load %arg7[%c0_4, %c0_5, %c0_6] : memref<2x7x128xf32, #tpu.memory_space<vmem>>, vector<1x7x128xf32>
    %22 = vector.shape_cast %21 : vector<1x7x128xf32> to vector<7x128xf32>
    %c0_7 = arith.constant 0 : index
    %c0_8 = arith.constant 0 : index
    %c0_9 = arith.constant 0 : index
    %23 = vector.load %arg5[%c0_7, %c0_8, %c0_9] : memref<2x4x128xf32, #tpu.memory_space<vmem>>, vector<1x4x128xf32>
    %24 = vector.shape_cast %23 : vector<1x4x128xf32> to vector<4x128xf32>
    %c0_10 = arith.constant 0 : index
    %c0_11 = arith.constant 0 : index
    %c0_12 = arith.constant 0 : index
    %25 = vector.load %arg1[%c0_10, %c0_11, %c0_12] : memref<3x1x64xf32, #tpu.memory_space<vmem>>, vector<1x1x64xf32>
    %26 = vector.shape_cast %25 : vector<1x1x64xf32> to vector<1x64xf32>
    %27 = vector.extract_strided_slice %0 {offsets = [0, 0], sizes = [8, 32], strides = [1, 1]} : vector<8x64xf32> to vector<8x32xf32>
    %28 = arith.mulf %27, %27 : vector<8x32xf32>
    %cst = arith.constant dense<0.000000e+00> : vector<8xf32>
    %29 = vector.multi_reduction <add>, %28, %cst [1] : vector<8x32xf32> to vector<8xf32>
    %30 = vector.shape_cast %29 : vector<8xf32> to vector<8x1xf32>
    %cst_13 = arith.constant 3.200000e+01 : f32
    %31 = vector.broadcast %cst_13 : f32 to vector<8x1xf32>
    %32 = arith.divf %30, %31 : vector<8x1xf32>
    %cst_14 = arith.constant 9.99999974E-6 : f32
    %33 = vector.broadcast %cst_14 : f32 to vector<8x1xf32>
    %34 = arith.addf %32, %33 : vector<8x1xf32>
    %35 = math.rsqrt %34 : vector<8x1xf32>
    %36 = vector.broadcast %35 : vector<8x1xf32> to vector<8x32xf32>
    %37 = arith.mulf %27, %36 : vector<8x32xf32>
    %38 = vector.extract_strided_slice %0 {offsets = [0, 32], sizes = [8, 32], strides = [1, 1]} : vector<8x64xf32> to vector<8x32xf32>
    %39 = arith.mulf %38, %38 : vector<8x32xf32>
    %cst_15 = arith.constant dense<0.000000e+00> : vector<8xf32>
    %40 = vector.multi_reduction <add>, %39, %cst_15 [1] : vector<8x32xf32> to vector<8xf32>
    %41 = vector.shape_cast %40 : vector<8xf32> to vector<8x1xf32>
    %cst_16 = arith.constant 3.200000e+01 : f32
    %42 = vector.broadcast %cst_16 : f32 to vector<8x1xf32>
    %43 = arith.divf %41, %42 : vector<8x1xf32>
    %cst_17 = arith.constant 9.99999974E-6 : f32
    %44 = vector.broadcast %cst_17 : f32 to vector<8x1xf32>
    %45 = arith.addf %43, %44 : vector<8x1xf32>
    %46 = math.rsqrt %45 : vector<8x1xf32>
    %47 = vector.broadcast %46 : vector<8x1xf32> to vector<8x32xf32>
    %48 = arith.mulf %38, %47 : vector<8x32xf32>
    %49 = tpu.concatenate %37, %48 in 1 : vector<8x32xf32>, vector<8x32xf32> -> vector<8x64xf32>
    %50 = vector.broadcast %26 : vector<1x64xf32> to vector<8x64xf32>
    %51 = arith.mulf %49, %50 : vector<8x64xf32>
    %52 = arith.truncf %51 : vector<8x64xf32> to vector<8x64xbf16>
    %c0_18 = arith.constant 0 : index
    %c0_19 = arith.constant 0 : index
    %c0_20 = arith.constant 0 : index
    %53 = vector.load %arg2[%c0_18, %c0_19, %c0_20] : memref<2x64x256xbf16, #tpu.memory_space<vmem>>, vector<1x64x256xbf16>
    %54 = vector.shape_cast %53 : vector<1x64x256xbf16> to vector<64x256xbf16>
    %cst_21 = arith.constant dense<0.000000e+00> : vector<8x256xf32>
    %55 = tpu.matmul %52, %54, %cst_21 {dimension_numbers = #tpu.dot_dimension_numbers<[1], [0], [0], [1], [0, 0, 1, 1], [], []>} : vector<8x64xbf16>, vector<64x256xbf16>, vector<8x256xf32> -> vector<8x256xf32>
    %56 = vector.extract_strided_slice %55 {offsets = [0, 0], sizes = [8, 128], strides = [1, 1]} : vector<8x256xf32> to vector<8x128xf32>
    %57 = vector.extract_strided_slice %55 {offsets = [0, 128], sizes = [8, 128], strides = [1, 1]} : vector<8x256xf32> to vector<8x128xf32>
    %58 = vector.extract_strided_slice %22 {offsets = [0, 0], sizes = [1, 128], strides = [1, 1]} : vector<7x128xf32> to vector<1x128xf32>
    %c3_i32 = arith.constant 3 : i32
    %59 = vector.broadcast %c3_i32 : i32 to vector<8x128xi32>
    %60 = arith.cmpi sge, %1, %59 : vector<8x128xi32>
    %c3_i32_22 = arith.constant 3 : i32
    %61 = tpu.dynamic_rotate %56 by %c3_i32_22 dim 0 : vector<8x128xf32>, i32 -> vector<8x128xf32>
    %cst_23 = arith.constant 0.000000e+00 : f32
    %62 = vector.broadcast %cst_23 : f32 to vector<8x128xf32>
    %63 = arith.select %60, %61, %62 : vector<8x128xi1>, vector<8x128xf32>
    %64 = vector.extract_strided_slice %22 {offsets = [3, 0], sizes = [1, 128], strides = [1, 1]} : vector<7x128xf32> to vector<1x128xf32>
    %65 = vector.broadcast %64 : vector<1x128xf32> to vector<8x128xf32>
    %66 = arith.mulf %63, %65 : vector<8x128xf32>
    %67 = vector.broadcast %58 : vector<1x128xf32> to vector<8x128xf32>
    %68 = arith.addf %67, %66 : vector<8x128xf32>
    %c2_i32 = arith.constant 2 : i32
    %69 = vector.broadcast %c2_i32 : i32 to vector<8x128xi32>
    %70 = arith.cmpi sge, %1, %69 : vector<8x128xi32>
    %c2_i32_24 = arith.constant 2 : i32
    %71 = tpu.dynamic_rotate %56 by %c2_i32_24 dim 0 : vector<8x128xf32>, i32 -> vector<8x128xf32>
    %cst_25 = arith.constant 0.000000e+00 : f32
    %72 = vector.broadcast %cst_25 : f32 to vector<8x128xf32>
    %73 = arith.select %70, %71, %72 : vector<8x128xi1>, vector<8x128xf32>
    %74 = vector.extract_strided_slice %22 {offsets = [4, 0], sizes = [1, 128], strides = [1, 1]} : vector<7x128xf32> to vector<1x128xf32>
    %75 = vector.broadcast %74 : vector<1x128xf32> to vector<8x128xf32>
    %76 = arith.mulf %73, %75 : vector<8x128xf32>
    %77 = arith.addf %68, %76 : vector<8x128xf32>
    %c1_i32_26 = arith.constant 1 : i32
    %78 = vector.broadcast %c1_i32_26 : i32 to vector<8x128xi32>
    %79 = arith.cmpi sge, %1, %78 : vector<8x128xi32>
    %c1_i32_27 = arith.constant 1 : i32
    %80 = tpu.dynamic_rotate %56 by %c1_i32_27 dim 0 : vector<8x128xf32>, i32 -> vector<8x128xf32>
    %cst_28 = arith.constant 0.000000e+00 : f32
    %81 = vector.broadcast %cst_28 : f32 to vector<8x128xf32>
    %82 = arith.select %79, %80, %81 : vector<8x128xi1>, vector<8x128xf32>
    %83 = vector.extract_strided_slice %22 {offsets = [5, 0], sizes = [1, 128], strides = [1, 1]} : vector<7x128xf32> to vector<1x128xf32>
    %84 = vector.broadcast %83 : vector<1x128xf32> to vector<8x128xf32>
    %85 = arith.mulf %82, %84 : vector<8x128xf32>
    %86 = arith.addf %77, %85 : vector<8x128xf32>
    %87 = vector.extract_strided_slice %22 {offsets = [6, 0], sizes = [1, 128], strides = [1, 1]} : vector<7x128xf32> to vector<1x128xf32>
    %88 = vector.broadcast %87 : vector<1x128xf32> to vector<8x128xf32>
    %89 = arith.mulf %56, %88 : vector<8x128xf32>
    %90 = arith.addf %86, %89 : vector<8x128xf32>
    %91 = arith.negf %90 : vector<8x128xf32>
    %92 = math.exp %91 : vector<8x128xf32>
    %cst_29 = arith.constant 1.000000e+00 : f32
    %93 = vector.broadcast %cst_29 : f32 to vector<8x128xf32>
    %94 = arith.addf %93, %92 : vector<8x128xf32>
    %95 = arith.divf %93, %94 : vector<8x128xf32>
    %96 = arith.mulf %90, %95 : vector<8x128xf32>
    %97 = arith.truncf %96 : vector<8x128xf32> to vector<8x128xbf16>
    %c0_30 = arith.constant 0 : index
    %c0_31 = arith.constant 0 : index
    %c0_32 = arith.constant 0 : index
    %98 = vector.load %arg3[%c0_30, %c0_31, %c0_32] : memref<2x128x68xbf16, #tpu.memory_space<vmem>>, vector<1x128x68xbf16>
    %99 = vector.shape_cast %98 : vector<1x128x68xbf16> to vector<128x68xbf16>
    %cst_33 = arith.constant dense<0.000000e+00> : vector<8x68xf32>
    %100 = tpu.matmul %97, %99, %cst_33 {dimension_numbers = #tpu.dot_dimension_numbers<[1], [0], [0], [1], [0, 0, 1, 1], [], []>} : vector<8x128xbf16>, vector<128x68xbf16>, vector<8x68xf32> -> vector<8x68xf32>
    %101 = vector.extract_strided_slice %22 {offsets = [1, 0], sizes = [1, 128], strides = [1, 1]} : vector<7x128xf32> to vector<1x128xf32>
    %102 = vector.extract_strided_slice %100 {offsets = [0, 0], sizes = [8, 1], strides = [1, 1]} : vector<8x68xf32> to vector<8x1xf32>
    %103 = vector.extract_strided_slice %24 {offsets = [0, 0], sizes = [1, 128], strides = [1, 1]} : vector<4x128xf32> to vector<1x128xf32>
    %104 = vector.broadcast %102 : vector<8x1xf32> to vector<8x128xf32>
    %105 = vector.broadcast %103 : vector<1x128xf32> to vector<8x128xf32>
    %106 = arith.mulf %104, %105 : vector<8x128xf32>
    %107 = vector.broadcast %101 : vector<1x128xf32> to vector<8x128xf32>
    %108 = arith.addf %107, %106 : vector<8x128xf32>
    %109 = vector.extract_strided_slice %100 {offsets = [0, 1], sizes = [8, 1], strides = [1, 1]} : vector<8x68xf32> to vector<8x1xf32>
    %110 = vector.extract_strided_slice %24 {offsets = [1, 0], sizes = [1, 128], strides = [1, 1]} : vector<4x128xf32> to vector<1x128xf32>
    %111 = vector.broadcast %109 : vector<8x1xf32> to vector<8x128xf32>
    %112 = vector.broadcast %110 : vector<1x128xf32> to vector<8x128xf32>
    %113 = arith.mulf %111, %112 : vector<8x128xf32>
    %114 = arith.addf %108, %113 : vector<8x128xf32>
    %115 = vector.extract_strided_slice %100 {offsets = [0, 2], sizes = [8, 1], strides = [1, 1]} : vector<8x68xf32> to vector<8x1xf32>
    %116 = vector.extract_strided_slice %24 {offsets = [2, 0], sizes = [1, 128], strides = [1, 1]} : vector<4x128xf32> to vector<1x128xf32>
    %117 = vector.broadcast %115 : vector<8x1xf32> to vector<8x128xf32>
    %118 = vector.broadcast %116 : vector<1x128xf32> to vector<8x128xf32>
    %119 = arith.mulf %117, %118 : vector<8x128xf32>
    %120 = arith.addf %114, %119 : vector<8x128xf32>
    %121 = vector.extract_strided_slice %100 {offsets = [0, 3], sizes = [8, 1], strides = [1, 1]} : vector<8x68xf32> to vector<8x1xf32>
    %122 = vector.extract_strided_slice %24 {offsets = [3, 0], sizes = [1, 128], strides = [1, 1]} : vector<4x128xf32> to vector<1x128xf32>
    %123 = vector.broadcast %121 : vector<8x1xf32> to vector<8x128xf32>
    %124 = vector.broadcast %122 : vector<1x128xf32> to vector<8x128xf32>
    %125 = arith.mulf %123, %124 : vector<8x128xf32>
    %126 = arith.addf %120, %125 : vector<8x128xf32>
    %cst_34 = arith.constant 2.000000e+01 : f32
    %127 = vector.broadcast %cst_34 : f32 to vector<8x128xf32>
    %128 = arith.cmpf ogt, %126, %127 : vector<8x128xf32>
    %cst_35 = arith.constant 2.000000e+01 : f32
    %129 = vector.broadcast %cst_35 : f32 to vector<8x128xf32>
    %130 = arith.minimumf %126, %129 : vector<8x128xf32>
    %131 = math.exp %130 : vector<8x128xf32>
    %132 = math.log1p %131 : vector<8x128xf32>
    %133 = arith.select %128, %126, %132 : vector<8x128xi1>, vector<8x128xf32>
    %134 = arith.mulf %133, %96 : vector<8x128xf32>
    %135 = vector.shape_cast %133 : vector<8x128xf32> to vector<8x1x128xf32>
    %136 = vector.shape_cast %135 : vector<8x1x128xf32> to vector<8x1x128xf32>
    %137 = vector.broadcast %136 : vector<8x1x128xf32> to vector<8x16x128xf32>
    %138 = vector.shape_cast %137 : vector<8x16x128xf32> to vector<128x128xf32>
    %139 = vector.shape_cast %134 : vector<8x128xf32> to vector<8x1x128xf32>
    %140 = vector.shape_cast %139 : vector<8x1x128xf32> to vector<8x1x128xf32>
    %141 = vector.broadcast %140 : vector<8x1x128xf32> to vector<8x16x128xf32>
    %142 = vector.shape_cast %141 : vector<8x16x128xf32> to vector<128x128xf32>
    %c0_36 = arith.constant 0 : index
    %c0_37 = arith.constant 0 : index
    %c0_38 = arith.constant 0 : index
    %143 = vector.load %arg6[%c0_36, %c0_37, %c0_38] : memref<2x128x128xf32, #tpu.memory_space<vmem>>, vector<1x128x128xf32>
    %144 = vector.shape_cast %143 : vector<1x128x128xf32> to vector<128x128xf32>
    %145 = arith.mulf %138, %144 : vector<128x128xf32>
    %146 = math.exp %145 : vector<128x128xf32>
    %147 = vector.extract_strided_slice %100 {offsets = [0, 4], sizes = [8, 16], strides = [1, 1]} : vector<8x68xf32> to vector<8x16xf32>
    %148 = vector.extract_strided_slice %100 {offsets = [0, 36], sizes = [8, 16], strides = [1, 1]} : vector<8x68xf32> to vector<8x16xf32>
    %149 = vector.shape_cast %147 : vector<8x16xf32> to vector<8x1x16xf32>
    %150 = vector.shape_cast %149 : vector<8x1x16xf32> to vector<8x1x16xf32>
    %151 = vector.broadcast %150 : vector<8x1x16xf32> to vector<8x16x16xf32>
    %152 = vector.shape_cast %151 : vector<8x16x16xf32> to vector<128x16xf32>
    %153 = vector.shape_cast %148 : vector<8x16xf32> to vector<8x1x16xf32>
    %154 = vector.shape_cast %153 : vector<8x1x16xf32> to vector<8x1x16xf32>
    %155 = vector.broadcast %154 : vector<8x1x16xf32> to vector<8x16x16xf32>
    %156 = vector.shape_cast %155 : vector<8x16x16xf32> to vector<128x16xf32>
    %cst_39 = arith.constant 0.000000e+00 : f32
    %157 = vector.broadcast %cst_39 : f32 to vector<128x16xf32>
    %158 = arith.select %20, %152, %157 : vector<128x16xi1>, vector<128x16xf32>
    %cst_40 = arith.constant dense<0.000000e+00> : vector<128xf32>
    %159 = vector.multi_reduction <add>, %158, %cst_40 [1] : vector<128x16xf32> to vector<128xf32>
    %160 = vector.shape_cast %159 : vector<128xf32> to vector<128x1xf32>
    %cst_41 = arith.constant 0.000000e+00 : f32
    %161 = vector.broadcast %cst_41 : f32 to vector<128x16xf32>
    %162 = arith.select %20, %156, %161 : vector<128x16xi1>, vector<128x16xf32>
    %cst_42 = arith.constant dense<0.000000e+00> : vector<128xf32>
    %163 = vector.multi_reduction <add>, %162, %cst_42 [1] : vector<128x16xf32> to vector<128xf32>
    %164 = vector.shape_cast %163 : vector<128xf32> to vector<128x1xf32>
    %165 = vector.extract_strided_slice %142 {offsets = [0, 0], sizes = [128, 64], strides = [1, 1]} : vector<128x128xf32> to vector<128x64xf32>
    %166 = vector.broadcast %160 : vector<128x1xf32> to vector<128x64xf32>
    %167 = arith.mulf %165, %166 : vector<128x64xf32>
    %168 = vector.extract_strided_slice %100 {offsets = [0, 20], sizes = [8, 16], strides = [1, 1]} : vector<8x68xf32> to vector<8x16xf32>
    %169 = vector.extract_strided_slice %100 {offsets = [0, 52], sizes = [8, 16], strides = [1, 1]} : vector<8x68xf32> to vector<8x16xf32>
    %170 = vector.shape_cast %168 : vector<8x16xf32> to vector<8x1x16xf32>
    %171 = vector.shape_cast %170 : vector<8x1x16xf32> to vector<8x1x16xf32>
    %172 = vector.broadcast %171 : vector<8x1x16xf32> to vector<8x16x16xf32>
    %173 = vector.shape_cast %172 : vector<8x16x16xf32> to vector<128x16xf32>
    %174 = vector.shape_cast %169 : vector<8x16xf32> to vector<8x1x16xf32>
    %175 = vector.shape_cast %174 : vector<8x1x16xf32> to vector<8x1x16xf32>
    %176 = vector.broadcast %175 : vector<8x1x16xf32> to vector<8x16x16xf32>
    %177 = vector.shape_cast %176 : vector<8x16x16xf32> to vector<128x16xf32>
    %cst_43 = arith.constant 0.000000e+00 : f32
    %178 = vector.broadcast %cst_43 : f32 to vector<128x16xf32>
    %179 = arith.select %20, %173, %178 : vector<128x16xi1>, vector<128x16xf32>
    %cst_44 = arith.constant dense<0.000000e+00> : vector<128xf32>
    %180 = vector.multi_reduction <add>, %179, %cst_44 [1] : vector<128x16xf32> to vector<128xf32>
    %181 = vector.shape_cast %180 : vector<128xf32> to vector<128x1xf32>
    %cst_45 = arith.constant 0.000000e+00 : f32
    %182 = vector.broadcast %cst_45 : f32 to vector<128x16xf32>
    %183 = arith.select %20, %177, %182 : vector<128x16xi1>, vector<128x16xf32>
    %cst_46 = arith.constant dense<0.000000e+00> : vector<128xf32>
    %184 = vector.multi_reduction <add>, %183, %cst_46 [1] : vector<128x16xf32> to vector<128xf32>
    %185 = vector.shape_cast %184 : vector<128xf32> to vector<128x1xf32>
    %186 = vector.extract_strided_slice %142 {offsets = [0, 64], sizes = [128, 64], strides = [1, 1]} : vector<128x128xf32> to vector<128x64xf32>
    %187 = vector.broadcast %181 : vector<128x1xf32> to vector<128x64xf32>
    %188 = arith.mulf %186, %187 : vector<128x64xf32>
    %189 = tpu.concatenate %167, %188 in 1 : vector<128x64xf32>, vector<128x64xf32> -> vector<128x128xf32>
    %cst_47 = arith.constant 0.000000e+00 : f32
    %190 = vector.broadcast %cst_47 : f32 to vector<16x128xf32>
    %191 = vector.extract_strided_slice %146 {offsets = [0, 0], sizes = [16, 128], strides = [1, 1]} : vector<128x128xf32> to vector<16x128xf32>
    %192 = arith.mulf %191, %190 : vector<16x128xf32>
    %193 = vector.extract_strided_slice %189 {offsets = [0, 0], sizes = [16, 128], strides = [1, 1]} : vector<128x128xf32> to vector<16x128xf32>
    %194 = arith.addf %192, %193 : vector<16x128xf32>
    %195 = vector.extract_strided_slice %146 {offsets = [16, 0], sizes = [16, 128], strides = [1, 1]} : vector<128x128xf32> to vector<16x128xf32>
    %196 = arith.mulf %195, %194 : vector<16x128xf32>
    %197 = vector.extract_strided_slice %189 {offsets = [16, 0], sizes = [16, 128], strides = [1, 1]} : vector<128x128xf32> to vector<16x128xf32>
    %198 = arith.addf %196, %197 : vector<16x128xf32>
    %199 = vector.extract_strided_slice %146 {offsets = [32, 0], sizes = [16, 128], strides = [1, 1]} : vector<128x128xf32> to vector<16x128xf32>
    %200 = arith.mulf %199, %198 : vector<16x128xf32>
    %201 = vector.extract_strided_slice %189 {offsets = [32, 0], sizes = [16, 128], strides = [1, 1]} : vector<128x128xf32> to vector<16x128xf32>
    %202 = arith.addf %200, %201 : vector<16x128xf32>
    %203 = vector.extract_strided_slice %146 {offsets = [48, 0], sizes = [16, 128], strides = [1, 1]} : vector<128x128xf32> to vector<16x128xf32>
    %204 = arith.mulf %203, %202 : vector<16x128xf32>
    %205 = vector.extract_strided_slice %189 {offsets = [48, 0], sizes = [16, 128], strides = [1, 1]} : vector<128x128xf32> to vector<16x128xf32>
    %206 = arith.addf %204, %205 : vector<16x128xf32>
    %207 = vector.extract_strided_slice %146 {offsets = [64, 0], sizes = [16, 128], strides = [1, 1]} : vector<128x128xf32> to vector<16x128xf32>
    %208 = arith.mulf %207, %206 : vector<16x128xf32>
    %209 = vector.extract_strided_slice %189 {offsets = [64, 0], sizes = [16, 128], strides = [1, 1]} : vector<128x128xf32> to vector<16x128xf32>
    %210 = arith.addf %208, %209 : vector<16x128xf32>
    %211 = vector.extract_strided_slice %146 {offsets = [80, 0], sizes = [16, 128], strides = [1, 1]} : vector<128x128xf32> to vector<16x128xf32>
    %212 = arith.mulf %211, %210 : vector<16x128xf32>
    %213 = vector.extract_strided_slice %189 {offsets = [80, 0], sizes = [16, 128], strides = [1, 1]} : vector<128x128xf32> to vector<16x128xf32>
    %214 = arith.addf %212, %213 : vector<16x128xf32>
    %215 = vector.extract_strided_slice %146 {offsets = [96, 0], sizes = [16, 128], strides = [1, 1]} : vector<128x128xf32> to vector<16x128xf32>
    %216 = arith.mulf %215, %214 : vector<16x128xf32>
    %217 = vector.extract_strided_slice %189 {offsets = [96, 0], sizes = [16, 128], strides = [1, 1]} : vector<128x128xf32> to vector<16x128xf32>
    %218 = arith.addf %216, %217 : vector<16x128xf32>
    %219 = vector.extract_strided_slice %146 {offsets = [112, 0], sizes = [16, 128], strides = [1, 1]} : vector<128x128xf32> to vector<16x128xf32>
    %220 = arith.mulf %219, %218 : vector<16x128xf32>
    %221 = vector.extract_strided_slice %189 {offsets = [112, 0], sizes = [16, 128], strides = [1, 1]} : vector<128x128xf32> to vector<16x128xf32>
    %222 = arith.addf %220, %221 : vector<16x128xf32>
    %223 = tpu.concatenate %194, %198, %202, %206, %210, %214, %218, %222 in 0 : vector<16x128xf32>, vector<16x128xf32>, vector<16x128xf32>, vector<16x128xf32>, vector<16x128xf32>, vector<16x128xf32>, vector<16x128xf32>, vector<16x128xf32> -> vector<128x128xf32>
    %224 = vector.extract_strided_slice %223 {offsets = [0, 0], sizes = [128, 64], strides = [1, 1]} : vector<128x128xf32> to vector<128x64xf32>
    %225 = vector.broadcast %164 : vector<128x1xf32> to vector<128x64xf32>
    %226 = arith.mulf %224, %225 : vector<128x64xf32>
    %227 = vector.extract_strided_slice %223 {offsets = [0, 64], sizes = [128, 64], strides = [1, 1]} : vector<128x128xf32> to vector<128x64xf32>
    %228 = vector.broadcast %185 : vector<128x1xf32> to vector<128x64xf32>
    %229 = arith.mulf %227, %228 : vector<128x64xf32>
    %230 = tpu.concatenate %226, %229 in 1 : vector<128x64xf32>, vector<128x64xf32> -> vector<128x128xf32>
    %231 = vector.extract_strided_slice %230 {offsets = [0, 0], sizes = [16, 128], strides = [1, 1]} : vector<128x128xf32> to vector<16x128xf32>
    %cst_48 = arith.constant dense<0.000000e+00> : vector<128xf32>
    %232 = vector.multi_reduction <add>, %231, %cst_48 [0] : vector<16x128xf32> to vector<128xf32>
    %233 = vector.shape_cast %232 : vector<128xf32> to vector<1x128xf32>
    %234 = vector.extract_strided_slice %230 {offsets = [16, 0], sizes = [16, 128], strides = [1, 1]} : vector<128x128xf32> to vector<16x128xf32>
    %cst_49 = arith.constant dense<0.000000e+00> : vector<128xf32>
    %235 = vector.multi_reduction <add>, %234, %cst_49 [0] : vector<16x128xf32> to vector<128xf32>
    %236 = vector.shape_cast %235 : vector<128xf32> to vector<1x128xf32>
    %237 = vector.extract_strided_slice %230 {offsets = [32, 0], sizes = [16, 128], strides = [1, 1]} : vector<128x128xf32> to vector<16x128xf32>
    %cst_50 = arith.constant dense<0.000000e+00> : vector<128xf32>
    %238 = vector.multi_reduction <add>, %237, %cst_50 [0] : vector<16x128xf32> to vector<128xf32>
    %239 = vector.shape_cast %238 : vector<128xf32> to vector<1x128xf32>
    %240 = vector.extract_strided_slice %230 {offsets = [48, 0], sizes = [16, 128], strides = [1, 1]} : vector<128x128xf32> to vector<16x128xf32>
    %cst_51 = arith.constant dense<0.000000e+00> : vector<128xf32>
    %241 = vector.multi_reduction <add>, %240, %cst_51 [0] : vector<16x128xf32> to vector<128xf32>
    %242 = vector.shape_cast %241 : vector<128xf32> to vector<1x128xf32>
    %243 = vector.extract_strided_slice %230 {offsets = [64, 0], sizes = [16, 128], strides = [1, 1]} : vector<128x128xf32> to vector<16x128xf32>
    %cst_52 = arith.constant dense<0.000000e+00> : vector<128xf32>
    %244 = vector.multi_reduction <add>, %243, %cst_52 [0] : vector<16x128xf32> to vector<128xf32>
    %245 = vector.shape_cast %244 : vector<128xf32> to vector<1x128xf32>
    %246 = vector.extract_strided_slice %230 {offsets = [80, 0], sizes = [16, 128], strides = [1, 1]} : vector<128x128xf32> to vector<16x128xf32>
    %cst_53 = arith.constant dense<0.000000e+00> : vector<128xf32>
    %247 = vector.multi_reduction <add>, %246, %cst_53 [0] : vector<16x128xf32> to vector<128xf32>
    %248 = vector.shape_cast %247 : vector<128xf32> to vector<1x128xf32>
    %249 = vector.extract_strided_slice %230 {offsets = [96, 0], sizes = [16, 128], strides = [1, 1]} : vector<128x128xf32> to vector<16x128xf32>
    %cst_54 = arith.constant dense<0.000000e+00> : vector<128xf32>
    %250 = vector.multi_reduction <add>, %249, %cst_54 [0] : vector<16x128xf32> to vector<128xf32>
    %251 = vector.shape_cast %250 : vector<128xf32> to vector<1x128xf32>
    %252 = vector.extract_strided_slice %230 {offsets = [112, 0], sizes = [16, 128], strides = [1, 1]} : vector<128x128xf32> to vector<16x128xf32>
    %cst_55 = arith.constant dense<0.000000e+00> : vector<128xf32>
    %253 = vector.multi_reduction <add>, %252, %cst_55 [0] : vector<16x128xf32> to vector<128xf32>
    %254 = vector.shape_cast %253 : vector<128xf32> to vector<1x128xf32>
    %255 = tpu.concatenate %233, %236, %239, %242, %245, %248, %251, %254 in 0 : vector<1x128xf32>, vector<1x128xf32>, vector<1x128xf32>, vector<1x128xf32>, vector<1x128xf32>, vector<1x128xf32>, vector<1x128xf32>, vector<1x128xf32> -> vector<8x128xf32>
    %256 = vector.extract_strided_slice %22 {offsets = [2, 0], sizes = [1, 128], strides = [1, 1]} : vector<7x128xf32> to vector<1x128xf32>
    %257 = vector.broadcast %256 : vector<1x128xf32> to vector<8x128xf32>
    %258 = arith.mulf %96, %257 : vector<8x128xf32>
    %259 = arith.addf %255, %258 : vector<8x128xf32>
    %260 = arith.negf %57 : vector<8x128xf32>
    %261 = math.exp %260 : vector<8x128xf32>
    %cst_56 = arith.constant 1.000000e+00 : f32
    %262 = vector.broadcast %cst_56 : f32 to vector<8x128xf32>
    %263 = arith.addf %262, %261 : vector<8x128xf32>
    %264 = arith.divf %262, %263 : vector<8x128xf32>
    %265 = arith.mulf %57, %264 : vector<8x128xf32>
    %266 = arith.mulf %259, %265 : vector<8x128xf32>
    %267 = arith.truncf %266 : vector<8x128xf32> to vector<8x128xbf16>
    %c0_57 = arith.constant 0 : index
    %c0_58 = arith.constant 0 : index
    %c0_59 = arith.constant 0 : index
    %268 = vector.load %arg4[%c0_57, %c0_58, %c0_59] : memref<2x128x64xbf16, #tpu.memory_space<vmem>>, vector<1x128x64xbf16>
    %269 = vector.shape_cast %268 : vector<1x128x64xbf16> to vector<128x64xbf16>
    %cst_60 = arith.constant dense<0.000000e+00> : vector<8x64xf32>
    %270 = tpu.matmul %267, %269, %cst_60 {dimension_numbers = #tpu.dot_dimension_numbers<[1], [0], [0], [1], [0, 0, 1, 1], [], []>} : vector<8x128xbf16>, vector<128x64xbf16>, vector<8x64xf32> -> vector<8x64xf32>
    %271 = arith.addf %0, %270 : vector<8x64xf32>
    %c1 = arith.constant 1 : index
    %c0_61 = arith.constant 0 : index
    %c0_62 = arith.constant 0 : index
    %272 = vector.load %arg7[%c1, %c0_61, %c0_62] : memref<2x7x128xf32, #tpu.memory_space<vmem>>, vector<1x7x128xf32>
    %273 = vector.shape_cast %272 : vector<1x7x128xf32> to vector<7x128xf32>
    %c1_63 = arith.constant 1 : index
    %c0_64 = arith.constant 0 : index
    %c0_65 = arith.constant 0 : index
    %274 = vector.load %arg5[%c1_63, %c0_64, %c0_65] : memref<2x4x128xf32, #tpu.memory_space<vmem>>, vector<1x4x128xf32>
    %275 = vector.shape_cast %274 : vector<1x4x128xf32> to vector<4x128xf32>
    %c1_66 = arith.constant 1 : index
    %c0_67 = arith.constant 0 : index
    %c0_68 = arith.constant 0 : index
    %276 = vector.load %arg1[%c1_66, %c0_67, %c0_68] : memref<3x1x64xf32, #tpu.memory_space<vmem>>, vector<1x1x64xf32>
    %277 = vector.shape_cast %276 : vector<1x1x64xf32> to vector<1x64xf32>
    %278 = vector.extract_strided_slice %271 {offsets = [0, 0], sizes = [8, 32], strides = [1, 1]} : vector<8x64xf32> to vector<8x32xf32>
    %279 = arith.mulf %278, %278 : vector<8x32xf32>
    %cst_69 = arith.constant dense<0.000000e+00> : vector<8xf32>
    %280 = vector.multi_reduction <add>, %279, %cst_69 [1] : vector<8x32xf32> to vector<8xf32>
    %281 = vector.shape_cast %280 : vector<8xf32> to vector<8x1xf32>
    %cst_70 = arith.constant 3.200000e+01 : f32
    %282 = vector.broadcast %cst_70 : f32 to vector<8x1xf32>
    %283 = arith.divf %281, %282 : vector<8x1xf32>
    %cst_71 = arith.constant 9.99999974E-6 : f32
    %284 = vector.broadcast %cst_71 : f32 to vector<8x1xf32>
    %285 = arith.addf %283, %284 : vector<8x1xf32>
    %286 = math.rsqrt %285 : vector<8x1xf32>
    %287 = vector.broadcast %286 : vector<8x1xf32> to vector<8x32xf32>
    %288 = arith.mulf %278, %287 : vector<8x32xf32>
    %289 = vector.extract_strided_slice %271 {offsets = [0, 32], sizes = [8, 32], strides = [1, 1]} : vector<8x64xf32> to vector<8x32xf32>
    %290 = arith.mulf %289, %289 : vector<8x32xf32>
    %cst_72 = arith.constant dense<0.000000e+00> : vector<8xf32>
    %291 = vector.multi_reduction <add>, %290, %cst_72 [1] : vector<8x32xf32> to vector<8xf32>
    %292 = vector.shape_cast %291 : vector<8xf32> to vector<8x1xf32>
    %cst_73 = arith.constant 3.200000e+01 : f32
    %293 = vector.broadcast %cst_73 : f32 to vector<8x1xf32>
    %294 = arith.divf %292, %293 : vector<8x1xf32>
    %cst_74 = arith.constant 9.99999974E-6 : f32
    %295 = vector.broadcast %cst_74 : f32 to vector<8x1xf32>
    %296 = arith.addf %294, %295 : vector<8x1xf32>
    %297 = math.rsqrt %296 : vector<8x1xf32>
    %298 = vector.broadcast %297 : vector<8x1xf32> to vector<8x32xf32>
    %299 = arith.mulf %289, %298 : vector<8x32xf32>
    %300 = tpu.concatenate %288, %299 in 1 : vector<8x32xf32>, vector<8x32xf32> -> vector<8x64xf32>
    %301 = vector.broadcast %277 : vector<1x64xf32> to vector<8x64xf32>
    %302 = arith.mulf %300, %301 : vector<8x64xf32>
    %303 = arith.truncf %302 : vector<8x64xf32> to vector<8x64xbf16>
    %c1_75 = arith.constant 1 : index
    %c0_76 = arith.constant 0 : index
    %c0_77 = arith.constant 0 : index
    %304 = vector.load %arg2[%c1_75, %c0_76, %c0_77] : memref<2x64x256xbf16, #tpu.memory_space<vmem>>, vector<1x64x256xbf16>
    %305 = vector.shape_cast %304 : vector<1x64x256xbf16> to vector<64x256xbf16>
    %cst_78 = arith.constant dense<0.000000e+00> : vector<8x256xf32>
    %306 = tpu.matmul %303, %305, %cst_78 {dimension_numbers = #tpu.dot_dimension_numbers<[1], [0], [0], [1], [0, 0, 1, 1], [], []>} : vector<8x64xbf16>, vector<64x256xbf16>, vector<8x256xf32> -> vector<8x256xf32>
    %307 = vector.extract_strided_slice %306 {offsets = [0, 0], sizes = [8, 128], strides = [1, 1]} : vector<8x256xf32> to vector<8x128xf32>
    %308 = vector.extract_strided_slice %306 {offsets = [0, 128], sizes = [8, 128], strides = [1, 1]} : vector<8x256xf32> to vector<8x128xf32>
    %309 = vector.extract_strided_slice %273 {offsets = [0, 0], sizes = [1, 128], strides = [1, 1]} : vector<7x128xf32> to vector<1x128xf32>
    %c3_i32_79 = arith.constant 3 : i32
    %310 = vector.broadcast %c3_i32_79 : i32 to vector<8x128xi32>
    %311 = arith.cmpi sge, %1, %310 : vector<8x128xi32>
    %c3_i32_80 = arith.constant 3 : i32
    %312 = tpu.dynamic_rotate %307 by %c3_i32_80 dim 0 : vector<8x128xf32>, i32 -> vector<8x128xf32>
    %cst_81 = arith.constant 0.000000e+00 : f32
    %313 = vector.broadcast %cst_81 : f32 to vector<8x128xf32>
    %314 = arith.select %311, %312, %313 : vector<8x128xi1>, vector<8x128xf32>
    %315 = vector.extract_strided_slice %273 {offsets = [3, 0], sizes = [1, 128], strides = [1, 1]} : vector<7x128xf32> to vector<1x128xf32>
    %316 = vector.broadcast %315 : vector<1x128xf32> to vector<8x128xf32>
    %317 = arith.mulf %314, %316 : vector<8x128xf32>
    %318 = vector.broadcast %309 : vector<1x128xf32> to vector<8x128xf32>
    %319 = arith.addf %318, %317 : vector<8x128xf32>
    %c2_i32_82 = arith.constant 2 : i32
    %320 = vector.broadcast %c2_i32_82 : i32 to vector<8x128xi32>
    %321 = arith.cmpi sge, %1, %320 : vector<8x128xi32>
    %c2_i32_83 = arith.constant 2 : i32
    %322 = tpu.dynamic_rotate %307 by %c2_i32_83 dim 0 : vector<8x128xf32>, i32 -> vector<8x128xf32>
    %cst_84 = arith.constant 0.000000e+00 : f32
    %323 = vector.broadcast %cst_84 : f32 to vector<8x128xf32>
    %324 = arith.select %321, %322, %323 : vector<8x128xi1>, vector<8x128xf32>
    %325 = vector.extract_strided_slice %273 {offsets = [4, 0], sizes = [1, 128], strides = [1, 1]} : vector<7x128xf32> to vector<1x128xf32>
    %326 = vector.broadcast %325 : vector<1x128xf32> to vector<8x128xf32>
    %327 = arith.mulf %324, %326 : vector<8x128xf32>
    %328 = arith.addf %319, %327 : vector<8x128xf32>
    %c1_i32_85 = arith.constant 1 : i32
    %329 = vector.broadcast %c1_i32_85 : i32 to vector<8x128xi32>
    %330 = arith.cmpi sge, %1, %329 : vector<8x128xi32>
    %c1_i32_86 = arith.constant 1 : i32
    %331 = tpu.dynamic_rotate %307 by %c1_i32_86 dim 0 : vector<8x128xf32>, i32 -> vector<8x128xf32>
    %cst_87 = arith.constant 0.000000e+00 : f32
    %332 = vector.broadcast %cst_87 : f32 to vector<8x128xf32>
    %333 = arith.select %330, %331, %332 : vector<8x128xi1>, vector<8x128xf32>
    %334 = vector.extract_strided_slice %273 {offsets = [5, 0], sizes = [1, 128], strides = [1, 1]} : vector<7x128xf32> to vector<1x128xf32>
    %335 = vector.broadcast %334 : vector<1x128xf32> to vector<8x128xf32>
    %336 = arith.mulf %333, %335 : vector<8x128xf32>
    %337 = arith.addf %328, %336 : vector<8x128xf32>
    %338 = vector.extract_strided_slice %273 {offsets = [6, 0], sizes = [1, 128], strides = [1, 1]} : vector<7x128xf32> to vector<1x128xf32>
    %339 = vector.broadcast %338 : vector<1x128xf32> to vector<8x128xf32>
    %340 = arith.mulf %307, %339 : vector<8x128xf32>
    %341 = arith.addf %337, %340 : vector<8x128xf32>
    %342 = arith.negf %341 : vector<8x128xf32>
    %343 = math.exp %342 : vector<8x128xf32>
    %cst_88 = arith.constant 1.000000e+00 : f32
    %344 = vector.broadcast %cst_88 : f32 to vector<8x128xf32>
    %345 = arith.addf %344, %343 : vector<8x128xf32>
    %346 = arith.divf %344, %345 : vector<8x128xf32>
    %347 = arith.mulf %341, %346 : vector<8x128xf32>
    %348 = arith.truncf %347 : vector<8x128xf32> to vector<8x128xbf16>
    %c1_89 = arith.constant 1 : index
    %c0_90 = arith.constant 0 : index
    %c0_91 = arith.constant 0 : index
    %349 = vector.load %arg3[%c1_89, %c0_90, %c0_91] : memref<2x128x68xbf16, #tpu.memory_space<vmem>>, vector<1x128x68xbf16>
    %350 = vector.shape_cast %349 : vector<1x128x68xbf16> to vector<128x68xbf16>
    %cst_92 = arith.constant dense<0.000000e+00> : vector<8x68xf32>
    %351 = tpu.matmul %348, %350, %cst_92 {dimension_numbers = #tpu.dot_dimension_numbers<[1], [0], [0], [1], [0, 0, 1, 1], [], []>} : vector<8x128xbf16>, vector<128x68xbf16>, vector<8x68xf32> -> vector<8x68xf32>
    %352 = vector.extract_strided_slice %273 {offsets = [1, 0], sizes = [1, 128], strides = [1, 1]} : vector<7x128xf32> to vector<1x128xf32>
    %353 = vector.extract_strided_slice %351 {offsets = [0, 0], sizes = [8, 1], strides = [1, 1]} : vector<8x68xf32> to vector<8x1xf32>
    %354 = vector.extract_strided_slice %275 {offsets = [0, 0], sizes = [1, 128], strides = [1, 1]} : vector<4x128xf32> to vector<1x128xf32>
    %355 = vector.broadcast %353 : vector<8x1xf32> to vector<8x128xf32>
    %356 = vector.broadcast %354 : vector<1x128xf32> to vector<8x128xf32>
    %357 = arith.mulf %355, %356 : vector<8x128xf32>
    %358 = vector.broadcast %352 : vector<1x128xf32> to vector<8x128xf32>
    %359 = arith.addf %358, %357 : vector<8x128xf32>
    %360 = vector.extract_strided_slice %351 {offsets = [0, 1], sizes = [8, 1], strides = [1, 1]} : vector<8x68xf32> to vector<8x1xf32>
    %361 = vector.extract_strided_slice %275 {offsets = [1, 0], sizes = [1, 128], strides = [1, 1]} : vector<4x128xf32> to vector<1x128xf32>
    %362 = vector.broadcast %360 : vector<8x1xf32> to vector<8x128xf32>
    %363 = vector.broadcast %361 : vector<1x128xf32> to vector<8x128xf32>
    %364 = arith.mulf %362, %363 : vector<8x128xf32>
    %365 = arith.addf %359, %364 : vector<8x128xf32>
    %366 = vector.extract_strided_slice %351 {offsets = [0, 2], sizes = [8, 1], strides = [1, 1]} : vector<8x68xf32> to vector<8x1xf32>
    %367 = vector.extract_strided_slice %275 {offsets = [2, 0], sizes = [1, 128], strides = [1, 1]} : vector<4x128xf32> to vector<1x128xf32>
    %368 = vector.broadcast %366 : vector<8x1xf32> to vector<8x128xf32>
    %369 = vector.broadcast %367 : vector<1x128xf32> to vector<8x128xf32>
    %370 = arith.mulf %368, %369 : vector<8x128xf32>
    %371 = arith.addf %365, %370 : vector<8x128xf32>
    %372 = vector.extract_strided_slice %351 {offsets = [0, 3], sizes = [8, 1], strides = [1, 1]} : vector<8x68xf32> to vector<8x1xf32>
    %373 = vector.extract_strided_slice %275 {offsets = [3, 0], sizes = [1, 128], strides = [1, 1]} : vector<4x128xf32> to vector<1x128xf32>
    %374 = vector.broadcast %372 : vector<8x1xf32> to vector<8x128xf32>
    %375 = vector.broadcast %373 : vector<1x128xf32> to vector<8x128xf32>
    %376 = arith.mulf %374, %375 : vector<8x128xf32>
    %377 = arith.addf %371, %376 : vector<8x128xf32>
    %cst_93 = arith.constant 2.000000e+01 : f32
    %378 = vector.broadcast %cst_93 : f32 to vector<8x128xf32>
    %379 = arith.cmpf ogt, %377, %378 : vector<8x128xf32>
    %cst_94 = arith.constant 2.000000e+01 : f32
    %380 = vector.broadcast %cst_94 : f32 to vector<8x128xf32>
    %381 = arith.minimumf %377, %380 : vector<8x128xf32>
    %382 = math.exp %381 : vector<8x128xf32>
    %383 = math.log1p %382 : vector<8x128xf32>
    %384 = arith.select %379, %377, %383 : vector<8x128xi1>, vector<8x128xf32>
    %385 = arith.mulf %384, %347 : vector<8x128xf32>
    %386 = vector.shape_cast %384 : vector<8x128xf32> to vector<8x1x128xf32>
    %387 = vector.shape_cast %386 : vector<8x1x128xf32> to vector<8x1x128xf32>
    %388 = vector.broadcast %387 : vector<8x1x128xf32> to vector<8x16x128xf32>
    %389 = vector.shape_cast %388 : vector<8x16x128xf32> to vector<128x128xf32>
    %390 = vector.shape_cast %385 : vector<8x128xf32> to vector<8x1x128xf32>
    %391 = vector.shape_cast %390 : vector<8x1x128xf32> to vector<8x1x128xf32>
    %392 = vector.broadcast %391 : vector<8x1x128xf32> to vector<8x16x128xf32>
    %393 = vector.shape_cast %392 : vector<8x16x128xf32> to vector<128x128xf32>
    %c1_95 = arith.constant 1 : index
    %c0_96 = arith.constant 0 : index
    %c0_97 = arith.constant 0 : index
    %394 = vector.load %arg6[%c1_95, %c0_96, %c0_97] : memref<2x128x128xf32, #tpu.memory_space<vmem>>, vector<1x128x128xf32>
    %395 = vector.shape_cast %394 : vector<1x128x128xf32> to vector<128x128xf32>
    %396 = arith.mulf %389, %395 : vector<128x128xf32>
    %397 = math.exp %396 : vector<128x128xf32>
    %398 = vector.extract_strided_slice %351 {offsets = [0, 4], sizes = [8, 16], strides = [1, 1]} : vector<8x68xf32> to vector<8x16xf32>
    %399 = vector.extract_strided_slice %351 {offsets = [0, 36], sizes = [8, 16], strides = [1, 1]} : vector<8x68xf32> to vector<8x16xf32>
    %400 = vector.shape_cast %398 : vector<8x16xf32> to vector<8x1x16xf32>
    %401 = vector.shape_cast %400 : vector<8x1x16xf32> to vector<8x1x16xf32>
    %402 = vector.broadcast %401 : vector<8x1x16xf32> to vector<8x16x16xf32>
    %403 = vector.shape_cast %402 : vector<8x16x16xf32> to vector<128x16xf32>
    %404 = vector.shape_cast %399 : vector<8x16xf32> to vector<8x1x16xf32>
    %405 = vector.shape_cast %404 : vector<8x1x16xf32> to vector<8x1x16xf32>
    %406 = vector.broadcast %405 : vector<8x1x16xf32> to vector<8x16x16xf32>
    %407 = vector.shape_cast %406 : vector<8x16x16xf32> to vector<128x16xf32>
    %cst_98 = arith.constant 0.000000e+00 : f32
    %408 = vector.broadcast %cst_98 : f32 to vector<128x16xf32>
    %409 = arith.select %20, %403, %408 : vector<128x16xi1>, vector<128x16xf32>
    %cst_99 = arith.constant dense<0.000000e+00> : vector<128xf32>
    %410 = vector.multi_reduction <add>, %409, %cst_99 [1] : vector<128x16xf32> to vector<128xf32>
    %411 = vector.shape_cast %410 : vector<128xf32> to vector<128x1xf32>
    %cst_100 = arith.constant 0.000000e+00 : f32
    %412 = vector.broadcast %cst_100 : f32 to vector<128x16xf32>
    %413 = arith.select %20, %407, %412 : vector<128x16xi1>, vector<128x16xf32>
    %cst_101 = arith.constant dense<0.000000e+00> : vector<128xf32>
    %414 = vector.multi_reduction <add>, %413, %cst_101 [1] : vector<128x16xf32> to vector<128xf32>
    %415 = vector.shape_cast %414 : vector<128xf32> to vector<128x1xf32>
    %416 = vector.extract_strided_slice %393 {offsets = [0, 0], sizes = [128, 64], strides = [1, 1]} : vector<128x128xf32> to vector<128x64xf32>
    %417 = vector.broadcast %411 : vector<128x1xf32> to vector<128x64xf32>
    %418 = arith.mulf %416, %417 : vector<128x64xf32>
    %419 = vector.extract_strided_slice %351 {offsets = [0, 20], sizes = [8, 16], strides = [1, 1]} : vector<8x68xf32> to vector<8x16xf32>
    %420 = vector.extract_strided_slice %351 {offsets = [0, 52], sizes = [8, 16], strides = [1, 1]} : vector<8x68xf32> to vector<8x16xf32>
    %421 = vector.shape_cast %419 : vector<8x16xf32> to vector<8x1x16xf32>
    %422 = vector.shape_cast %421 : vector<8x1x16xf32> to vector<8x1x16xf32>
    %423 = vector.broadcast %422 : vector<8x1x16xf32> to vector<8x16x16xf32>
    %424 = vector.shape_cast %423 : vector<8x16x16xf32> to vector<128x16xf32>
    %425 = vector.shape_cast %420 : vector<8x16xf32> to vector<8x1x16xf32>
    %426 = vector.shape_cast %425 : vector<8x1x16xf32> to vector<8x1x16xf32>
    %427 = vector.broadcast %426 : vector<8x1x16xf32> to vector<8x16x16xf32>
    %428 = vector.shape_cast %427 : vector<8x16x16xf32> to vector<128x16xf32>
    %cst_102 = arith.constant 0.000000e+00 : f32
    %429 = vector.broadcast %cst_102 : f32 to vector<128x16xf32>
    %430 = arith.select %20, %424, %429 : vector<128x16xi1>, vector<128x16xf32>
    %cst_103 = arith.constant dense<0.000000e+00> : vector<128xf32>
    %431 = vector.multi_reduction <add>, %430, %cst_103 [1] : vector<128x16xf32> to vector<128xf32>
    %432 = vector.shape_cast %431 : vector<128xf32> to vector<128x1xf32>
    %cst_104 = arith.constant 0.000000e+00 : f32
    %433 = vector.broadcast %cst_104 : f32 to vector<128x16xf32>
    %434 = arith.select %20, %428, %433 : vector<128x16xi1>, vector<128x16xf32>
    %cst_105 = arith.constant dense<0.000000e+00> : vector<128xf32>
    %435 = vector.multi_reduction <add>, %434, %cst_105 [1] : vector<128x16xf32> to vector<128xf32>
    %436 = vector.shape_cast %435 : vector<128xf32> to vector<128x1xf32>
    %437 = vector.extract_strided_slice %393 {offsets = [0, 64], sizes = [128, 64], strides = [1, 1]} : vector<128x128xf32> to vector<128x64xf32>
    %438 = vector.broadcast %432 : vector<128x1xf32> to vector<128x64xf32>
    %439 = arith.mulf %437, %438 : vector<128x64xf32>
    %440 = tpu.concatenate %418, %439 in 1 : vector<128x64xf32>, vector<128x64xf32> -> vector<128x128xf32>
    %cst_106 = arith.constant 0.000000e+00 : f32
    %441 = vector.broadcast %cst_106 : f32 to vector<16x128xf32>
    %442 = vector.extract_strided_slice %397 {offsets = [0, 0], sizes = [16, 128], strides = [1, 1]} : vector<128x128xf32> to vector<16x128xf32>
    %443 = arith.mulf %442, %441 : vector<16x128xf32>
    %444 = vector.extract_strided_slice %440 {offsets = [0, 0], sizes = [16, 128], strides = [1, 1]} : vector<128x128xf32> to vector<16x128xf32>
    %445 = arith.addf %443, %444 : vector<16x128xf32>
    %446 = vector.extract_strided_slice %397 {offsets = [16, 0], sizes = [16, 128], strides = [1, 1]} : vector<128x128xf32> to vector<16x128xf32>
    %447 = arith.mulf %446, %445 : vector<16x128xf32>
    %448 = vector.extract_strided_slice %440 {offsets = [16, 0], sizes = [16, 128], strides = [1, 1]} : vector<128x128xf32> to vector<16x128xf32>
    %449 = arith.addf %447, %448 : vector<16x128xf32>
    %450 = vector.extract_strided_slice %397 {offsets = [32, 0], sizes = [16, 128], strides = [1, 1]} : vector<128x128xf32> to vector<16x128xf32>
    %451 = arith.mulf %450, %449 : vector<16x128xf32>
    %452 = vector.extract_strided_slice %440 {offsets = [32, 0], sizes = [16, 128], strides = [1, 1]} : vector<128x128xf32> to vector<16x128xf32>
    %453 = arith.addf %451, %452 : vector<16x128xf32>
    %454 = vector.extract_strided_slice %397 {offsets = [48, 0], sizes = [16, 128], strides = [1, 1]} : vector<128x128xf32> to vector<16x128xf32>
    %455 = arith.mulf %454, %453 : vector<16x128xf32>
    %456 = vector.extract_strided_slice %440 {offsets = [48, 0], sizes = [16, 128], strides = [1, 1]} : vector<128x128xf32> to vector<16x128xf32>
    %457 = arith.addf %455, %456 : vector<16x128xf32>
    %458 = vector.extract_strided_slice %397 {offsets = [64, 0], sizes = [16, 128], strides = [1, 1]} : vector<128x128xf32> to vector<16x128xf32>
    %459 = arith.mulf %458, %457 : vector<16x128xf32>
    %460 = vector.extract_strided_slice %440 {offsets = [64, 0], sizes = [16, 128], strides = [1, 1]} : vector<128x128xf32> to vector<16x128xf32>
    %461 = arith.addf %459, %460 : vector<16x128xf32>
    %462 = vector.extract_strided_slice %397 {offsets = [80, 0], sizes = [16, 128], strides = [1, 1]} : vector<128x128xf32> to vector<16x128xf32>
    %463 = arith.mulf %462, %461 : vector<16x128xf32>
    %464 = vector.extract_strided_slice %440 {offsets = [80, 0], sizes = [16, 128], strides = [1, 1]} : vector<128x128xf32> to vector<16x128xf32>
    %465 = arith.addf %463, %464 : vector<16x128xf32>
    %466 = vector.extract_strided_slice %397 {offsets = [96, 0], sizes = [16, 128], strides = [1, 1]} : vector<128x128xf32> to vector<16x128xf32>
    %467 = arith.mulf %466, %465 : vector<16x128xf32>
    %468 = vector.extract_strided_slice %440 {offsets = [96, 0], sizes = [16, 128], strides = [1, 1]} : vector<128x128xf32> to vector<16x128xf32>
    %469 = arith.addf %467, %468 : vector<16x128xf32>
    %470 = vector.extract_strided_slice %397 {offsets = [112, 0], sizes = [16, 128], strides = [1, 1]} : vector<128x128xf32> to vector<16x128xf32>
    %471 = arith.mulf %470, %469 : vector<16x128xf32>
    %472 = vector.extract_strided_slice %440 {offsets = [112, 0], sizes = [16, 128], strides = [1, 1]} : vector<128x128xf32> to vector<16x128xf32>
    %473 = arith.addf %471, %472 : vector<16x128xf32>
    %474 = tpu.concatenate %445, %449, %453, %457, %461, %465, %469, %473 in 0 : vector<16x128xf32>, vector<16x128xf32>, vector<16x128xf32>, vector<16x128xf32>, vector<16x128xf32>, vector<16x128xf32>, vector<16x128xf32>, vector<16x128xf32> -> vector<128x128xf32>
    %475 = vector.extract_strided_slice %474 {offsets = [0, 0], sizes = [128, 64], strides = [1, 1]} : vector<128x128xf32> to vector<128x64xf32>
    %476 = vector.broadcast %415 : vector<128x1xf32> to vector<128x64xf32>
    %477 = arith.mulf %475, %476 : vector<128x64xf32>
    %478 = vector.extract_strided_slice %474 {offsets = [0, 64], sizes = [128, 64], strides = [1, 1]} : vector<128x128xf32> to vector<128x64xf32>
    %479 = vector.broadcast %436 : vector<128x1xf32> to vector<128x64xf32>
    %480 = arith.mulf %478, %479 : vector<128x64xf32>
    %481 = tpu.concatenate %477, %480 in 1 : vector<128x64xf32>, vector<128x64xf32> -> vector<128x128xf32>
    %482 = vector.extract_strided_slice %481 {offsets = [0, 0], sizes = [16, 128], strides = [1, 1]} : vector<128x128xf32> to vector<16x128xf32>
    %cst_107 = arith.constant dense<0.000000e+00> : vector<128xf32>
    %483 = vector.multi_reduction <add>, %482, %cst_107 [0] : vector<16x128xf32> to vector<128xf32>
    %484 = vector.shape_cast %483 : vector<128xf32> to vector<1x128xf32>
    %485 = vector.extract_strided_slice %481 {offsets = [16, 0], sizes = [16, 128], strides = [1, 1]} : vector<128x128xf32> to vector<16x128xf32>
    %cst_108 = arith.constant dense<0.000000e+00> : vector<128xf32>
    %486 = vector.multi_reduction <add>, %485, %cst_108 [0] : vector<16x128xf32> to vector<128xf32>
    %487 = vector.shape_cast %486 : vector<128xf32> to vector<1x128xf32>
    %488 = vector.extract_strided_slice %481 {offsets = [32, 0], sizes = [16, 128], strides = [1, 1]} : vector<128x128xf32> to vector<16x128xf32>
    %cst_109 = arith.constant dense<0.000000e+00> : vector<128xf32>
    %489 = vector.multi_reduction <add>, %488, %cst_109 [0] : vector<16x128xf32> to vector<128xf32>
    %490 = vector.shape_cast %489 : vector<128xf32> to vector<1x128xf32>
    %491 = vector.extract_strided_slice %481 {offsets = [48, 0], sizes = [16, 128], strides = [1, 1]} : vector<128x128xf32> to vector<16x128xf32>
    %cst_110 = arith.constant dense<0.000000e+00> : vector<128xf32>
    %492 = vector.multi_reduction <add>, %491, %cst_110 [0] : vector<16x128xf32> to vector<128xf32>
    %493 = vector.shape_cast %492 : vector<128xf32> to vector<1x128xf32>
    %494 = vector.extract_strided_slice %481 {offsets = [64, 0], sizes = [16, 128], strides = [1, 1]} : vector<128x128xf32> to vector<16x128xf32>
    %cst_111 = arith.constant dense<0.000000e+00> : vector<128xf32>
    %495 = vector.multi_reduction <add>, %494, %cst_111 [0] : vector<16x128xf32> to vector<128xf32>
    %496 = vector.shape_cast %495 : vector<128xf32> to vector<1x128xf32>
    %497 = vector.extract_strided_slice %481 {offsets = [80, 0], sizes = [16, 128], strides = [1, 1]} : vector<128x128xf32> to vector<16x128xf32>
    %cst_112 = arith.constant dense<0.000000e+00> : vector<128xf32>
    %498 = vector.multi_reduction <add>, %497, %cst_112 [0] : vector<16x128xf32> to vector<128xf32>
    %499 = vector.shape_cast %498 : vector<128xf32> to vector<1x128xf32>
    %500 = vector.extract_strided_slice %481 {offsets = [96, 0], sizes = [16, 128], strides = [1, 1]} : vector<128x128xf32> to vector<16x128xf32>
    %cst_113 = arith.constant dense<0.000000e+00> : vector<128xf32>
    %501 = vector.multi_reduction <add>, %500, %cst_113 [0] : vector<16x128xf32> to vector<128xf32>
    %502 = vector.shape_cast %501 : vector<128xf32> to vector<1x128xf32>
    %503 = vector.extract_strided_slice %481 {offsets = [112, 0], sizes = [16, 128], strides = [1, 1]} : vector<128x128xf32> to vector<16x128xf32>
    %cst_114 = arith.constant dense<0.000000e+00> : vector<128xf32>
    %504 = vector.multi_reduction <add>, %503, %cst_114 [0] : vector<16x128xf32> to vector<128xf32>
    %505 = vector.shape_cast %504 : vector<128xf32> to vector<1x128xf32>
    %506 = tpu.concatenate %484, %487, %490, %493, %496, %499, %502, %505 in 0 : vector<1x128xf32>, vector<1x128xf32>, vector<1x128xf32>, vector<1x128xf32>, vector<1x128xf32>, vector<1x128xf32>, vector<1x128xf32>, vector<1x128xf32> -> vector<8x128xf32>
    %507 = vector.extract_strided_slice %273 {offsets = [2, 0], sizes = [1, 128], strides = [1, 1]} : vector<7x128xf32> to vector<1x128xf32>
    %508 = vector.broadcast %507 : vector<1x128xf32> to vector<8x128xf32>
    %509 = arith.mulf %347, %508 : vector<8x128xf32>
    %510 = arith.addf %506, %509 : vector<8x128xf32>
    %511 = arith.negf %308 : vector<8x128xf32>
    %512 = math.exp %511 : vector<8x128xf32>
    %cst_115 = arith.constant 1.000000e+00 : f32
    %513 = vector.broadcast %cst_115 : f32 to vector<8x128xf32>
    %514 = arith.addf %513, %512 : vector<8x128xf32>
    %515 = arith.divf %513, %514 : vector<8x128xf32>
    %516 = arith.mulf %308, %515 : vector<8x128xf32>
    %517 = arith.mulf %510, %516 : vector<8x128xf32>
    %518 = arith.truncf %517 : vector<8x128xf32> to vector<8x128xbf16>
    %c1_116 = arith.constant 1 : index
    %c0_117 = arith.constant 0 : index
    %c0_118 = arith.constant 0 : index
    %519 = vector.load %arg4[%c1_116, %c0_117, %c0_118] : memref<2x128x64xbf16, #tpu.memory_space<vmem>>, vector<1x128x64xbf16>
    %520 = vector.shape_cast %519 : vector<1x128x64xbf16> to vector<128x64xbf16>
    %cst_119 = arith.constant dense<0.000000e+00> : vector<8x64xf32>
    %521 = tpu.matmul %518, %520, %cst_119 {dimension_numbers = #tpu.dot_dimension_numbers<[1], [0], [0], [1], [0, 0, 1, 1], [], []>} : vector<8x128xbf16>, vector<128x64xbf16>, vector<8x64xf32> -> vector<8x64xf32>
    %522 = arith.addf %271, %521 : vector<8x64xf32>
    %c2 = arith.constant 2 : index
    %c0_120 = arith.constant 0 : index
    %c0_121 = arith.constant 0 : index
    %523 = vector.load %arg1[%c2, %c0_120, %c0_121] : memref<3x1x64xf32, #tpu.memory_space<vmem>>, vector<1x1x64xf32>
    %524 = vector.shape_cast %523 : vector<1x1x64xf32> to vector<1x64xf32>
    %525 = vector.extract_strided_slice %522 {offsets = [0, 0], sizes = [8, 32], strides = [1, 1]} : vector<8x64xf32> to vector<8x32xf32>
    %526 = arith.mulf %525, %525 : vector<8x32xf32>
    %cst_122 = arith.constant dense<0.000000e+00> : vector<8xf32>
    %527 = vector.multi_reduction <add>, %526, %cst_122 [1] : vector<8x32xf32> to vector<8xf32>
    %528 = vector.shape_cast %527 : vector<8xf32> to vector<8x1xf32>
    %cst_123 = arith.constant 3.200000e+01 : f32
    %529 = vector.broadcast %cst_123 : f32 to vector<8x1xf32>
    %530 = arith.divf %528, %529 : vector<8x1xf32>
    %cst_124 = arith.constant 9.99999974E-6 : f32
    %531 = vector.broadcast %cst_124 : f32 to vector<8x1xf32>
    %532 = arith.addf %530, %531 : vector<8x1xf32>
    %533 = math.rsqrt %532 : vector<8x1xf32>
    %534 = vector.broadcast %533 : vector<8x1xf32> to vector<8x32xf32>
    %535 = arith.mulf %525, %534 : vector<8x32xf32>
    %536 = vector.extract_strided_slice %522 {offsets = [0, 32], sizes = [8, 32], strides = [1, 1]} : vector<8x64xf32> to vector<8x32xf32>
    %537 = arith.mulf %536, %536 : vector<8x32xf32>
    %cst_125 = arith.constant dense<0.000000e+00> : vector<8xf32>
    %538 = vector.multi_reduction <add>, %537, %cst_125 [1] : vector<8x32xf32> to vector<8xf32>
    %539 = vector.shape_cast %538 : vector<8xf32> to vector<8x1xf32>
    %cst_126 = arith.constant 3.200000e+01 : f32
    %540 = vector.broadcast %cst_126 : f32 to vector<8x1xf32>
    %541 = arith.divf %539, %540 : vector<8x1xf32>
    %cst_127 = arith.constant 9.99999974E-6 : f32
    %542 = vector.broadcast %cst_127 : f32 to vector<8x1xf32>
    %543 = arith.addf %541, %542 : vector<8x1xf32>
    %544 = math.rsqrt %543 : vector<8x1xf32>
    %545 = vector.broadcast %544 : vector<8x1xf32> to vector<8x32xf32>
    %546 = arith.mulf %536, %545 : vector<8x32xf32>
    %547 = tpu.concatenate %535, %546 in 1 : vector<8x32xf32>, vector<8x32xf32> -> vector<8x64xf32>
    %548 = vector.broadcast %524 : vector<1x64xf32> to vector<8x64xf32>
    %549 = arith.mulf %547, %548 : vector<8x64xf32>
    %c0_128 = arith.constant 0 : index
    %c0_129 = arith.constant 0 : index
    %550 = vector.load %arg8[%c0_128, %c0_129] : memref<8x64xf32, #tpu.memory_space<vmem>>, vector<8x64xf32>
    tpu.vector_store %arg8[%c0_128, %c0_129], %549 {strides = array<i32>} : memref<8x64xf32, #tpu.memory_space<vmem>>, vector<8x64xf32>,
    return
  }
}

</mosaic_0001>

<bundles_post_ra>
// kernel: tpu_custom_call.1
= control target key start
LH: loop header
LB: loop body
LE: loop exit
PB: predicated region body
PF: predicated region fallthrough
CT: control target
= control target key end

     0   :  { %s3395_s29 = smov 96   ;;  %s4947_s0 = inlined_call_operand.vmem [shape: f32[8,64], index: 0, kind: input, shape index: {}]   ;;  %s4948_s1 = inlined_call_operand.vmem [shape: f32[3,1,64], index: 1, kind: input, shape index: {}]   ;;  %s4949_s2 = inlined_call_operand.vmem [shape: bf16[2,64,256], index: 2, kind: input, shape index: {}]   ;;  %s4950_s3 = inlined_call_operand.vmem [shape: bf16[2,128,68], index: 3, kind: input, shape index: {}]   ;;  %s4951_s4 = inlined_call_operand.vmem [shape: bf16[2,128,64], index: 4, kind: input, shape index: {}]   ;;  %s4952_s5 = inlined_call_operand.vmem [shape: f32[2,4,128], index: 5, kind: input, shape index: {}]   ;;  %s4953_s6 = inlined_call_operand.vmem [shape: f32[2,128,128], index: 6, kind: input, shape index: {}]   ;;  %s4954_s7 = inlined_call_operand.vmem [shape: f32[2,7,128], index: 7, kind: input, shape index: {}]   ;;  %s4955_s8 = inlined_call_operand.hbm [shape: f32[8,64], index: 8, kind: output, shape index: {}]  }
   0x1   :  { %v31_v0 = vld [vmem:[%s4947_s0] sm:$0xff] }
   0x2   :  { %v262_v1 = vmul.f32 %v31_v0, %v31_v0 }
   0x4   :  { %273 = vrot.lane.b32.xlu0 %v262_v1, %s3395_s29 }
   0x5   :  { %13 = vsyncpa [#allocation3], 0  ;;  %vm4959_vm0 = vcmask 261120   ;;  %v3212_v5 = vld [vmem:[%s4949_s2 + $0x4] ss:$8 sps:$4 sm:$0xff]   ;;  %v3396_v9 = vmov 0   ;;  %v32_v38 = vlaneseq }
   0x6   :  { %v264_v2 = vsel %vm4959_vm0, %v262_v1, 0.0  ;;  %v3214_v6 = vld [vmem:[%s4949_s2] ss:$8 sps:$4 sm:$0xff]   ;;  %v3215_v7 = vld [vmem:[%s4949_s2 + $0x14] ss:$8 sps:$4 sm:$0xff]   ;;  %344 = vmatprep.subr.bf16.mxu0 %v3212_v5  ;;  %376 = vmatprep.mubr.bf16.mxu0 %v3396_v9  ;;  %vm4962_vm1 = vcmask 523264  }
   0x7   :  { %345 = vmatpush1.bf16.msra.mxu0 %v3214_v6  ;;  %v3217_v8 = vld [vmem:[%s4949_s2 + $0x10] ss:$8 sps:$4 sm:$0xff]   ;;  %v3218_v10 = vld [vmem:[%s4949_s2 + $0x24] ss:$8 sps:$4 sm:$0xff]   ;;  %3204 = vset.pattern.permute.xlu1 %v3396_v9  ;;  %v3220_v11 = vld [vmem:[%s4949_s2 + $0x20] ss:$8 sps:$4 sm:$0xff]  }
   0x8   :  { %346 = vmatprep.subr.bf16.mxu0 %v3215_v7  ;;  %v3221_v12 = vld [vmem:[%s4949_s2 + $0x34] ss:$8 sps:$4 sm:$0xff]   ;;  %v3223_v13 = vld [vmem:[%s4949_s2 + $0x30] ss:$8 sps:$4 sm:$0xff]   ;;  %v2958_v23 = vld [vmem:[%s4948_s1] ss:$0 sm:$0xff] }
   0x9   :  { %v3224_v28 = vld [vmem:[%s4950_s3] sm:$0xff]   ;;  %v4973_v29 = vmov 0.0   ;;  %v3225_v30 = vld [vmem:[%s4950_s3 + $0x8] sm:$0xff]   ;;  %v3226_v31 = vld [vmem:[%s4950_s3 + $0x10] sm:$0xff]   ;;  %vm4960_vm2 = vmmov 0   ;;  %v3399_v37 = vmov 1  }
   0xa   :  { %3111 = vmatprep.subr.bf16.mxu1 %v4973_v29  ;;  %v3227_v32 = vld [vmem:[%s4950_s3 + $0x18] sm:$0xff]   ;;  %v3228_v33 = vld [vmem:[%s4950_s3 + $0x20] sm:$0xff]   ;;  %v3229_v34 = vld [vmem:[%s4950_s3 + $0x28] sm:$0xff]   ;;  %3127 = vmatprep.mubr.msk.bf16.mxu1 %vm4960_vm2, %v4973_v29  ;;  %v3529_v39 = vshrl.u32 %v32_v38, 7  ;;  %s3402_s23 = smov 92   ;;  %s3404_s24 = smov 76  }
   0xb   :  { %347 = vmatpush1.bf16.msra.mxu0 %v3217_v8  ;;  %3112 = vmatpush3.bf16.msra.mxu1 %v3224_v28  ;;  %v3230_v35 = vld [vmem:[%s4950_s3 + $0x30] sm:$0xff]   ;;  %v3231_v36 = vld [vmem:[%s4950_s3 + $0x38] sm:$0xff]   ;;  %v3541_v43 = vld [vmem:[%s4954_s7] sm:$0x7f]  ;;  %s3405_s25 = smov 124   ;;  %s3406_s26 = smov 108  }
   0xc   :  { %348 = vmatprep.subr.bf16.mxu0 %v3218_v10  ;;  %3113 = vmatprep.subr.bf16.mxu1 %v4973_v29  ;;  %5028 = vst [vmem:[#allocation5_spill] sm:$0xff] %v3529_v39  ;;  %v3532_v40 = vsub.s32 3, %v3529_v39  ;;  %v3535_v41 = vsub.s32 0, %v3529_v39  ;;  %v4972_v42 = vsub.s32 4, %v3529_v39  ;;  %vm4958_vm3 = vcmp.ge.s32.totalorder %v3529_v39, 3 }
   0xd   :  { %3205 = vset.pattern.permute.xlu0 %v3399_v37  ;;  %vm4957_vm4 = vcmp.ge.s32.totalorder %v3529_v39, 2  ;;  %v4971_v46 = vsub.s32 5, %v3529_v39  ;;  %vm4956_vm5 = vcmp.ge.s32.totalorder %v3529_v39, 1  ;;  %v4970_v53 = vsub.s32 6, %v3529_v39 }
   0xe   :  { %5029 = vst [vmem:[#allocation6_spill] sm:$0xff] %v3532_v40  ;;  %v391_v45 = vrot.slane %v3541_v43, %v3532_v40  ;;  %v396_v51 = vrot.slane %v3541_v43, %v3535_v41  ;;  %v404_v52 = vrot.slane %v3541_v43, %v4972_v42  ;;  %vm4965_vm8 = vcmask 130048  }
   0xf   :  { %349 = vmatpush1.bf16.msra.mxu0 %v3220_v11  ;;  %3114 = vmatpush3.bf16.msra.mxu1 %v3225_v30  ;;  %v413_v59 = vrot.slane %v3541_v43, %v4971_v46  ;;  %v419_v63 = vrot.slane %v3541_v43, %v4970_v53  ;;  %v776_v46 = vld [vmem:[%s4953_s6 + $0x10] sm:$0xff] }
  0x10   :  { %350 = vmatprep.subr.bf16.mxu0 %v3221_v12  ;;  %3115 = vmatprep.subr.bf16.mxu1 %v4973_v29  ;;  %v3400_v12 = vmov 1966171168  }
  0x13   :  { %351 = vmatpush1.bf16.msra.mxu0 %v3223_v13  ;;  %3116 = vmatpush3.bf16.msra.mxu1 %v3226_v31  ;;  %v597_v13 = vunpack.c.l.s4 %v3400_v12 }
  0x14   :  { %3131 = vmatprep.subr.bf16.mxu0 %v4973_v29  ;;  %3117 = vmatprep.subr.bf16.mxu1 %v4973_v29 }
  0x17   :  { %3118 = vmatpush3.bf16.msra.mxu1 %v3227_v32 }
  0x18   :  { %3119 = vmatprep.subr.bf16.mxu1 %v4973_v29 }
  0x1b   :  { %3120 = vmatpush3.bf16.msra.mxu1 %v3228_v33 }
  0x1c   :  { %3121 = vmatprep.subr.bf16.mxu1 %v4973_v29 }
  0x1f   :  { %3122 = vmatpush3.bf16.msra.mxu1 %v3229_v34 }
  0x20   :  { %3123 = vmatprep.subr.bf16.mxu1 %v4973_v29 }
  0x23   :  { %265 = vadd.xlane.f32.xlu0 %v264_v2  ;;  %3124 = vmatpush3.bf16.msra.mxu1 %v3230_v35 }
  0x24   :  { %3125 = vmatprep.subr.bf16.mxu1 %v4973_v29 }
  0x27   :  { %3126 = vmatpush3.bf16.msra.mxu1 %v3231_v36 }
  0x76   :  { %v274_v3 = vpop.permute.xlu0 %273 }
  0x77   :  { %v276_v4 = vsel %vm4959_vm0, %v274_v3, 0.0 }
  0x78   :  { %277 = vadd.xlane.f32.xlu1 %v276_v4 }
  0xb0   :  { %v266_v14 = vpop.xlane.xlu0 %265 }
  0xb1   :  { %v268_v15 = vmul.f32 0.03125, %v266_v14  ;;  %v598_v14 = vunpack.c.0.s8 %v597_v13 }
  0xb3   :  { %v269_v16 = vadd.f32 1e-05, %v268_v15  ;;  %v3575_v15 = vsub.s32 %v598_v14, %v3529_v39 }
  0xb5   :  { %3268 = vrsqrt.f32 %v269_v16  ;;  %5030 = vst [vmem:[#allocation7_spill] sm:$0xff] %v3575_v15 }
  0xbf   :  { %v3269_v20 = vpop.eup %3268 }
  0xc0   :  { %v271_v21 = vmul.f32 %v3269_v20, %v31_v0 }
 0x105   :  { %v278_v17 = vpop.xlane.xlu1 %277 }
 0x106   :  { %v279_v18 = vmul.f32 0.03125, %v278_v17 }
 0x108   :  { %v280_v19 = vadd.f32 1e-05, %v279_v18 }
 0x10a   :  { %3270 = vrsqrt.f32 %v280_v19 }
 0x114   :  { %v3271_v22 = vpop.eup %3270 }
 0x115   :  { %v282_v24 = vmul.f32 %v3271_v22, %v31_v0  ;;  %v4969_v22 = vmov 2  }
 0x117   :  { %v283_v25 = vsel %vm4959_vm0, %v271_v21, %v282_v24 }
 0x118   :  { %v290_v26 = vmul.f32 %v2958_v23, %v283_v25 }
 0x11a   :  { %v291_v27 = vpack.c.bf16 %v290_v26, %v290_v26  ;;  %v4968_v26 = vmov 3  }
 0x11c   :  { %2967 = vmatmul.mubr.msk.bf16.vlgmr.msra.gmra.mrb[0].mxu0 %vm4962_vm1, %v291_v27 }
 0x11d   :  { %3147 = vmatprep.mubr.msk.bf16.mxu0 %vm4960_vm2, %v4973_v29 }
 0x1ef   :  { %v378_v44 = vpop.f32.mrb[0].mxu0 }
 0x1f0   :  { %v386_v47 = vrot.slane %v378_v44, 5  ;;  %v399_v48 = vrot.slane %v378_v44, 6  ;;  %v408_v49 = vrot.slane %v378_v44, 7  ;;  %v3548_v50 = vpop.f32.mrb[1].mxu0  ;;  %v420_v3 = vmul.f32 %v419_v63, %v378_v44 }
 0x1f1   :  { %v382_v54 = vpop.f32.mrb[2].mxu0 }
 0x1f2   :  { %v387_v55 = vsel %vm4958_vm3, %v386_v47, 0.0  ;;  %v400_v56 = vsel %vm4957_vm4, %v399_v48, 0.0  ;;  %v383_v57 = vpop.f32.mrb[3].mxu0  ;;  %v409_v60 = vsel %vm4956_vm5, %v408_v49, 0.0 }
 0x1f3   :  { %v392_v58 = vmul.f32 %v391_v45, %v387_v55  ;;  %v405_v62 = vmul.f32 %v404_v52, %v400_v56  ;;  %v414_v1 = vmul.f32 %v413_v59, %v409_v60  ;;  %v34_v52 = vadd.s32 8, %v3529_v39 }
 0x1f4   :  { %v53_v56 = vand.u32 15, %v3529_v39  ;;  %v5031_v59 = vmov 0  ;;  %v5034_v60 = vmov 0 }
 0x1f5   :  { %v397_v61 = vadd.f32 %v396_v51, %v392_v58  ;;  %v60_v55 = vand.u32 15, %v34_v52  ;;  %v3636_v58 = vand.u32 127, %v32_v38  ;;  %v5046_v52 = vmov 0 }
 0x1f7   :  { %v406_v0 = vadd.f32 %v405_v62, %v397_v61  ;;  %vm3639_vm6 = vcmp.eq.s32.totalorder %v3636_v58, %v60_v55  ;;  %vm3644_vm7 = vcmp.eq.s32.totalorder %v3636_v58, %v53_v56  ;;  %v41_v55 = vadd.s32 64, %v3529_v39 }
 0x1f8   :  { %v5032_v59 = vsel %vm3639_vm6, 4294967295, %v5031_v59  ;;  %v5035_v60 = vsel %vm3644_vm7, 4294967295, %v5034_v60 }
 0x1f9   :  { %v415_v2 = vadd.f32 %v414_v1, %v406_v0  ;;  %5033 = vst [vmem:[#allocation8_spill] sm:$0xff] %v5032_v59  ;;  %5036 = vst [vmem:[#allocation9_spill] sm:$0xff] %v5035_v60 }
 0x1fb   :  { %v421_v4 = vadd.f32 %v420_v3, %v415_v2 }
 0x1fd   :  { %v2968_v5 = vmul.f32 -1.442695, %v421_v4 }
 0x1ff   :  { %3272 = vpow2.f32 %v2968_v5 }
 0x209   :  { %v3273_v6 = vpop.eup %3272 }
 0x20a   :  { %v425_v7 = vadd.f32 1.0, %v3273_v6 }
 0x20c   :  { %3274 = vrcp.f32 %v425_v7  ;;  %v35_v7 = vadd.s32 16, %v3529_v39 }
 0x216   :  { %v3275_v8 = vpop.eup %3274 }
 0x217   :  { %v3569_v10 = vmul.f32 %v3275_v8, %v421_v4  ;;  %v36_v8 = vadd.s32 24, %v3529_v39 }
 0x219   :  { %v429_v11 = vpack.c.bf16 %v3569_v10, %v3569_v10 }
 0x21b   :  { %3128 = vmatmul.mubr.bf16.vlgmr.msra.gmra.mrb[0].mxu1 %v429_v11 }
 0x21c   :  { %1708 = vmatprep.mubr.bf16.mxu1 %v3396_v9 }
 0x2ee   :  { %v528_v16 = vpop.f32.mrb[0].mxu1 }
 0x2ef   :  { %v845_v17 = vrot.slane %v528_v16, %v3575_v15  ;;  %550 = vperm.xlu0 %3205, %v528_v16   ;;  %536 = vperm.xlu1 %3204, %v528_v16   ;;  %v3129_v18 = vpop.f32.mrb[1].mxu1  ;;  %v838_v27 = vcombine.high %v528_v16, %v528_v16 }
 0x2f0   :  { %v531_v19 = vpop.f32.mrb[2].mxu1  ;;  %v74_v18 = vand.u32 15, %v36_v8 }
 0x2f1   :  { %v3130_v20 = vpop.f32.mrb[3].mxu1  ;;  %v853_v21 = vcombine.high %v845_v17, %v845_v17  ;;  %v861_v25 = vrot.slane %v845_v17, %v3575_v15  ;;  %v852_v31 = vrot.slane %v838_v27, %v3575_v15  ;;  %v67_v17 = vand.u32 15, %v35_v7 }
 0x2f2   :  { %vm3680_vm10 = vcmp.eq.s32.totalorder %v3636_v58, %v74_v18  ;;  %v5040_v27 = vmov 0 }
 0x2f3   :  { %3206 = vset.pattern.permute.xlu1 %v4969_v22  ;;  %v875_v23 = vrot.slane %v853_v21, %v3575_v15  ;;  %3208 = vset.pattern.permute.xlu0 %v3396_v9  ;;  %v883_v28 = vcombine.high %v861_v25, %v861_v25  ;;  %v890_v30 = vrot.slane %v861_v25, %v3535_v41  ;;  %v5037_v25 = vmov 0 }
 0x2f4   :  { %560 = vperm.xlu1 %3206, %v528_v16   ;;  %v868_v32 = vrot.slane %v852_v31, %v3575_v15  ;;  %vm3675_vm9 = vcmp.eq.s32.totalorder %v3636_v58, %v67_v17  ;;  %v5041_v27 = vsel %vm3680_vm10, 4294967295, %v5040_v27 }
 0x2f5   :  { %v894_v24 = vrot.slane %v875_v23, %v3535_v41  ;;  %v898_v9 = vrot.slane %v883_v28, %v3535_v41  ;;  %v885_v36 = vcombine.high %v875_v23, %v875_v23  ;;  %v5038_v25 = vsel %vm3675_vm9, 4294967295, %v5037_v25  ;;  %5042 = vst [vmem:[#allocation11_spill] sm:$0xff] %v5041_v27 }
 0x2f6   :  { %v906_v33 = vrot.slane %v868_v32, %v3535_v41  ;;  %v884_v34 = vcombine.high %v868_v32, %v868_v32  ;;  %5039 = vst [vmem:[#allocation10_spill] sm:$0xff] %v5038_v25  ;;  %v37_v28 = vadd.s32 32, %v3529_v39  ;;  %v782_v25 = vld [vmem:[%s4953_s6 + $0x40] sm:$0xff] }
 0x2f7   :  { %1010 = vrot.lane.b32.xlu0 %v894_v24, %s3402_s23  ;;  %v902_v44 = vrot.slane %v885_v36, %v3535_v41 }
 0x2f8   :  { %3207 = vset.pattern.permute.xlu1 %v4968_v26  ;;  %v914_v35 = vrot.slane %v884_v34, %v3535_v41 }
 0x2f9   :  { %570 = vperm.xlu1 %3207, %v528_v16  }
 0x2fb   :  { %1202 = vrot.lane.b32.xlu0 %v894_v24, %s3404_s24 }
 0x2fd   :  { %919 = vrot.lane.b32.xlu1 %v890_v30, %s3405_s25 }
 0x2fe   :  { %3209 = vset.pattern.permute.xlu1 %v3399_v37  ;;  %v854_v37 = vcombine.high %v852_v31, %v852_v31 }
 0x2ff   :  { %1012 = vrot.lane.b32.xlu0 %v898_v9, %s3402_s23 }
 0x300   :  { %v882_v45 = vrot.slane %v854_v37, %v3575_v15 }
 0x301   :  { %1112 = vrot.lane.b32.xlu1 %v890_v30, %s3406_s26 }
 0x302   :  { %v910_v47 = vrot.slane %v882_v45, %v3535_v41  ;;  %v886_v48 = vcombine.high %v882_v45, %v882_v45 }
 0x303   :  { %1204 = vrot.lane.b32.xlu0 %v898_v9, %s3404_s24 }
 0x304   :  { %v918_v49 = vrot.slane %v886_v48, %v3535_v41 }
 0x305   :  { %1008 = vrot.lane.b32.xlu1 %v890_v30, %s3402_s23 }
 0x307   :  { %1208 = vrot.lane.b32.xlu0 %v906_v33, %s3404_s24 }
 0x309   :  { %1200 = vrot.lane.b32.xlu1 %v890_v30, %s3404_s24  ;;  %v38_v30 = vadd.s32 40, %v3529_v39 }
 0x30b   :  { %1124 = vrot.lane.b32.xlu0 %v914_v35, %s3406_s26  ;;  %v88_v36 = vand.u32 15, %v38_v30 }
 0x30d   :  { %921 = vrot.lane.b32.xlu1 %v894_v24, %s3405_s25  ;;  %vm3704_vm12 = vcmp.eq.s32.totalorder %v3636_v58, %v88_v36 }
 0x30e   :  { %v5047_v52 = vsel %vm3704_vm12, 4294967295, %v5046_v52 }
 0x30f   :  { %1206 = vrot.lane.b32.xlu0 %v902_v44, %s3404_s24  ;;  %5048 = vst [vmem:[#allocation13_spill] sm:$0xff] %v5047_v52 }
 0x311   :  { %1114 = vrot.lane.b32.xlu1 %v894_v24, %s3406_s26 }
 0x313   :  { %1210 = vrot.lane.b32.xlu0 %v910_v47, %s3404_s24 }
 0x315   :  { %923 = vrot.lane.b32.xlu1 %v898_v9, %s3405_s25 }
 0x317   :  { %1212 = vrot.lane.b32.xlu0 %v914_v35, %s3404_s24 }
 0x319   :  { %1116 = vrot.lane.b32.xlu1 %v898_v9, %s3406_s26 }
 0x31b   :  { %1214 = vrot.lane.b32.xlu0 %v918_v49, %s3404_s24 }
 0x31d   :  { %927 = vrot.lane.b32.xlu1 %v906_v33, %s3405_s25 }
 0x321   :  { %1120 = vrot.lane.b32.xlu1 %v906_v33, %s3406_s26 }
 0x325   :  { %1016 = vrot.lane.b32.xlu1 %v906_v33, %s3402_s23 }
 0x329   :  { %925 = vrot.lane.b32.xlu1 %v902_v44, %s3405_s25 }
 0x32d   :  { %1118 = vrot.lane.b32.xlu1 %v902_v44, %s3406_s26 }
 0x331   :  { %929 = vrot.lane.b32.xlu1 %v910_v47, %s3405_s25 }
 0x335   :  { %1122 = vrot.lane.b32.xlu1 %v910_v47, %s3406_s26 }
 0x339   :  { %931 = vrot.lane.b32.xlu1 %v914_v35, %s3405_s25 }
 0x33d   :  { %1014 = vrot.lane.b32.xlu1 %v902_v44, %s3402_s23 }
 0x341   :  { %1018 = vrot.lane.b32.xlu1 %v910_v47, %s3402_s23 }
 0x345   :  { %1020 = vrot.lane.b32.xlu1 %v914_v35, %s3402_s23  ;;  %v81_v35 = vand.u32 15, %v37_v28 }
 0x347   :  { %vm3699_vm11 = vcmp.eq.s32.totalorder %v3636_v58, %v81_v35 }
 0x349   :  { %933 = vrot.lane.b32.xlu1 %v918_v49, %s3405_s25 }
 0x34d   :  { %1126 = vrot.lane.b32.xlu1 %v918_v49, %s3406_s26 }
 0x351   :  { %1022 = vrot.lane.b32.xlu1 %v918_v49, %s3402_s23  ;;  %v5043_v49 = vmov 0 }
 0x352   :  { %v5044_v49 = vsel %vm3699_vm11, 4294967295, %v5043_v49 }
 0x353   :  { %5045 = vst [vmem:[#allocation12_spill] sm:$0xff] %v5044_v49 }
 0x36e   :  { %v3627_v51 = vpop.permute.xlu1 %536 }
 0x373   :  { %v3630_v54 = vpop.permute.xlu1 %560 }
 0x378   :  { %v3633_v57 = vpop.permute.xlu1 %570 }
 0x37c   :  { %v920_v61 = vpop.permute.xlu1 %919 }
 0x37d   :  { %v944_v62 = vsel %vm3639_vm6, %v920_v61, 0.0  ;;  %v943_v63 = vsel %vm3644_vm7, %v920_v61, 0.0 }
 0x37e   :  { %v963_v38 = vsel %vm4965_vm8, %v944_v62, 0.0  ;;  %v960_v0 = vsel %vm4965_vm8, %v943_v63, 0.0  ;;  %v42_v62 = vadd.s32 72, %v3529_v39  ;;  %v3714_v63 = vpop.permute.xlu0 %550 }
 0x37f   :  { %964 = vadd.xlane.f32.xlu0 %v963_v38  ;;  %961 = vadd.xlane.f32.xlu1 %v960_v0 }
 0x380   :  { %v1113_v1 = vpop.permute.xlu1 %1112 }
 0x381   :  { %v1136_v2 = vsel %vm3644_vm7, %v1113_v1, 0.0  ;;  %v1137_v3 = vsel %vm3639_vm6, %v1113_v1, 0.0 }
 0x382   :  { %v1152_v4 = vsel %vm4965_vm8, %v1136_v2, 0.0  ;;  %v1155_v5 = vsel %vm4965_vm8, %v1137_v3, 0.0  ;;  %v109_v2 = vand.u32 15, %v41_v55  ;;  %v1011_v8 = vpop.permute.xlu0 %1010 }
 0x383   :  { %1153 = vadd.xlane.f32.xlu0 %v1152_v4  ;;  %1156 = vadd.xlane.f32.xlu1 %v1155_v5  ;;  %v116_v5 = vand.u32 15, %v42_v62  ;;  %v1034_v28 = vsel %vm3675_vm9, %v1011_v8, 0.0 }
 0x384   :  { %v1009_v6 = vpop.permute.xlu1 %1008  ;;  %vm3725_vm13 = vcmp.eq.s32.totalorder %v3636_v58, %v109_v2 }
 0x385   :  { %v1032_v11 = vsel %vm3644_vm7, %v1009_v6, 0.0  ;;  %v1033_v12 = vsel %vm3639_vm6, %v1009_v6, 0.0  ;;  %vm3732_vm14 = vcmp.eq.s32.totalorder %v3636_v58, %v116_v5  ;;  %v40_v5 = vadd.s32 56, %v3529_v39 }
 0x386   :  { %v1048_v13 = vsel %vm4965_vm8, %v1032_v11, 0.0  ;;  %v1051_v14 = vsel %vm4965_vm8, %v1033_v12, 0.0  ;;  %v5049_v12 = vmov 0 }
 0x387   :  { %1049 = vadd.xlane.f32.xlu0 %v1048_v13  ;;  %1052 = vadd.xlane.f32.xlu1 %v1051_v14  ;;  %v5050_v12 = vsel %vm3725_vm13, 4294967295, %v5049_v12  ;;  %v5052_v14 = vmov 0 }
 0x388   :  { %v1201_v16 = vpop.permute.xlu1 %1200  ;;  %5051 = vst [vmem:[#allocation14_spill] sm:$0xff] %v5050_v12  ;;  %v5053_v14 = vsel %vm3732_vm14, 4294967295, %v5052_v14 }
 0x389   :  { %v1224_v19 = vsel %vm3644_vm7, %v1201_v16, 0.0  ;;  %v1225_v20 = vsel %vm3639_vm6, %v1201_v16, 0.0  ;;  %5054 = vst [vmem:[#allocation15_spill] sm:$0xff] %v5053_v14 }
 0x38a   :  { %v1240_v21 = vsel %vm4965_vm8, %v1224_v19, 0.0  ;;  %v1243_v23 = vsel %vm4965_vm8, %v1225_v20, 0.0  ;;  %v1203_v20 = vpop.permute.xlu0 %1202 }
 0x38b   :  { %1241 = vadd.xlane.f32.xlu0 %v1240_v21  ;;  %1244 = vadd.xlane.f32.xlu1 %v1243_v23 }
 0x38c   :  { %v922_v24 = vpop.permute.xlu1 %921 }
 0x38d   :  { %v945_v9 = vsel %vm3675_vm9, %v922_v24, 0.0  ;;  %v946_v31 = vsel %vm3680_vm10, %v922_v24, 0.0 }
 0x38e   :  { %v966_v32 = vsel %vm4965_vm8, %v945_v9, 0.0  ;;  %v969_v33 = vsel %vm4965_vm8, %v946_v31, 0.0  ;;  %v1013_v9 = vpop.permute.xlu0 %1012  ;;  %v1054_v31 = vsel %vm4965_vm8, %v1034_v28, 0.0 }
 0x38f   :  { %967 = vadd.xlane.f32.xlu0 %v966_v32  ;;  %970 = vadd.xlane.f32.xlu1 %v969_v33  ;;  %v1035_v32 = vsel %vm3680_vm10, %v1011_v8, 0.0  ;;  %v1226_v33 = vsel %vm3675_vm9, %v1203_v20, 0.0  ;;  %v1037_v55 = vsel %vm3704_vm12, %v1013_v9, 0.0 }
 0x390   :  { %v1115_v34 = vpop.permute.xlu1 %1114  ;;  %v1246_v36 = vsel %vm4965_vm8, %v1226_v33, 0.0  ;;  %v1063_v62 = vsel %vm4965_vm8, %v1037_v55, 0.0 }
 0x391   :  { %v1138_v37 = vsel %vm3675_vm9, %v1115_v34, 0.0  ;;  %v1139_v44 = vsel %vm3680_vm10, %v1115_v34, 0.0  ;;  %v1057_v34 = vsel %vm4965_vm8, %v1035_v32, 0.0 }
 0x392   :  { %v1158_v45 = vsel %vm4965_vm8, %v1138_v37, 0.0  ;;  %v1161_v47 = vsel %vm4965_vm8, %v1139_v44, 0.0  ;;  %v1227_v37 = vsel %vm3680_vm10, %v1203_v20, 0.0  ;;  %v1036_v44 = vsel %vm3699_vm11, %v1013_v9, 0.0 }
 0x393   :  { %1159 = vadd.xlane.f32.xlu0 %v1158_v45  ;;  %1162 = vadd.xlane.f32.xlu1 %v1161_v47  ;;  %v1205_v45 = vpop.permute.xlu0 %1204  ;;  %v1249_v47 = vsel %vm4965_vm8, %v1227_v37, 0.0  ;;  %v5055_v20 = vmov 0  ;;  %v44_v9 = vadd.s32 88, %v3529_v39 }
 0x394   :  { %v924_v48 = vpop.permute.xlu1 %923 }
 0x395   :  { %v947_v56 = vsel %vm3699_vm11, %v924_v48, 0.0  ;;  %v948_v61 = vsel %vm3704_vm12, %v924_v48, 0.0  ;;  %v1060_v48 = vsel %vm4965_vm8, %v1036_v44, 0.0 }
 0x396   :  { %v972_v38 = vsel %vm4965_vm8, %v947_v56, 0.0  ;;  %v975_v0 = vsel %vm4965_vm8, %v948_v61, 0.0  ;;  %v1228_v56 = vsel %vm3699_vm11, %v1205_v45, 0.0 }
 0x397   :  { %973 = vadd.xlane.f32.xlu0 %v972_v38  ;;  %976 = vadd.xlane.f32.xlu1 %v975_v0  ;;  %v1252_v38 = vsel %vm4965_vm8, %v1228_v56, 0.0  ;;  %v1229_v0 = vsel %vm3704_vm12, %v1205_v45, 0.0 }
 0x398   :  { %v1117_v1 = vpop.permute.xlu1 %1116 }
 0x399   :  { %v1140_v3 = vsel %vm3699_vm11, %v1117_v1, 0.0  ;;  %v1141_v4 = vsel %vm3704_vm12, %v1117_v1, 0.0  ;;  %v39_v1 = vadd.s32 48, %v3529_v39 }
 0x39a   :  { %v1164_v6 = vsel %vm4965_vm8, %v1140_v3, 0.0  ;;  %v1167_v7 = vsel %vm4965_vm8, %v1141_v4, 0.0  ;;  %v1209_v3 = vpop.permute.xlu0 %1208  ;;  %v1255_v4 = vsel %vm4965_vm8, %v1229_v0, 0.0 }
 0x39b   :  { %1165 = vadd.xlane.f32.xlu0 %v1164_v6  ;;  %1168 = vadd.xlane.f32.xlu1 %v1167_v7 }
 0x39c   :  { %v928_v11 = vpop.permute.xlu1 %927 }
 0x39d   :  { %v951_v13 = vsel %vm3725_vm13, %v928_v11, 0.0  ;;  %v952_v17 = vsel %vm3732_vm14, %v928_v11, 0.0  ;;  %v95_v11 = vand.u32 15, %v39_v1 }
 0x39e   :  { %v984_v16 = vsel %vm4965_vm8, %v951_v13, 0.0  ;;  %v987_v18 = vsel %vm4965_vm8, %v952_v17, 0.0  ;;  %v1232_v13 = vsel %vm3725_vm13, %v1209_v3, 0.0  ;;  %v102_v17 = vand.u32 15, %v40_v5 }
 0x39f   :  { %985 = vadd.xlane.f32.xlu0 %v984_v16  ;;  %988 = vadd.xlane.f32.xlu1 %v987_v18  ;;  %v1264_v18 = vsel %vm4965_vm8, %v1232_v13, 0.0  ;;  %vm3784_vm15 = vcmp.eq.s32.totalorder %v3636_v58, %v95_v11  ;;  %v1125_v13 = vpop.permute.xlu0 %1124 }
 0x3a0   :  { %v1121_v19 = vpop.permute.xlu1 %1120  ;;  %v5056_v20 = vsel %vm3784_vm15, 4294967295, %v5055_v20  ;;  %vm3793_vm5 = vcmp.eq.s32.totalorder %v3636_v58, %v102_v17  ;;  %v5070_v17 = vmov 0 }
 0x3a1   :  { %v1144_v21 = vsel %vm3725_vm13, %v1121_v19, 0.0  ;;  %v1145_v24 = vsel %vm3732_vm14, %v1121_v19, 0.0  ;;  %v1233_v19 = vsel %vm3732_vm14, %v1209_v3, 0.0  ;;  %5057 = vst [vmem:[#allocation16_spill] sm:$0xff] %v5056_v20 }
 0x3a2   :  { %v1176_v23 = vsel %vm4965_vm8, %v1144_v21, 0.0  ;;  %v1179_v30 = vsel %vm4965_vm8, %v1145_v24, 0.0  ;;  %v43_v21 = vadd.s32 80, %v3529_v39  ;;  %v1267_v28 = vsel %vm4965_vm8, %v1233_v19, 0.0 }
 0x3a3   :  { %1177 = vadd.xlane.f32.xlu0 %v1176_v23  ;;  %1180 = vadd.xlane.f32.xlu1 %v1179_v30  ;;  %v5058_v30 = vmov 0 }
 0x3a4   :  { %v1017_v35 = vpop.permute.xlu1 %1016  ;;  %v5059_v30 = vsel %vm3793_vm5, 4294967295, %v5058_v30  ;;  %v123_v33 = vand.u32 15, %v43_v21 }
 0x3a5   :  { %v1040_v2 = vsel %vm3725_vm13, %v1017_v35, 0.0  ;;  %v1041_v8 = vsel %vm3732_vm14, %v1017_v35, 0.0  ;;  %5060 = vst [vmem:[#allocation17_spill] sm:$0xff] %v5059_v30 }
 0x3a6   :  { %v1072_v7 = vsel %vm4965_vm8, %v1040_v2, 0.0  ;;  %v1075_v16 = vsel %vm4965_vm8, %v1041_v8, 0.0  ;;  %vm3808_vm4 = vcmp.eq.s32.totalorder %v3636_v58, %v123_v33  ;;  %v5067_v8 = vmov 0 }
 0x3a7   :  { %1055 = vadd.xlane.f32.xlu0 %v1054_v31  ;;  %1058 = vadd.xlane.f32.xlu1 %v1057_v34 }
 0x3a8   :  { %v926_v61 = vpop.permute.xlu1 %925 }
 0x3a9   :  { %v949_v23 = vsel %vm3784_vm15, %v926_v61, 0.0  ;;  %v950_v32 = vsel %vm3793_vm5, %v926_v61, 0.0  ;;  %v5064_v61 = vmov 0 }
 0x3aa   :  { %v978_v31 = vsel %vm4965_vm8, %v949_v23, 0.0  ;;  %v981_v35 = vsel %vm4965_vm8, %v950_v32, 0.0  ;;  %v1207_v32 = vpop.permute.xlu0 %1206 }
 0x3ab   :  { %1247 = vadd.xlane.f32.xlu0 %v1246_v36  ;;  %1250 = vadd.xlane.f32.xlu1 %v1249_v47  ;;  %v130_v36 = vand.u32 15, %v44_v9  ;;  %v5061_v47 = vmov 0 }
 0x3ac   :  { %v1119_v6 = vpop.permute.xlu1 %1118  ;;  %v5062_v47 = vsel %vm3808_vm4, 4294967295, %v5061_v47 }
 0x3ad   :  { %v1142_v34 = vsel %vm3784_vm15, %v1119_v6, 0.0  ;;  %v1143_v45 = vsel %vm3793_vm5, %v1119_v6, 0.0  ;;  %5063 = vst [vmem:[#allocation18_spill] sm:$0xff] %v5062_v47  ;;  %vm3817_vm3 = vcmp.eq.s32.totalorder %v3636_v58, %v130_v36  ;;  %v1230_v36 = vsel %vm3784_vm15, %v1207_v32, 0.0 }
 0x3ae   :  { %v1170_v44 = vsel %vm4965_vm8, %v1142_v34, 0.0  ;;  %v1173_v56 = vsel %vm4965_vm8, %v1143_v45, 0.0  ;;  %v5065_v61 = vsel %vm3817_vm3, 4294967295, %v5064_v61  ;;  %v1258_v45 = vsel %vm4965_vm8, %v1230_v36, 0.0 }
 0x3af   :  { %1061 = vadd.xlane.f32.xlu0 %v1060_v48  ;;  %1064 = vadd.xlane.f32.xlu1 %v1063_v62  ;;  %v45_v48 = vadd.s32 96, %v3529_v39  ;;  %5066 = vst [vmem:[#allocation19_spill] sm:$0xff] %v5065_v61  ;;  %v46_v62 = vadd.s32 104, %v3529_v39 }
 0x3b0   :  { %v930_v24 = vpop.permute.xlu1 %929 }
 0x3b1   :  { %v953_v55 = vsel %vm3808_vm4, %v930_v24, 0.0  ;;  %v954_v0 = vsel %vm3817_vm3, %v930_v24, 0.0  ;;  %v137_v1 = vand.u32 15, %v45_v48  ;;  %v144_v5 = vand.u32 15, %v46_v62 }
 0x3b2   :  { %v1231_v48 = vsel %vm3793_vm5, %v1207_v32, 0.0 }
 0x3b3   :  { %1253 = vadd.xlane.f32.xlu0 %v1252_v38  ;;  %1256 = vadd.xlane.f32.xlu1 %v1255_v4  ;;  %v990_v38 = vsel %vm4965_vm8, %v953_v55, 0.0  ;;  %v993_v4 = vsel %vm4965_vm8, %v954_v0, 0.0  ;;  %vm3832_vm0 = vcmp.eq.s32.totalorder %v3636_v58, %v137_v1  ;;  %vm3840_vm2 = vcmp.eq.s32.totalorder %v3636_v58, %v144_v5 }
 0x3b4   :  { %v1123_v37 = vpop.permute.xlu1 %1122  ;;  %v5068_v8 = vsel %vm3832_vm0, 4294967295, %v5067_v8  ;;  %v5071_v17 = vsel %vm3840_vm2, 4294967295, %v5070_v17  ;;  %v1148_v21 = vsel %vm3832_vm0, %v1125_v13, 0.0  ;;  %v1149_v9 = vsel %vm3840_vm2, %v1125_v13, 0.0 }
 0x3b5   :  { %v1146_v2 = vsel %vm3808_vm4, %v1123_v37, 0.0  ;;  %5069 = vst [vmem:[#allocation20_spill] sm:$0xff] %v5068_v8  ;;  %5072 = vst [vmem:[#allocation21_spill] sm:$0xff] %v5071_v17  ;;  %v1191_v33 = vsel %vm4965_vm8, %v1149_v9, 0.0  ;;  %v1261_v62 = vsel %vm4965_vm8, %v1231_v48, 0.0  ;;  %v3890_v9 = vsub.s32 1, %v3529_v39 }
 0x3b6   :  { %v1182_v6 = vsel %vm4965_vm8, %v1146_v2, 0.0 }
 0x3b7   :  { %1073 = vadd.xlane.f32.xlu0 %v1072_v7  ;;  %1076 = vadd.xlane.f32.xlu1 %v1075_v16  ;;  %v1147_v7 = vsel %vm3817_vm3, %v1123_v37, 0.0  ;;  %5073 = vst [vmem:[#allocation22_spill] sm:$0xff] %v3890_v9  ;;  %v547_v32 = vrot.slane %v3541_v43, %v3890_v9 }
 0x3b8   :  { %v932_v3 = vpop.permute.xlu1 %931  ;;  %v1185_v16 = vsel %vm4965_vm8, %v1147_v7, 0.0  ;;  %v260_v7 = vld [vmem:[%s4952_s5] sm:$0xf] }
 0x3b9   :  { %v955_v11 = vsel %vm3832_vm0, %v932_v3, 0.0  ;;  %v956_v19 = vsel %vm3840_vm2, %v932_v3, 0.0  ;;  %v556_v48 = vrot.slane %v260_v7, %v3890_v9 }
 0x3ba   :  { %v999_v24 = vsel %vm4965_vm8, %v956_v19, 0.0  ;;  %v48_v19 = vadd.s32 120, %v3529_v39 }
 0x3bb   :  { %1265 = vadd.xlane.f32.xlu0 %v1264_v18  ;;  %1268 = vadd.xlane.f32.xlu1 %v1267_v28  ;;  %v996_v18 = vsel %vm4965_vm8, %v955_v11, 0.0  ;;  %v1188_v28 = vsel %vm4965_vm8, %v1148_v21, 0.0  ;;  %v542_v21 = vrot.slane %v260_v7, %v3535_v41 }
 0x3bc   :  { %v1015_v23 = vpop.permute.xlu1 %1014 }
 0x3bf   :  { %979 = vadd.xlane.f32.xlu0 %v978_v31  ;;  %982 = vadd.xlane.f32.xlu1 %v981_v35  ;;  %v1038_v31 = vsel %vm3784_vm15, %v1015_v23, 0.0  ;;  %v1039_v35 = vsel %vm3793_vm5, %v1015_v23, 0.0 }
 0x3c0   :  { %v1066_v34 = vsel %vm4965_vm8, %v1038_v31, 0.0  ;;  %v1019_v37 = vpop.permute.xlu1 %1018 }
 0x3c1   :  { %v1042_v55 = vsel %vm3808_vm4, %v1019_v37, 0.0  ;;  %v1043_v1 = vsel %vm3817_vm3, %v1019_v37, 0.0 }
 0x3c2   :  { %v1078_v0 = vsel %vm4965_vm8, %v1042_v55, 0.0  ;;  %v1081_v3 = vsel %vm4965_vm8, %v1043_v1, 0.0 }
 0x3c3   :  { %1171 = vadd.xlane.f32.xlu0 %v1170_v44  ;;  %1174 = vadd.xlane.f32.xlu1 %v1173_v56  ;;  %v1069_v44 = vsel %vm4965_vm8, %v1039_v35, 0.0  ;;  %v1211_v56 = vpop.permute.xlu0 %1210  ;;  %v543_v35 = vmul.f32 %v542_v21, %v3627_v51  ;;  %v3910_v51 = vsub.s32 2, %v3529_v39 }
 0x3c4   :  { %v1234_v2 = vsel %vm3808_vm4, %v1211_v56, 0.0  ;;  %v1235_v5 = vsel %vm3817_vm3, %v1211_v56, 0.0  ;;  %v5077_v56 = vmov 0 }
 0x3c7   :  { %991 = vadd.xlane.f32.xlu0 %v990_v38  ;;  %994 = vadd.xlane.f32.xlu1 %v993_v4  ;;  %v1021_v38 = vpop.permute.xlu1 %1020  ;;  %v1270_v4 = vsel %vm4965_vm8, %v1234_v2, 0.0  ;;  %v1213_v13 = vpop.permute.xlu0 %1212 }
 0x3c8   :  { %v1044_v11 = vsel %vm3832_vm0, %v1021_v38, 0.0  ;;  %v1236_v31 = vsel %vm3832_vm0, %v1213_v13, 0.0 }
 0x3c9   :  { %v1084_v23 = vsel %vm4965_vm8, %v1044_v11, 0.0  ;;  %v1276_v37 = vsel %vm4965_vm8, %v1236_v31, 0.0 }
 0x3cb   :  { %1183 = vadd.xlane.f32.xlu0 %v1182_v6  ;;  %1186 = vadd.xlane.f32.xlu1 %v1185_v16  ;;  %v47_v6 = vadd.s32 112, %v3529_v39  ;;  %v934_v16 = vpop.permute.xlu1 %933 }
 0x3cf   :  { %997 = vadd.xlane.f32.xlu0 %v996_v18  ;;  %1000 = vadd.xlane.f32.xlu1 %v999_v24  ;;  %v1273_v18 = vsel %vm4965_vm8, %v1235_v5, 0.0  ;;  %v1045_v24 = vsel %vm3840_vm2, %v1021_v38, 0.0  ;;  %v1127_v36 = vpop.permute.xlu1 %1126  ;;  %v566_v38 = vrot.slane %v260_v7, %v3910_v51 }
 0x3d1   :  { %v567_v11 = vmul.f32 %v566_v38, %v3630_v54 }
 0x3d3   :  { %1189 = vadd.xlane.f32.xlu0 %v1188_v28  ;;  %1192 = vadd.xlane.f32.xlu1 %v1191_v33  ;;  %v151_v28 = vand.u32 15, %v47_v6  ;;  %v1087_v33 = vsel %vm4965_vm8, %v1045_v24, 0.0 }
 0x3d5   :  { %vm3902_vm1 = vcmp.eq.s32.totalorder %v3636_v58, %v151_v28 }
 0x3d6   :  { %v957_v43 = vsel %vm3902_vm1, %v934_v16, 0.0  ;;  %v1150_v2 = vsel %vm3902_vm1, %v1127_v36, 0.0 }
 0x3d7   :  { %1067 = vadd.xlane.f32.xlu0 %v1066_v34  ;;  %1070 = vadd.xlane.f32.xlu1 %v1069_v44  ;;  %v158_v34 = vand.u32 15, %v48_v19  ;;  %v1237_v44 = vsel %vm3840_vm2, %v1213_v13, 0.0  ;;  %v1002_v1 = vsel %vm4965_vm8, %v957_v43, 0.0  ;;  %v1215_v19 = vpop.permute.xlu0 %1214  ;;  %v3233_v43 = vld [vmem:[%s4951_s4 + $0x8] sm:$0xff]  }
 0x3d8   :  { %v1279_v55 = vsel %vm4965_vm8, %v1237_v44, 0.0  ;;  %v1238_v24 = vsel %vm3902_vm1, %v1215_v19, 0.0  ;;  %v3232_v44 = vld [vmem:[%s4951_s4] sm:$0xff]  }
 0x3d9   :  { %vm3914_vm3 = vcmp.eq.s32.totalorder %v3636_v58, %v158_v34  ;;  %v576_v58 = vrot.slane %v260_v7, %v3532_v40  ;;  %3132 = vmatpush3.bf16.msra.mxu0 %v3232_v44 }
 0x3da   :  { %v5078_v56 = vsel %vm3914_vm3, 4294967295, %v5077_v56  ;;  %v1151_v13 = vsel %vm3914_vm3, %v1127_v36, 0.0  ;;  %3133 = vmatprep.subr.bf16.mxu0 %v4973_v29 }
 0x3db   :  { %1259 = vadd.xlane.f32.xlu0 %v1258_v45  ;;  %1262 = vadd.xlane.f32.xlu1 %v1261_v62  ;;  %v5074_v45 = vmov 0  ;;  %5079 = vst [vmem:[#allocation24_spill] sm:$0xff] %v5078_v56  ;;  %v548_v62 = vadd.f32 %v547_v32, %v543_v35  ;;  %v1197_v7 = vsel %vm4965_vm8, %v1151_v13, 0.0  ;;  %v1282_v32 = vsel %vm4965_vm8, %v1238_v24, 0.0  ;;  %v3237_v24 = vld [vmem:[%s4951_s4 + $0x28] sm:$0xff]  }
 0x3dc   :  { %v5075_v45 = vsel %vm3902_vm1, 4294967295, %v5074_v45 }
 0x3dd   :  { %5076 = vst [vmem:[#allocation23_spill] sm:$0xff] %v5075_v45  ;;  %3134 = vmatpush3.bf16.msra.mxu0 %v3233_v43  ;;  %v3239_v43 = vld [vmem:[%s4951_s4 + $0x38] sm:$0xff]  }
 0x3de   :  { %3135 = vmatprep.subr.bf16.mxu0 %v4973_v29 }
 0x3df   :  { %1079 = vadd.xlane.f32.xlu0 %v1078_v0  ;;  %1082 = vadd.xlane.f32.xlu1 %v1081_v3  ;;  %v958_v0 = vsel %vm3914_vm3, %v934_v16, 0.0  ;;  %v557_v3 = vmul.f32 %v556_v48, %v3714_v63  ;;  %v1194_v16 = vsel %vm4965_vm8, %v1150_v2, 0.0  ;;  %v577_v63 = vmul.f32 %v576_v58, %v3633_v57  ;;  %v3234_v58 = vld [vmem:[%s4951_s4 + $0x10] sm:$0xff]  }
 0x3e0   :  { %v1005_v5 = vsel %vm4965_vm8, %v958_v0, 0.0  ;;  %v1239_v57 = vsel %vm3914_vm3, %v1215_v19, 0.0 }
 0x3e1   :  { %v558_v6 = vadd.f32 %v557_v3, %v548_v62  ;;  %v1285_v34 = vsel %vm4965_vm8, %v1239_v57, 0.0  ;;  %3136 = vmatpush3.bf16.msra.mxu0 %v3234_v58 }
 0x3e2   :  { %3137 = vmatprep.subr.bf16.mxu0 %v4973_v29 }
 0x3e3   :  { %1271 = vadd.xlane.f32.xlu0 %v1270_v4  ;;  %1274 = vadd.xlane.f32.xlu1 %v1273_v18  ;;  %v1023_v4 = vpop.permute.xlu1 %1022  ;;  %v568_v21 = vadd.f32 %v567_v11, %v558_v6  ;;  %v3235_v6 = vld [vmem:[%s4951_s4 + $0x18] sm:$0xff]  }
 0x3e4   :  { %v1046_v18 = vsel %vm3902_vm1, %v1023_v4, 0.0  ;;  %v1047_v54 = vsel %vm3914_vm3, %v1023_v4, 0.0 }
 0x3e5   :  { %v578_v28 = vadd.f32 %v577_v63, %v568_v21  ;;  %v1093_v31 = vsel %vm4965_vm8, %v1047_v54, 0.0  ;;  %3138 = vmatpush3.bf16.msra.mxu0 %v3235_v6  ;;  %v3236_v63 = vld [vmem:[%s4951_s4 + $0x20] sm:$0xff]  }
 0x3e6   :  { %3139 = vmatprep.subr.bf16.mxu0 %v4973_v29 }
 0x3e7   :  { %1085 = vadd.xlane.f32.xlu0 %v1084_v23  ;;  %1088 = vadd.xlane.f32.xlu1 %v1087_v33  ;;  %v1090_v23 = vsel %vm4965_vm8, %v1046_v18, 0.0  ;;  %v580_v33 = vmin.f32 %v578_v28, 20.0  ;;  %vm579_vm3 = vcmp.gt.f32.partialorder %v578_v28, 20.0 }
 0x3e9   :  { %v581_v35 = vmul.f32 1.442695, %v580_v33  ;;  %3140 = vmatpush3.bf16.msra.mxu0 %v3236_v63 }
 0x3ea   :  { %3141 = vmatprep.subr.bf16.mxu0 %v4973_v29 }
 0x3eb   :  { %1277 = vadd.xlane.f32.xlu0 %v1276_v37  ;;  %1280 = vadd.xlane.f32.xlu1 %v1279_v55  ;;  %3276 = vpow2.f32 %v581_v35 }
 0x3ed   :  { %3142 = vmatpush3.bf16.msra.mxu0 %v3237_v24 }
 0x3ee   :  { %3143 = vmatprep.subr.bf16.mxu0 %v4973_v29 }
 0x3ef   :  { %1003 = vadd.xlane.f32.xlu0 %v1002_v1  ;;  %1006 = vadd.xlane.f32.xlu1 %v1005_v5 }
 0x3f3   :  { %1195 = vadd.xlane.f32.xlu0 %v1194_v16  ;;  %1198 = vadd.xlane.f32.xlu1 %v1197_v7 }
 0x3f5   :  { %v3277_v48 = vpop.eup %3276 }
 0x3f6   :  { %v583_v38 = vadd.f32 1.0, %v3277_v48  ;;  %v586_v11 = vmul.f32 -0.5, %v3277_v48  ;;  %v589_v7 = vand.u32 2147483647, %v3277_v48 }
 0x3f7   :  { %1091 = vadd.xlane.f32.xlu0 %v1090_v23  ;;  %1094 = vadd.xlane.f32.xlu1 %v1093_v31 }
 0x3f8   :  { %3278 = vlog2.f32 %v583_v38  ;;  %v587_v19 = vadd.f32 1.0, %v586_v11  ;;  %vm590_vm8 = vcmp.lt.f32.partialorder %v589_v7, 0.0004427343  ;;  %v775_v7 = vld [vmem:[%s4953_s6 + $0x8] sm:$0xff] }
 0x3fa   :  { %v588_v31 = vmul.f32 %v3277_v48, %v587_v19  ;;  %v774_v19 = vld [vmem:[%s4953_s6] sm:$0xff] }
 0x3fb   :  { %1283 = vadd.xlane.f32.xlu0 %v1282_v32  ;;  %1286 = vadd.xlane.f32.xlu1 %v1285_v34  ;;  %v3238_v34 = vld [vmem:[%s4951_s4 + $0x30] sm:$0xff]  }
 0x3fc   :  { %3144 = vmatpush3.bf16.msra.mxu0 %v3238_v34 }
 0x3fd   :  { %3145 = vmatprep.subr.bf16.mxu0 %v4973_v29 }
 0x400   :  { %3146 = vmatpush3.bf16.msra.mxu0 %v3239_v43 }
 0x401   :  { %3151 = vmatprep.subr.bf16.mxu0 %v4973_v29 }
 0x402   :  { %v3279_v16 = vpop.eup %3278 }
 0x403   :  { %v585_v21 = vmul.f32 0.6931472, %v3279_v16 }
 0x405   :  { %v591_v57 = vsel %vm590_vm8, %v588_v31, %v585_v21 }
 0x406   :  { %v592_v35 = vsel %vm579_vm3, %v578_v28, %v591_v57  ;;  %vm5080_vm3 = vcmask 523264  }
 0x407   :  { %v602_v48 = vrot.slane %v592_v35, %v3575_v15  ;;  %v4034_v34 = vmul.f32 %v592_v35, %v3569_v10  ;;  %v595_v56 = vcombine.high %v592_v35, %v592_v35  ;;  %vm5081_vm8 = vmmov %vm5080_vm3 }
 0x408   :  { %vm5087_vm1 = vmmov %vm5080_vm3 }
 0x409   :  { %v618_v58 = vrot.slane %v602_v48, %v3575_v15  ;;  %v610_v11 = vcombine.high %v602_v48, %v602_v48  ;;  %vm5088_vm2 = vmmov %vm5087_vm1 }
 0x40a   :  { %vm5097_vm0 = vmmov %vm5087_vm1 }
 0x40b   :  { %v647_v16 = vrot.slane %v618_v58, %v3535_v41  ;;  %v632_v24 = vrot.slane %v610_v11, %v3575_v15  ;;  %v640_v42 = vcombine.high %v618_v58, %v618_v58  ;;  %v692_v11 = vrot.slane %v4034_v34, %v3575_v15  ;;  %vm5098_vm5 = vmmov %vm5097_vm0 }
 0x40c   :  { %v3945_v36 = vpop.xlane.xlu0 %964  ;;  %v3947_v37 = vpop.xlane.xlu1 %961 }
 0x40d   :  { %v790_v31 = vmul.f32 %v774_v19, %v647_v16  ;;  %v791_v43 = vmul.f32 %v775_v7, %v647_v16  ;;  %v651_v26 = vrot.slane %v632_v24, %v3535_v41  ;;  %v777_v16 = vld [vmem:[%s4953_s6 + $0x18] sm:$0xff]  ;;  %v655_v45 = vrot.slane %v640_v42, %v3535_v41 }
 0x40e   :  { %v708_v17 = vrot.slane %v692_v11, %v3575_v15  ;;  %v700_v8 = vcombine.high %v692_v11, %v692_v11  ;;  %v609_v42 = vrot.slane %v595_v56, %v3575_v15  ;;  %v780_v56 = vld [vmem:[%s4953_s6 + $0x30] sm:$0xff] }
 0x40f   :  { %v806_v22 = vmul.f32 1.442695, %v790_v31  ;;  %v808_v19 = vmul.f32 1.442695, %v791_v43  ;;  %v792_v29 = vmul.f32 %v776_v46, %v651_v26  ;;  %v793_v58 = vmul.f32 %v777_v16, %v651_v26  ;;  %v778_v43 = vld [vmem:[%s4953_s6 + $0x20] sm:$0xff]  ;;  %v779_v46 = vld [vmem:[%s4953_s6 + $0x28] sm:$0xff] }
 0x410   :  { %v3955_v55 = vpop.xlane.xlu0 %1153  ;;  %v3957_v62 = vpop.xlane.xlu1 %1156  ;;  %v794_v47 = vmul.f32 %v778_v43, %v655_v45  ;;  %v795_v16 = vmul.f32 %v779_v46, %v655_v45  ;;  %v4071_v14 = vrot.slane %v700_v8, %v3575_v15  ;;  %v4077_v11 = vrot.slane %v609_v42, %v3575_v15 }
 0x411   :  { %3280 = vpow2.f32 %v806_v22  ;;  %v642_v22 = vcombine.high %v632_v24, %v632_v24  ;;  %v810_v30 = vmul.f32 1.442695, %v792_v29  ;;  %v812_v26 = vmul.f32 1.442695, %v793_v58 }
 0x412   :  { %3282 = vpow2.f32 %v808_v19  ;;  %v737_v19 = vrot.slane %v708_v17, %v3535_v41  ;;  %v814_v58 = vmul.f32 1.442695, %v794_v47  ;;  %v816_v8 = vmul.f32 1.442695, %v795_v16 }
 0x413   :  { %v659_v9 = vrot.slane %v642_v22, %v3535_v41  ;;  %3284 = vpow2.f32 %v810_v30  ;;  %v781_v30 = vld [vmem:[%s4953_s6 + $0x38] sm:$0xff]  ;;  %v741_v47 = vrot.slane %v4071_v14, %v3535_v41  ;;  %v730_v49 = vcombine.high %v708_v17, %v708_v17 }
 0x414   :  { %v3960_v0 = vpop.xlane.xlu0 %1049  ;;  %v3962_v1 = vpop.xlane.xlu1 %1052  ;;  %v1288_v24 = vmul.f32 %v3955_v55, %v737_v19  ;;  %v1096_v43 = vmul.f32 %v3947_v37, %v737_v19  ;;  %v1289_v46 = vmul.f32 %v3957_v62, %v737_v19  ;;  %3286 = vpow2.f32 %v812_v26 }
 0x415   :  { %v1097_v52 = vmul.f32 %v3945_v36, %v737_v19  ;;  %v796_v37 = vmul.f32 %v780_v56, %v659_v9  ;;  %v611_v62 = vcombine.high %v609_v42, %v609_v42  ;;  %v663_v26 = vrot.slane %v4077_v11, %v3535_v41  ;;  %v783_v42 = vld [vmem:[%s4953_s6 + $0x48] sm:$0xff] }
 0x416   :  { %v1304_v12 = vsel %vm5080_vm3, %v1096_v43, %v1288_v24  ;;  %3288 = vpow2.f32 %v814_v58  ;;  %v797_v24 = vmul.f32 %v781_v30, %v659_v9 }
 0x417   :  { %v1305_v36 = vsel %vm5081_vm8, %v1097_v52, %v1289_v46  ;;  %3290 = vpow2.f32 %v816_v8  ;;  %v818_v52 = vmul.f32 1.442695, %v796_v37  ;;  %v798_v9 = vmul.f32 %v782_v25, %v663_v26  ;;  %vm5082_vm8 = vmmov %vm5080_vm3 }
 0x418   :  { %v3965_v2 = vpop.xlane.xlu0 %1241  ;;  %v3967_v3 = vpop.xlane.xlu1 %1244 }
 0x419   :  { %3292 = vpow2.f32 %v818_v52 }
 0x41b   :  { %v3281_v45 = vpop.eup %3280 }
 0x41c   :  { %v3972_v4 = vpop.xlane.xlu0 %967  ;;  %v3974_v5 = vpop.xlane.xlu1 %970  ;;  %v1320_v16 = vmul.f32 0.0, %v3281_v45 }
 0x41d   :  { %v3283_v55 = vpop.eup %3282  ;;  %v1098_v17 = vmul.f32 %v3972_v4, %v741_v47  ;;  %v1099_v46 = vmul.f32 %v3974_v5, %v741_v47  ;;  %v799_v4 = vmul.f32 %v783_v42, %v663_v26  ;;  %v685_v5 = vcombine.high %v4034_v34, %v4034_v34  ;;  %v784_v34 = vld [vmem:[%s4953_s6 + $0x50] sm:$0xff] }
 0x41e   :  { %v4102_v43 = vadd.f32 %v1320_v16, %v1304_v12  ;;  %v1321_v60 = vmul.f32 0.0, %v3283_v55  ;;  %v3285_v58 = vpop.eup %3284  ;;  %v745_v55 = vrot.slane %v730_v49, %v3535_v41  ;;  %v820_v16 = vmul.f32 1.442695, %v797_v24 }
 0x41f   :  { %v3287_v39 = vpop.eup %3286  ;;  %v822_v49 = vmul.f32 1.442695, %v798_v9 }
 0x420   :  { %v3980_v13 = vpop.xlane.xlu0 %1159  ;;  %v3982_v18 = vpop.xlane.xlu1 %1162  ;;  %v4114_v12 = vadd.f32 %v1321_v60, %v1305_v36  ;;  %v732_v60 = vcombine.high %v4071_v14, %v4071_v14  ;;  %3294 = vpow2.f32 %v820_v16 }
 0x421   :  { %v1290_v19 = vmul.f32 %v3980_v13, %v741_v47  ;;  %v1291_v45 = vmul.f32 %v3982_v18, %v741_v47  ;;  %v4112_v13 = vrot.slane %v611_v62, %v3575_v15  ;;  %v1324_v18 = vmul.f32 %v3285_v58, %v4102_v43  ;;  %v3289_v42 = vpop.eup %3288  ;;  %v785_v58 = vld [vmem:[%s4953_s6 + $0x58] sm:$0xff] }
 0x422   :  { %v1325_v26 = vmul.f32 %v3287_v39, %v4114_v12  ;;  %v749_v52 = vrot.slane %v732_v60, %v3535_v41  ;;  %3296 = vpow2.f32 %v822_v49 }
 0x423   :  { %v1306_v30 = vsel %vm5080_vm3, %v1098_v17, %v1290_v19  ;;  %v1307_v37 = vsel %vm5082_vm8, %v1099_v46, %v1291_v45  ;;  %v667_v36 = vrot.slane %v4112_v13, %v3535_v41  ;;  %v824_v17 = vmul.f32 1.442695, %v799_v4  ;;  %v3291_v46 = vpop.eup %3290  ;;  %vm5083_vm8 = vmmov %vm5080_vm3 }
 0x424   :  { %v3988_v54 = vpop.xlane.xlu0 %973  ;;  %v3990_v23 = vpop.xlane.xlu1 %976  ;;  %v4128_v47 = vadd.f32 %v1324_v18, %v1306_v30  ;;  %v4135_v14 = vadd.f32 %v1325_v26, %v1307_v37  ;;  %v643_v26 = vcombine.high %v4112_v13, %v4112_v13  ;;  %v786_v13 = vld [vmem:[%s4953_s6 + $0x60] sm:$0xff] }
 0x425   :  { %v1100_v19 = vmul.f32 %v3988_v54, %v745_v55  ;;  %v1101_v39 = vmul.f32 %v3990_v23, %v745_v55  ;;  %v699_v23 = vrot.slane %v685_v5, %v3575_v15  ;;  %v800_v16 = vmul.f32 %v784_v34, %v667_v36 }
 0x426   :  { %v1328_v9 = vmul.f32 %v3289_v42, %v4128_v47  ;;  %v1329_v18 = vmul.f32 %v3291_v46, %v4135_v14  ;;  %3298 = vpow2.f32 %v824_v17  ;;  %v801_v49 = vmul.f32 %v785_v58, %v667_v36 }
 0x427   :  { %v826_v17 = vmul.f32 1.442695, %v800_v16  ;;  %v675_v46 = vrot.slane %v643_v26, %v3535_v41 }
 0x428   :  { %v3996_v32 = vpop.xlane.xlu0 %1165  ;;  %v3998_v33 = vpop.xlane.xlu1 %1168 }
 0x429   :  { %v1292_v62 = vmul.f32 %v3996_v32, %v745_v55  ;;  %v1293_v32 = vmul.f32 %v3998_v33, %v745_v55  ;;  %v641_v33 = vcombine.high %v4077_v11, %v4077_v11  ;;  %3300 = vpow2.f32 %v826_v17 }
 0x42b   :  { %v1308_v45 = vsel %vm5080_vm3, %v1100_v19, %v1292_v62  ;;  %v1309_v30 = vsel %vm5083_vm8, %v1101_v39, %v1293_v32  ;;  %v671_v5 = vrot.slane %v641_v33, %v3535_v41  ;;  %v3293_v19 = vpop.eup %3292  ;;  %v715_v32 = vrot.slane %v699_v23, %v3575_v15  ;;  %vm5084_vm8 = vmmov %vm5080_vm3 }
 0x42c   :  { %v4004_v44 = vpop.xlane.xlu0 %985  ;;  %v4011_v38 = vpop.xlane.xlu1 %988  ;;  %v4155_v4 = vadd.f32 %v1328_v9, %v1308_v45  ;;  %v701_v45 = vcombine.high %v699_v23, %v699_v23  ;;  %v828_v9 = vmul.f32 1.442695, %v801_v49  ;;  %v788_v23 = vld [vmem:[%s4953_s6 + $0x70] sm:$0xff] }
 0x42d   :  { %v3295_v36 = vpop.eup %3294 }
 0x42e   :  { %v3297_v16 = vpop.eup %3296  ;;  %v4197_v49 = vrot.slane %v701_v45, %v3575_v15  ;;  %3302 = vpow2.f32 %v828_v9 }
 0x430   :  { %v4014_v6 = vpop.xlane.xlu0 %1177  ;;  %v4017_v28 = vpop.xlane.xlu1 %1180 }
 0x431   :  { %v3299_v17 = vpop.eup %3298 }
 0x434   :  { %v4020_v63 = vpop.xlane.xlu0 %1055  ;;  %v4028_v21 = vpop.xlane.xlu1 %1058 }
 0x438   :  { %v4031_v57 = vpop.xlane.xlu0 %1247  ;;  %v4036_v48 = vpop.xlane.xlu1 %1250 }
 0x43c   :  { %v4039_v53 = vpop.xlane.xlu0 %1061  ;;  %v4049_v7 = vpop.xlane.xlu1 %1064 }
 0x440   :  { %v4051_v31 = vpop.xlane.xlu0 %1253  ;;  %v4058_v61 = vpop.xlane.xlu1 %1256 }
 0x444   :  { %v4063_v35 = vpop.xlane.xlu0 %1073  ;;  %v4067_v20 = vpop.xlane.xlu1 %1076 }
 0x448   :  { %v4074_v29 = vpop.xlane.xlu0 %1265  ;;  %v4084_v22 = vpop.xlane.xlu1 %1268 }
 0x44c   :  { %v4093_v27 = vpop.xlane.xlu0 %979  ;;  %v4104_v56 = vpop.xlane.xlu1 %982 }
 0x44d   :  { %v1102_v11 = vmul.f32 %v4093_v27, %v749_v52  ;;  %v1103_v34 = vmul.f32 %v4104_v56, %v749_v52 }
 0x450   :  { %v1172_v59 = vpop.xlane.xlu0 %1171  ;;  %v1175_v8 = vpop.xlane.xlu1 %1174 }
 0x451   :  { %v1294_v55 = vmul.f32 %v1172_v59, %v749_v52  ;;  %v1295_v62 = vmul.f32 %v1175_v8, %v749_v52  ;;  %v4166_v59 = vadd.f32 %v1329_v18, %v1309_v30  ;;  %v1332_v8 = vmul.f32 %v3293_v19, %v4155_v4  ;;  %v787_v52 = vld [vmem:[%s4953_s6 + $0x68] sm:$0xff] }
 0x452   :  { %v753_v30 = vrot.slane %v715_v32, %v3535_v41  ;;  %v803_v26 = vmul.f32 %v787_v52, %v671_v5  ;;  %v757_v52 = vrot.slane %v4197_v49, %v3535_v41 }
 0x453   :  { %v1310_v42 = vsel %vm5080_vm3, %v1102_v11, %v1294_v55  ;;  %v1311_v39 = vsel %vm5084_vm8, %v1103_v34, %v1295_v62  ;;  %v1333_v56 = vmul.f32 %v3295_v36, %v4166_v59  ;;  %v802_v55 = vmul.f32 %v786_v13, %v671_v5  ;;  %vm5085_vm8 = vmmov %vm5080_vm3 }
 0x454   :  { %v4124_v25 = vpop.xlane.xlu0 %991  ;;  %v4137_v24 = vpop.xlane.xlu1 %994  ;;  %v4180_v58 = vadd.f32 %v1332_v8, %v1310_v42  ;;  %v1296_v62 = vmul.f32 %v4014_v6, %v753_v30  ;;  %v804_v42 = vmul.f32 %v788_v23, %v675_v46  ;;  %v1104_v8 = vmul.f32 %v4004_v44, %v753_v30  ;;  %v789_v6 = vld [vmem:[%s4953_s6 + $0x78] sm:$0xff] }
 0x455   :  { %v4193_v11 = vadd.f32 %v1333_v56, %v1311_v39  ;;  %v1297_v13 = vmul.f32 %v4017_v28, %v753_v30  ;;  %v830_v36 = vmul.f32 1.442695, %v802_v55  ;;  %v731_v39 = vcombine.high %v715_v32, %v715_v32 }
 0x456   :  { %v1336_v34 = vmul.f32 %v3297_v16, %v4180_v58  ;;  %v1105_v5 = vmul.f32 %v4011_v38, %v753_v30  ;;  %v1312_v9 = vsel %vm5080_vm3, %v1104_v8, %v1296_v62  ;;  %v832_v23 = vmul.f32 1.442695, %v803_v26  ;;  %v3301_v8 = vpop.eup %3300 }
 0x457   :  { %v1337_v45 = vmul.f32 %v3299_v17, %v4193_v11  ;;  %v834_v55 = vmul.f32 1.442695, %v804_v42  ;;  %v805_v16 = vmul.f32 %v789_v6, %v675_v46  ;;  %3304 = vpow2.f32 %v830_v36  ;;  %v3303_v36 = vpop.eup %3302 }
 0x458   :  { %v4145_v54 = vpop.xlane.xlu0 %1183  ;;  %v4158_v37 = vpop.xlane.xlu1 %1186  ;;  %v1338_v28 = vadd.f32 %v1336_v34, %v1312_v9  ;;  %v1313_v15 = vsel %vm5085_vm8, %v1105_v5, %v1297_v13  ;;  %v4217_v17 = vmul.f32 -1.442695, %v3548_v50  ;;  %v761_v38 = vrot.slane %v731_v39, %v3535_v41  ;;  %vm5086_vm8 = vmmov %vm5080_vm3 }
 0x459   :  { %v1298_v32 = vmul.f32 %v4145_v54, %v757_v52  ;;  %v1339_v62 = vadd.f32 %v1337_v45, %v1313_v15  ;;  %v1106_v40 = vmul.f32 %v4124_v25, %v757_v52  ;;  %v1299_v26 = vmul.f32 %v4158_v37, %v757_v52 }
 0x45a   :  { %3306 = vpow2.f32 %v832_v23  ;;  %v733_v46 = vcombine.high %v4197_v49, %v4197_v49  ;;  %v1368_v54 = vmul.f32 %v4102_v43, %v3965_v2  ;;  %v1340_v42 = vmul.f32 %v3301_v8, %v1338_v28 }
 0x45b   :  { %3308 = vpow2.f32 %v834_v55  ;;  %v836_v13 = vmul.f32 1.442695, %v805_v16  ;;  %v1369_v15 = vmul.f32 %v4114_v12, %v3967_v3  ;;  %v1370_v25 = vmul.f32 %v4128_v47, %v4031_v57 }
 0x45c   :  { %v4161_v60 = vpop.xlane.xlu0 %997  ;;  %v4171_v27 = vpop.xlane.xlu1 %1000  ;;  %v1107_v37 = vmul.f32 %v4137_v24, %v757_v52  ;;  %v1314_v6 = vsel %vm5080_vm3, %v1106_v40, %v1298_v32  ;;  %v1352_v39 = vmul.f32 %v4102_v43, %v3960_v0  ;;  %v1353_v2 = vmul.f32 %v4114_v12, %v3962_v1 }
 0x45d   :  { %v1371_v45 = vmul.f32 %v4135_v14, %v4036_v48  ;;  %v1341_v5 = vmul.f32 %v3303_v36, %v1339_v62  ;;  %v1354_v3 = vmul.f32 %v4128_v47, %v4020_v63  ;;  %v1372_v57 = vmul.f32 %v4155_v4, %v4051_v31 }
 0x45e   :  { %v1315_v24 = vsel %vm5086_vm8, %v1107_v37, %v1299_v26  ;;  %v1384_v0 = vsel %vm5080_vm3, %v1352_v39, %v1368_v54  ;;  %v1355_v1 = vmul.f32 %v4135_v14, %v4028_v21  ;;  %v1373_v48 = vmul.f32 %v4166_v59, %v4058_v61  ;;  %vm5089_vm8 = vmmov %vm5087_vm1 }
 0x45f   :  { %v1342_v43 = vadd.f32 %v1340_v42, %v1314_v6  ;;  %v1385_v12 = vsel %vm5087_vm1, %v1353_v2, %v1369_v15  ;;  %v1386_v63 = vsel %vm5088_vm2, %v1354_v3, %v1370_v25  ;;  %v1356_v31 = vmul.f32 %v4155_v4, %v4039_v53  ;;  %vm5090_vm3 = vmmov %vm5087_vm1 }
 0x460   :  { %v4178_v33 = vpop.xlane.xlu0 %1189  ;;  %v4191_v18 = vpop.xlane.xlu1 %1192  ;;  %v1108_v47 = vmul.f32 %v4161_v60, %v761_v38  ;;  %v1357_v23 = vmul.f32 %v4166_v59, %v4049_v7  ;;  %v1343_v14 = vadd.f32 %v1341_v5, %v1315_v24  ;;  %vm5091_vm2 = vmmov %vm5087_vm1  ;;  %v1109_v26 = vmul.f32 %v4171_v27, %v761_v38 }
 0x461   :  { %v1300_v40 = vmul.f32 %v4178_v33, %v761_v38  ;;  %v1387_v33 = vsel %vm5089_vm8, %v1355_v1, %v1371_v45  ;;  %v1301_v21 = vmul.f32 %v4191_v18, %v761_v38  ;;  %v3305_v61 = vpop.eup %3304  ;;  %v1388_v16 = vsel %vm5090_vm3, %v1356_v31, %v1372_v57  ;;  %vm5092_vm8 = vmmov %vm5087_vm1 }
 0x462   :  { %v1389_v60 = vsel %vm5091_vm2, %v1357_v23, %v1373_v48  ;;  %v1360_v7 = vmul.f32 %v1338_v28, %v4063_v35  ;;  %v1344_v59 = vmul.f32 %v3305_v61, %v1342_v43  ;;  %v1376_v36 = vmul.f32 %v1338_v28, %v4074_v29  ;;  %vm5093_vm3 = vmmov %vm5087_vm1 }
 0x463   :  { %v1316_v32 = vsel %vm5087_vm1, %v1108_v47, %v1300_v40  ;;  %v1317_v15 = vsel %vm5092_vm8, %v1109_v26, %v1301_v21  ;;  %v1377_v25 = vmul.f32 %v1339_v62, %v4084_v22  ;;  %3310 = vpow2.f32 %v836_v13  ;;  %vm5094_vm2 = vmmov %vm5087_vm1 }
 0x464   :  { %v4199_v19 = vpop.xlane.xlu0 %1067  ;;  %v4208_v56 = vpop.xlane.xlu1 %1070  ;;  %v1346_v27 = vadd.f32 %v1344_v59, %v1316_v32  ;;  %vm5095_vm8 = vmmov %vm5087_vm1  ;;  %v765_v47 = vrot.slane %v733_v46, %v3535_v41  ;;  %3312 = vpow2.f32 %v4217_v17 }
 0x465   :  { %v3307_v18 = vpop.eup %3306  ;;  %v1358_v54 = vmul.f32 %v4180_v58, %v4199_v19  ;;  %v1359_v42 = vmul.f32 %v4193_v11, %v4208_v56  ;;  %v1407_v56 = vadd.f32 %v1387_v33, %v1386_v63 }
 0x466   :  { %v1345_v38 = vmul.f32 %v3307_v18, %v1343_v14 }
 0x467   :  { %v1408_v13 = vrot.slane %v1407_v56, 4 }
 0x468   :  { %v1260_v44 = vpop.xlane.xlu0 %1259  ;;  %v1263_v30 = vpop.xlane.xlu1 %1262  ;;  %v1347_v45 = vadd.f32 %v1345_v38, %v1317_v15 }
 0x469   :  { %v1374_v8 = vmul.f32 %v4180_v58, %v1260_v44  ;;  %v1375_v53 = vmul.f32 %v4193_v11, %v1263_v30  ;;  %v1361_v44 = vmul.f32 %v1339_v62, %v4067_v20  ;;  %v3309_v30 = vpop.eup %3308  ;;  %v1400_v11 = vadd.f32 %v1385_v12, %v1384_v0 }
 0x46a   :  { %v1414_v20 = vadd.f32 %v1389_v60, %v1388_v16  ;;  %v1392_v62 = vsel %vm5094_vm2, %v1360_v7, %v1376_v36  ;;  %vm5100_vm2 = vmmov %vm5097_vm0 }
 0x46b   :  { %v1390_v37 = vsel %vm5093_vm3, %v1358_v54, %v1374_v8  ;;  %v1391_v6 = vsel %vm5087_vm1, %v1359_v42, %v1375_v53  ;;  %v1393_v5 = vsel %vm5095_vm8, %v1361_v44, %v1377_v25  ;;  %vm5096_vm3 = vmmov %vm5087_vm1  ;;  %v1348_v54 = vmul.f32 %v3309_v30, %v1346_v27 }
 0x46c   :  { %v4222_v34 = vpop.xlane.xlu0 %1079  ;;  %v1083_v9 = vpop.xlane.xlu1 %1082  ;;  %v1421_v22 = vadd.f32 %v1391_v6, %v1390_v37  ;;  %v1428_v63 = vadd.f32 %v1393_v5, %v1392_v62  ;;  %vm5101_vm8 = vmmov %vm5097_vm0 }
 0x46d   :  { %v1362_v28 = vmul.f32 %v1342_v43, %v4222_v34  ;;  %v1363_v2 = vmul.f32 %v1343_v14, %v1083_v9  ;;  %v1401_v34 = vrot.slane %v1400_v11, 4  ;;  %v1415_v9 = vrot.slane %v1414_v20, 4  ;;  %v3311_v8 = vpop.eup %3310 }
 0x46e   :  { %v1422_v12 = vrot.slane %v1421_v22, 4  ;;  %v1349_v15 = vmul.f32 %v3311_v8, %v1347_v45 }
 0x46f   :  { %v1402_v16 = vadd.f32 %v1401_v34, %v1400_v11  ;;  %v1416_v32 = vadd.f32 %v1415_v9, %v1414_v20 }
 0x470   :  { %v1272_v52 = vpop.xlane.xlu0 %1271  ;;  %v1275_v55 = vpop.xlane.xlu1 %1274  ;;  %v1423_v53 = vadd.f32 %v1422_v12, %v1421_v22 }
 0x471   :  { %v1378_v58 = vmul.f32 %v1342_v43, %v1272_v52  ;;  %v1379_v19 = vmul.f32 %v1343_v14, %v1275_v55  ;;  %v1409_v14 = vadd.f32 %v1408_v13, %v1407_v56  ;;  %v1417_v42 = vrot.slane %v1416_v32, 2 }
 0x472   :  { %v1403_v25 = vrot.slane %v1402_v16, 2  ;;  %v1424_v38 = vrot.slane %v1423_v53, 2 }
 0x473   :  { %v1394_v24 = vsel %vm5096_vm3, %v1362_v28, %v1378_v58  ;;  %v1395_v40 = vsel %vm5087_vm1, %v1363_v2, %v1379_v19  ;;  %v1410_v17 = vrot.slane %v1409_v14, 2  ;;  %v1418_v20 = vadd.f32 %v1417_v42, %v1416_v32 }
 0x474   :  { %v1086_v4 = vpop.xlane.xlu0 %1085  ;;  %v1089_v35 = vpop.xlane.xlu1 %1088  ;;  %v1435_v31 = vadd.f32 %v1395_v40, %v1394_v24  ;;  %v1404_v30 = vadd.f32 %v1403_v25, %v1402_v16  ;;  %vm5023_vm3 = vcmask 1040384   ;;  %vm1458_vm1 = vcmask 1041408  }
 0x475   :  { %v1364_v3 = vmul.f32 %v1346_v27, %v1086_v4  ;;  %v1365_v52 = vmul.f32 %v1347_v45, %v1089_v35  ;;  %v1429_v4 = vrot.slane %v1428_v63, 4  ;;  %v1411_v11 = vadd.f32 %v1410_v17, %v1409_v14 }
 0x476   :  { %v1436_v60 = vrot.slane %v1435_v31, 4 }
 0x477   :  { %v1430_v35 = vadd.f32 %v1429_v4, %v1428_v63  ;;  %v1412_v40 = vrot.slane %v1411_v11, 1 }
 0x478   :  { %v1278_v39 = vpop.xlane.xlu0 %1277  ;;  %v1281_v57 = vpop.xlane.xlu1 %1280  ;;  %v1437_v37 = vadd.f32 %v1436_v60, %v1435_v31 }
 0x479   :  { %v1380_v29 = vmul.f32 %v1346_v27, %v1278_v39  ;;  %v1381_v0 = vmul.f32 %v1347_v45, %v1281_v57  ;;  %v1425_v27 = vadd.f32 %v1424_v38, %v1423_v53  ;;  %v1431_v62 = vrot.slane %v1430_v35, 2 }
 0x47a   :  { %v1438_v2 = vrot.slane %v1437_v37, 2  ;;  %v1413_v12 = vadd.f32 %v1412_v40, %v1411_v11 }
 0x47b   :  { %v1396_v48 = vsel %vm5097_vm0, %v1364_v3, %v1380_v29  ;;  %v1397_v43 = vsel %vm5098_vm5, %v1365_v52, %v1381_v0  ;;  %vm5099_vm5 = vmmov %vm5097_vm0  ;;  %v3313_v29 = vpop.eup %3312  ;;  %v1419_v52 = vrot.slane %v1418_v20, 1  ;;  %v1426_v13 = vrot.slane %v1425_v27, 1 }
 0x47c   :  { %v1004_v1 = vpop.xlane.xlu0 %1003  ;;  %v1007_v33 = vpop.xlane.xlu1 %1006  ;;  %v1442_v23 = vadd.f32 %v1397_v43, %v1396_v48  ;;  %v1479_v24 = vadd.f32 1.0, %v3313_v29  ;;  %v1439_v48 = vadd.f32 %v1438_v2, %v1437_v37  ;;  %v1432_v43 = vadd.f32 %v1431_v62, %v1430_v35  ;;  %v3243_v2 = vld [vmem:[%s4949_s2 + $0x50] ss:$8 sps:$4 sm:$0xff]   ;;  %v3246_v62 = vld [vmem:[%s4949_s2 + $0x60] ss:$8 sps:$4 sm:$0xff]  }
 0x47d   :  { %v1110_v55 = vmul.f32 %v1004_v1, %v765_v47  ;;  %v1111_v49 = vmul.f32 %v1007_v33, %v765_v47  ;;  %v1405_v1 = vrot.slane %v1404_v30, 1  ;;  %v1420_v31 = vadd.f32 %v1419_v52, %v1418_v20 }
 0x47e   :  { %v1443_v59 = vrot.slane %v1442_v23, 4  ;;  %3314 = vrcp.f32 %v1479_v24  ;;  %v1427_v33 = vadd.f32 %v1426_v13, %v1425_v27  ;;  %v5102_v37 = vmov 0.0   ;;  %v3245_v27 = vld [vmem:[%s4949_s2 + $0x54] ss:$8 sps:$4 sm:$0xff]  }
 0x480   :  { %v1196_v21 = vpop.xlane.xlu0 %1195  ;;  %v1199_v26 = vpop.xlane.xlu1 %1198  ;;  %v1444_v58 = vadd.f32 %v1443_v59, %v1442_v23  ;;  %v1440_v23 = vrot.slane %v1439_v48, 1 }
 0x481   :  { %v1302_v61 = vmul.f32 %v1196_v21, %v765_v47  ;;  %v1303_v46 = vmul.f32 %v1199_v26, %v765_v47  ;;  %v1406_v47 = vadd.f32 %v1405_v1, %v1404_v30  ;;  %v3242_v30 = vld [vmem:[%s4949_s2 + $0x44] ss:$8 sps:$4 sm:$0xff]  }
 0x482   :  { %v1445_v5 = vrot.slane %v1444_v58, 2  ;;  %v1441_v53 = vadd.f32 %v1440_v23, %v1439_v48  ;;  %1676 = vmatprep.subr.bf16.mxu1 %v3242_v30  ;;  %v3255_v23 = vld [vmem:[%s4950_s3 + $0x58] sm:$0xff]  }
 0x483   :  { %v1318_v7 = vsel %vm5097_vm0, %v1110_v55, %v1302_v61  ;;  %v1319_v44 = vsel %vm5099_vm5, %v1111_v49, %v1303_v46  ;;  %vm5024_vm0 = vcmask 1042432   ;;  %v1433_v55 = vrot.slane %v1432_v43, 1 }
 0x484   :  { %v1092_v18 = vpop.xlane.xlu0 %1091  ;;  %v1350_v36 = vadd.f32 %v1348_v54, %v1318_v7  ;;  %v1095_v6 = vpop.xlane.xlu1 %1094  ;;  %v1351_v19 = vadd.f32 %v1349_v15, %v1319_v44  ;;  %v1446_v9 = vadd.f32 %v1445_v5, %v1444_v58  ;;  %v1457_v61 = vsel %vm5023_vm3, %v1406_v47, %v1413_v12  ;;  %v3368_v7 = vld [vmem:[%s4954_s7] sm:$0x7f]  ;;  %v3251_v5 = vld [vmem:[%s4949_s2 + $0x74] ss:$8 sps:$4 sm:$0xff]   ;;  %v3253_v47 = vld [vmem:[%s4950_s3 + $0x48] sm:$0xff]  }
 0x485   :  { %v1459_v32 = vsel %vm1458_vm1, %v1457_v61, %v1420_v31  ;;  %vm1462_vm5 = vcmask 1043456   ;;  %v1434_v26 = vadd.f32 %v1433_v55, %v1432_v43  ;;  %v1473_v59 = vrot.slane %v3368_v7, %v3910_v51  ;;  %v3369_v58 = vld [vmem:[%s4947_s0] sm:$0xff]  ;;  %v3258_v55 = vld [vmem:[%s4950_s3 + $0x70] sm:$0xff]   ;;  %v3259_v61 = vld [vmem:[%s4950_s3 + $0x78] sm:$0xff]  }
 0x486   :  { %v1366_v28 = vmul.f32 %v1350_v36, %v1092_v18  ;;  %v1367_v45 = vmul.f32 %v1351_v19, %v1095_v6  ;;  %v1447_v14 = vrot.slane %v1446_v9, 1  ;;  %v1461_v8 = vsel %vm5024_vm0, %v1459_v32, %v1427_v33  ;;  %v3252_v31 = vld [vmem:[%s4950_s3 + $0x40] sm:$0xff]   ;;  %v3254_v33 = vld [vmem:[%s4950_s3 + $0x50] sm:$0xff]  }
 0x487   :  { %v1463_v46 = vsel %vm1462_vm5, %v1461_v8, %v1434_v26  ;;  %vm5025_vm3 = vcmask 1046528   ;;  %vm5103_vm0 = vmmov 0   ;;  %v5107_v8 = vld [vmem:[#allocation6_spill] sm:$0xff] }
 0x488   :  { %v1284_v39 = vpop.xlane.xlu0 %1283  ;;  %v1287_v22 = vpop.xlane.xlu1 %1286  ;;  %v1448_v60 = vadd.f32 %v1447_v14, %v1446_v9  ;;  %v2989_v9 = vld [vmem:[%s4948_s1 + $0x1] ss:$0 sm:$0xff]  ;;  %v3257_v14 = vld [vmem:[%s4950_s3 + $0x68] sm:$0xff]  }
 0x489   :  { %v1382_v56 = vmul.f32 %v1350_v36, %v1284_v39  ;;  %v1383_v57 = vmul.f32 %v1351_v19, %v1287_v22  ;;  %v3315_v18 = vpop.eup %3314  ;;  %v1474_v36 = vmul.f32 %v1473_v59, %v3569_v10  ;;  %v3248_v22 = vld [vmem:[%s4949_s2 + $0x64] ss:$8 sps:$4 sm:$0xff]  }
 0x48a   :  { %v1482_v15 = vmul.f32 %v3315_v18, %v3548_v50 }
 0x48b   :  { %v1398_v3 = vsel %vm5100_vm2, %v1366_v28, %v1382_v56  ;;  %v1399_v0 = vsel %vm5101_vm8, %v1367_v45, %v1383_v57  ;;  %vm5027_vm2 = vcmask 1044480   ;;  %vm5026_vm8 = vcmask 1045504   ;;  %v3240_v28 = vld [vmem:[%s4949_s2 + $0x40] ss:$8 sps:$4 sm:$0xff]   ;;  %v3249_v45 = vld [vmem:[%s4949_s2 + $0x70] ss:$8 sps:$4 sm:$0xff]  }
 0x48c   :  { %v1449_v34 = vadd.f32 %v1399_v0, %v1398_v3  ;;  %v1465_v17 = vsel %vm5027_vm2, %v1463_v46, %v1441_v53  ;;  %1677 = vmatpush1.bf16.msra.mxu1 %v3240_v28 }
 0x48d   :  { %v1467_v42 = vsel %vm5026_vm8, %v1465_v17, %v1448_v60  ;;  %1678 = vmatprep.subr.bf16.mxu1 %v3245_v27 }
 0x48e   :  { %v1450_v63 = vrot.slane %v1449_v34, 4 }
 0x490   :  { %v1451_v21 = vadd.f32 %v1450_v63, %v1449_v34  ;;  %1679 = vmatpush1.bf16.msra.mxu1 %v3243_v2 }
 0x491   :  { %1680 = vmatprep.subr.bf16.mxu1 %v3248_v22 }
 0x492   :  { %v1452_v16 = vrot.slane %v1451_v21, 2 }
 0x494   :  { %v1453_v4 = vadd.f32 %v1452_v16, %v1451_v21  ;;  %1681 = vmatpush1.bf16.msra.mxu1 %v3246_v62  ;;  %v3256_v21 = vld [vmem:[%s4950_s3 + $0x60] sm:$0xff]   ;;  %v4386_v16 = vld [vmem:[%s4954_s7 + $0x8] sm:$0x7f] }
 0x495   :  { %1682 = vmatprep.subr.bf16.mxu1 %v3251_v5  ;;  %v1722_v53 = vrot.slane %v4386_v16, %v5107_v8  ;;  %v1727_v59 = vrot.slane %v4386_v16, %v3535_v41 }
 0x496   :  { %v1454_v49 = vrot.slane %v1453_v4, 1 }
 0x498   :  { %v1455_v54 = vadd.f32 %v1454_v49, %v1453_v4  ;;  %1683 = vmatpush1.bf16.msra.mxu1 %v3249_v45  ;;  %v5108_v49 = vld [vmem:[#allocation5_spill] sm:$0xff]  ;;  %v5115_v45 = vld [vmem:[#allocation7_spill] sm:$0xff] }
 0x499   :  { %3171 = vmatprep.subr.bf16.mxu1 %v5102_v37  ;;  %v5109_v46 = vsub.s32 4, %v5108_v49 }
 0x49a   :  { %v1469_v44 = vsel %vm5025_vm3, %v1467_v42, %v1455_v54  ;;  %vm5104_vm3 = vcmask 261120  }
 0x49b   :  { %v1475_v25 = vadd.f32 %v1474_v36, %v1469_v44  ;;  %vm5105_vm8 = vmmov %vm5104_vm3  ;;  %v1734_v18 = vrot.slane %v4386_v16, %v5109_v46 }
 0x49d   :  { %v1483_v38 = vmul.f32 %v1482_v15, %v1475_v25  ;;  %v5112_v15 = vsub.s32 5, %v5108_v49 }
 0x49f   :  { %v1484_v35 = vpack.c.bf16 %v1483_v38, %v1483_v38  ;;  %v1742_v25 = vrot.slane %v4386_v16, %v5112_v15 }
 0x4a1   :  { %3148 = vmatmul.mubr.bf16.vlgmr.msra.gmra.mrb[4].mxu0 %v1484_v35 }
 0x4a2   :  { %3167 = vmatprep.mubr.msk.bf16.mxu0 %vm5103_vm0, %v5102_v37  ;;  %3152 = vmatpush3.bf16.msra.mxu0 %v3252_v31 }
 0x4a3   :  { %3153 = vmatprep.subr.bf16.mxu0 %v5102_v37 }
 0x4a6   :  { %3154 = vmatpush3.bf16.msra.mxu0 %v3253_v47 }
 0x4a7   :  { %3155 = vmatprep.subr.bf16.mxu0 %v5102_v37 }
 0x4aa   :  { %3156 = vmatpush3.bf16.msra.mxu0 %v3254_v33 }
 0x4ab   :  { %3157 = vmatprep.subr.bf16.mxu0 %v5102_v37 }
 0x4ae   :  { %3158 = vmatpush3.bf16.msra.mxu0 %v3255_v23 }
 0x4af   :  { %3159 = vmatprep.subr.bf16.mxu0 %v5102_v37 }
 0x4b2   :  { %3160 = vmatpush3.bf16.msra.mxu0 %v3256_v21 }
 0x4b3   :  { %3161 = vmatprep.subr.bf16.mxu0 %v5102_v37 }
 0x4b6   :  { %3162 = vmatpush3.bf16.msra.mxu0 %v3257_v14 }
 0x4b7   :  { %3163 = vmatprep.subr.bf16.mxu0 %v5102_v37 }
 0x4ba   :  { %3164 = vmatpush3.bf16.msra.mxu0 %v3258_v55 }
 0x4bb   :  { %3165 = vmatprep.subr.bf16.mxu0 %v5102_v37 }
 0x4be   :  { %3166 = vmatpush3.bf16.msra.mxu0 %v3259_v61 }
 0x574   :  { %v1583_v6 = vpop.f32.mrb[4].mxu0 }
 0x575   :  { %v4311_v19 = vadd.f32 %v3369_v58, %v1583_v6  ;;  %v3149_v39 = vpop.f32.mrb[5].mxu0  ;;  %v5114_v58 = vsub.s32 6, %v5108_v49 }
 0x576   :  { %v1586_v10 = vpop.f32.mrb[6].mxu0 }
 0x577   :  { %v3150_v11 = vpop.f32.mrb[7].mxu0  ;;  %v1596_v50 = vmul.f32 %v4311_v19, %v4311_v19  ;;  %v1748_v39 = vrot.slane %v4386_v16, %v5114_v58 }
 0x579   :  { %1605 = vrot.lane.b32.xlu0 %v1596_v50, %s3395_s29  ;;  %v1597_v56 = vsel %vm5104_vm3, %v1596_v50, 0.0 }
 0x57a   :  { %1598 = vadd.xlane.f32.xlu1 %v1597_v56 }
 0x5eb   :  { %v1606_v29 = vpop.permute.xlu0 %1605 }
 0x5ec   :  { %v1608_v20 = vsel %vm5105_vm8, %v1606_v29, 0.0  ;;  %vm5106_vm8 = vcmask 523264  }
 0x5ed   :  { %1609 = vadd.xlane.f32.xlu1 %v1608_v20 }
 0x607   :  { %v1599_v3 = vpop.xlane.xlu1 %1598 }
 0x608   :  { %v1600_v57 = vmul.f32 0.03125, %v1599_v3 }
 0x60a   :  { %v1601_v24 = vadd.f32 1e-05, %v1600_v57 }
 0x60c   :  { %3316 = vrsqrt.f32 %v1601_v24 }
 0x616   :  { %v3317_v1 = vpop.eup %3316 }
 0x617   :  { %v1603_v48 = vmul.f32 %v3317_v1, %v4311_v19  ;;  %v5117_v1 = vmov 3  }
 0x67a   :  { %v1610_v40 = vpop.xlane.xlu1 %1609 }
 0x67b   :  { %v1611_v52 = vmul.f32 0.03125, %v1610_v40 }
 0x67d   :  { %v1612_v0 = vadd.f32 1e-05, %v1611_v52 }
 0x67f   :  { %3318 = vrsqrt.f32 %v1612_v0  ;;  %v5116_v0 = vmov 2  }
 0x689   :  { %v3319_v13 = vpop.eup %3318 }
 0x68a   :  { %v1614_v34 = vmul.f32 %v3319_v13, %v4311_v19 }
 0x68c   :  { %v1615_v43 = vsel %vm5104_vm3, %v1603_v48, %v1614_v34  ;;  %vm5111_vm3 = vcmp.ge.s32.totalorder %v5108_v49, 2 }
 0x68d   :  { %v1622_v12 = vmul.f32 %v2989_v9, %v1615_v43 }
 0x68f   :  { %v1623_v63 = vpack.c.bf16 %v1622_v12, %v1622_v12 }
 0x691   :  { %3006 = vmatmul.mubr.msk.bf16.vlgmr.msra.gmra.mrb[4].mxu1 %vm5106_vm8, %v1623_v63  ;;  %vm5113_vm8 = vcmp.ge.s32.totalorder %v5108_v49, 1 }
 0x692   :  { %3187 = vmatprep.mubr.msk.bf16.mxu1 %vm5103_vm0, %v5102_v37  ;;  %vm5110_vm0 = vcmp.ge.s32.totalorder %v5108_v49, 3 }
 0x764   :  { %v1710_v32 = vpop.f32.mrb[4].mxu1 }
 0x765   :  { %v1717_v4 = vrot.slane %v1710_v32, 5  ;;  %v1729_v60 = vrot.slane %v1710_v32, 6  ;;  %v1737_v26 = vrot.slane %v1710_v32, 7  ;;  %v4390_v7 = vpop.f32.mrb[5].mxu1  ;;  %v1749_v56 = vmul.f32 %v1748_v39, %v1710_v32 }
 0x766   :  { %v1714_v54 = vpop.f32.mrb[6].mxu1 }
 0x767   :  { %v1718_v17 = vsel %vm5110_vm0, %v1717_v4, 0.0  ;;  %v1730_v42 = vsel %vm5111_vm3, %v1729_v60, 0.0  ;;  %v1715_v36 = vpop.f32.mrb[7].mxu1  ;;  %v1738_v38 = vsel %vm5113_vm8, %v1737_v26, 0.0  ;;  %vm5119_vm0 = vcmask 130048  }
 0x768   :  { %v1723_v44 = vmul.f32 %v1722_v53, %v1718_v17  ;;  %v1735_v6 = vmul.f32 %v1734_v18, %v1730_v42  ;;  %v1743_v11 = vmul.f32 %v1742_v25, %v1738_v38  ;;  %vm5121_vm3 = vmmov %vm5119_vm0 }
 0x769   :  { %vm5122_vm8 = vmmov %vm5119_vm0 }
 0x76a   :  { %v1728_v35 = vadd.f32 %v1727_v59, %v1723_v44  ;;  %vm5123_vm2 = vmmov %vm5119_vm0 }
 0x76c   :  { %v1736_v10 = vadd.f32 %v1735_v6, %v1728_v35 }
 0x76e   :  { %v1744_v50 = vadd.f32 %v1743_v11, %v1736_v10 }
 0x770   :  { %v1750_v29 = vadd.f32 %v1749_v56, %v1744_v50 }
 0x772   :  { %v3007_v20 = vmul.f32 -1.442695, %v1750_v29 }
 0x774   :  { %3320 = vpow2.f32 %v3007_v20 }
 0x77e   :  { %v3321_v28 = vpop.eup %3320 }
 0x77f   :  { %v1754_v30 = vadd.f32 1.0, %v3321_v28 }
 0x781   :  { %3322 = vrcp.f32 %v1754_v30 }
 0x78b   :  { %v3323_v27 = vpop.eup %3322 }
 0x78c   :  { %v4409_v2 = vmul.f32 %v3323_v27, %v1750_v29 }
 0x78e   :  { %v1758_v22 = vpack.c.bf16 %v4409_v2, %v4409_v2 }
 0x790   :  { %3168 = vmatmul.mubr.bf16.vlgmr.msra.gmra.mrb[8].mxu0 %v1758_v22 }
 0x863   :  { %v1858_v62 = vpop.f32.mrb[8].mxu0 }
 0x864   :  { %1880 = vperm.xlu1 %3209, %v1858_v62   ;;  %1866 = vperm.xlu0 %3208, %v1858_v62   ;;  %v3169_v5 = vpop.f32.mrb[9].mxu0  ;;  %v2176_v3 = vrot.slane %v1858_v62, %v5115_v45  ;;  %v2169_v13 = vcombine.high %v1858_v62, %v1858_v62 }
 0x865   :  { %v1861_v57 = vpop.f32.mrb[10].mxu0 }
 0x866   :  { %v3170_v24 = vpop.f32.mrb[11].mxu0  ;;  %v2192_v40 = vrot.slane %v2176_v3, %v5115_v45  ;;  %v2184_v52 = vcombine.high %v2176_v3, %v2176_v3  ;;  %v2183_v12 = vrot.slane %v2169_v13, %v5115_v45 }
 0x868   :  { %3210 = vset.pattern.permute.xlu1 %v5116_v0  ;;  %3211 = vset.pattern.permute.xlu0 %v5117_v1  ;;  %v2221_v48 = vrot.slane %v2192_v40, %v3535_v41  ;;  %v2206_v34 = vrot.slane %v2184_v52, %v5115_v45  ;;  %v2214_v43 = vcombine.high %v2192_v40, %v2192_v40 }
 0x869   :  { %1890 = vperm.xlu1 %3210, %v1858_v62   ;;  %1900 = vperm.xlu0 %3211, %v1858_v62   ;;  %v2199_v31 = vrot.slane %v2183_v12, %v5115_v45  ;;  %v2185_v33 = vcombine.high %v2183_v12, %v2183_v12 }
 0x86a   :  { %v2225_v9 = vrot.slane %v2206_v34, %v3535_v41  ;;  %v2229_v63 = vrot.slane %v2214_v43, %v3535_v41  ;;  %v2216_v61 = vcombine.high %v2206_v34, %v2206_v34 }
 0x86b   :  { %v2237_v47 = vrot.slane %v2199_v31, %v3535_v41  ;;  %v2213_v23 = vrot.slane %v2185_v33, %v5115_v45  ;;  %v2215_v14 = vcombine.high %v2199_v31, %v2199_v31 }
 0x86c   :  { %v2233_v32 = vrot.slane %v2216_v61, %v3535_v41 }
 0x86d   :  { %2442 = vrot.lane.b32.xlu0 %v2221_v48, %s3406_s26  ;;  %2250 = vrot.lane.b32.xlu1 %v2221_v48, %s3405_s25  ;;  %v2241_v21 = vrot.slane %v2213_v23, %v3535_v41  ;;  %v2245_v55 = vrot.slane %v2215_v14, %v3535_v41  ;;  %v2217_v53 = vcombine.high %v2213_v23, %v2213_v23 }
 0x86f   :  { %v2249_v4 = vrot.slane %v2217_v53, %v3535_v41 }
 0x871   :  { %2338 = vrot.lane.b32.xlu0 %v2221_v48, %s3402_s23  ;;  %2444 = vrot.lane.b32.xlu1 %v2225_v9, %s3406_s26 }
 0x875   :  { %2530 = vrot.lane.b32.xlu0 %v2221_v48, %s3404_s24  ;;  %2254 = vrot.lane.b32.xlu1 %v2229_v63, %s3405_s25 }
 0x879   :  { %2252 = vrot.lane.b32.xlu0 %v2225_v9, %s3405_s25  ;;  %2450 = vrot.lane.b32.xlu1 %v2237_v47, %s3406_s26 }
 0x87d   :  { %2446 = vrot.lane.b32.xlu0 %v2229_v63, %s3406_s26  ;;  %2340 = vrot.lane.b32.xlu1 %v2225_v9, %s3402_s23 }
 0x881   :  { %2532 = vrot.lane.b32.xlu1 %v2225_v9, %s3404_s24  ;;  %2258 = vrot.lane.b32.xlu0 %v2237_v47, %s3405_s25 }
 0x885   :  { %2342 = vrot.lane.b32.xlu1 %v2229_v63, %s3402_s23  ;;  %2346 = vrot.lane.b32.xlu0 %v2237_v47, %s3402_s23 }
 0x889   :  { %2534 = vrot.lane.b32.xlu1 %v2229_v63, %s3404_s24  ;;  %2260 = vrot.lane.b32.xlu0 %v2241_v21, %s3405_s25 }
 0x88d   :  { %2538 = vrot.lane.b32.xlu1 %v2237_v47, %s3404_s24  ;;  %2262 = vrot.lane.b32.xlu0 %v2245_v55, %s3405_s25 }
 0x891   :  { %2256 = vrot.lane.b32.xlu1 %v2233_v32, %s3405_s25  ;;  %2344 = vrot.lane.b32.xlu0 %v2233_v32, %s3402_s23 }
 0x895   :  { %2448 = vrot.lane.b32.xlu1 %v2233_v32, %s3406_s26  ;;  %2348 = vrot.lane.b32.xlu0 %v2241_v21, %s3402_s23 }
 0x899   :  { %2452 = vrot.lane.b32.xlu1 %v2241_v21, %s3406_s26  ;;  %2350 = vrot.lane.b32.xlu0 %v2245_v55, %s3402_s23 }
 0x89d   :  { %2454 = vrot.lane.b32.xlu1 %v2245_v55, %s3406_s26  ;;  %2264 = vrot.lane.b32.xlu0 %v2249_v4, %s3405_s25 }
 0x8a1   :  { %2536 = vrot.lane.b32.xlu1 %v2233_v32, %s3404_s24  ;;  %2456 = vrot.lane.b32.xlu0 %v2249_v4, %s3406_s26 }
 0x8a5   :  { %2540 = vrot.lane.b32.xlu1 %v2241_v21, %s3404_s24  ;;  %2352 = vrot.lane.b32.xlu0 %v2249_v4, %s3402_s23 }
 0x8a9   :  { %2542 = vrot.lane.b32.xlu1 %v2245_v55, %s3404_s24 }
 0x8ad   :  { %2544 = vrot.lane.b32.xlu1 %v2249_v4, %s3404_s24 }
 0x8e3   :  { %v4461_v60 = vpop.permute.xlu1 %1880  ;;  %v4463_v26 = vpop.permute.xlu0 %1866 }
 0x8e8   :  { %v4465_v59 = vpop.permute.xlu1 %1890  ;;  %v4467_v49 = vpop.permute.xlu0 %1900 }
 0x8ec   :  { %v2443_v46 = vpop.permute.xlu0 %2442  ;;  %v2251_v18 = vpop.permute.xlu1 %2250 }
 0x8ed   :  { %v2275_v17 = vsel %vm3639_vm6, %v2251_v18, 0.0  ;;  %v2274_v44 = vsel %vm3644_vm7, %v2251_v18, 0.0  ;;  %v2466_v25 = vsel %vm3644_vm7, %v2443_v46, 0.0  ;;  %v2467_v10 = vsel %vm3639_vm6, %v2443_v46, 0.0 }
 0x8ee   :  { %v2293_v42 = vsel %vm5119_vm0, %v2275_v17, 0.0  ;;  %v2290_v15 = vsel %vm5121_vm3, %v2274_v44, 0.0  ;;  %v2482_v39 = vsel %vm5123_vm2, %v2466_v25, 0.0  ;;  %vm5124_vm3 = vmmov %vm5119_vm0 }
 0x8ef   :  { %2294 = vadd.xlane.f32.xlu1 %v2293_v42  ;;  %2291 = vadd.xlane.f32.xlu0 %v2290_v15  ;;  %v2485_v29 = vsel %vm5124_vm3, %v2467_v10, 0.0  ;;  %vm5126_vm2 = vmmov %vm5119_vm0  ;;  %v2987_v10 = vld [vmem:[%s4952_s5 + $0x4] sm:$0xf] }
 0x8f0   :  { %v2339_v38 = vpop.permute.xlu0 %2338  ;;  %v2445_v6 = vpop.permute.xlu1 %2444  ;;  %vm5131_vm3 = vmmov %vm5119_vm0  ;;  %v1896_v48 = vrot.slane %v2987_v10, %v3910_v51 }
 0x8f1   :  { %v2362_v35 = vsel %vm3644_vm7, %v2339_v38, 0.0  ;;  %v2363_v20 = vsel %vm3639_vm6, %v2339_v38, 0.0  ;;  %v2468_v5 = vsel %vm3675_vm9, %v2445_v6, 0.0  ;;  %v2469_v63 = vsel %vm3680_vm10, %v2445_v6, 0.0 }
 0x8f2   :  { %v2378_v58 = vsel %vm5122_vm8, %v2362_v35, 0.0  ;;  %vm5128_vm8 = vmmov %vm5119_vm0 }
 0x8f3   :  { %2379 = vadd.xlane.f32.xlu1 %v2378_v58  ;;  %2483 = vadd.xlane.f32.xlu0 %v2482_v39  ;;  %v2488_v52 = vsel %vm5128_vm8, %v2468_v5, 0.0  ;;  %vm5137_vm8 = vmmov %vm5119_vm0  ;;  %v5146_v5 = vld [vmem:[#allocation22_spill] sm:$0xff] }
 0x8f4   :  { %v2531_v11 = vpop.permute.xlu0 %2530  ;;  %v2255_v28 = vpop.permute.xlu1 %2254  ;;  %v1886_v0 = vrot.slane %v2987_v10, %v5146_v5 }
 0x8f5   :  { %v2554_v50 = vsel %vm3644_vm7, %v2531_v11, 0.0  ;;  %vm5127_vm7 = vmmov %vm5119_vm0  ;;  %v2555_v57 = vsel %vm3639_vm6, %v2531_v11, 0.0  ;;  %v2278_v1 = vsel %vm3699_vm11, %v2255_v28, 0.0  ;;  %v2279_v61 = vsel %vm3704_vm12, %v2255_v28, 0.0 }
 0x8f6   :  { %v2570_v56 = vsel %vm5119_vm0, %v2554_v50, 0.0  ;;  %v2381_v3 = vsel %vm5127_vm7, %v2363_v20, 0.0  ;;  %v2573_v13 = vsel %vm5119_vm0, %v2555_v57, 0.0  ;;  %v2302_v9 = vsel %vm5131_vm3, %v2278_v1, 0.0  ;;  %vm5132_vm6 = vmmov %vm5119_vm0 }
 0x8f7   :  { %2571 = vadd.xlane.f32.xlu1 %v2570_v56  ;;  %2486 = vadd.xlane.f32.xlu0 %v2485_v29  ;;  %vm5135_vm7 = vmmov %vm5119_vm0  ;;  %v2305_v46 = vsel %vm5119_vm0, %v2279_v61, 0.0  ;;  %v1872_v29 = vrot.slane %v2987_v10, %v3535_v41 }
 0x8f8   :  { %v2253_v30 = vpop.permute.xlu0 %2252  ;;  %v2451_v24 = vpop.permute.xlu1 %2450  ;;  %v2491_v14 = vsel %vm5135_vm7, %v2469_v63, 0.0  ;;  %vm5138_vm3 = vmmov %vm5119_vm0 }
 0x8f9   :  { %v2276_v22 = vsel %vm3675_vm9, %v2253_v30, 0.0  ;;  %v2277_v34 = vsel %vm3680_vm10, %v2253_v30, 0.0  ;;  %v2474_v4 = vsel %vm3725_vm13, %v2451_v24, 0.0  ;;  %vm5142_vm7 = vmmov %vm5119_vm0  ;;  %v2475_v6 = vsel %vm3732_vm14, %v2451_v24, 0.0 }
 0x8fa   :  { %v2296_v62 = vsel %vm5126_vm2, %v2276_v22, 0.0  ;;  %v2299_v12 = vsel %vm5132_vm6, %v2277_v34, 0.0  ;;  %vm5133_vm2 = vmmov %vm5119_vm0  ;;  %v2506_v54 = vsel %vm5138_vm3, %v2474_v4, 0.0  ;;  %v2509_v50 = vsel %vm5119_vm0, %v2475_v6, 0.0 }
 0x8fb   :  { %2297 = vadd.xlane.f32.xlu1 %v2296_v62  ;;  %2382 = vadd.xlane.f32.xlu0 %v2381_v3  ;;  %vm5139_vm6 = vmmov %vm5119_vm0  ;;  %v1877_v3 = vrot.slane %v4386_v16, %v5146_v5  ;;  %v1873_v57 = vmul.f32 %v1872_v29, %v4463_v26 }
 0x8fc   :  { %v2447_v40 = vpop.permute.xlu0 %2446  ;;  %v2341_v31 = vpop.permute.xlu1 %2340  ;;  %vm5145_vm3 = vmmov %vm5119_vm0 }
 0x8fd   :  { %v2470_v43 = vsel %vm3699_vm11, %v2447_v40, 0.0  ;;  %v2471_v18 = vsel %vm3704_vm12, %v2447_v40, 0.0  ;;  %v2364_v17 = vsel %vm3675_vm9, %v2341_v31, 0.0  ;;  %v2365_v56 = vsel %vm3680_vm10, %v2341_v31, 0.0 }
 0x8fe   :  { %v2494_v33 = vsel %vm5133_vm2, %v2470_v43, 0.0  ;;  %v2497_v42 = vsel %vm5139_vm6, %v2471_v18, 0.0  ;;  %vm5141_vm2 = vmmov %vm5119_vm0  ;;  %v2387_v30 = vsel %vm5145_vm3, %v2365_v56, 0.0  ;;  %v1887_v43 = vmul.f32 %v1886_v0, %v4461_v60 }
 0x8ff   :  { %2489 = vadd.xlane.f32.xlu1 %v2488_v52  ;;  %2574 = vadd.xlane.f32.xlu0 %v2573_v13  ;;  %v2384_v25 = vsel %vm5141_vm2, %v2364_v17, 0.0  ;;  %vm5147_vm6 = vmmov %vm5119_vm0  ;;  %v1878_v13 = vadd.f32 %v1877_v3, %v1873_v57  ;;  %v1897_v31 = vmul.f32 %v1896_v48, %v4465_v59 }
 0x900   :  { %v2259_v47 = vpop.permute.xlu0 %2258  ;;  %v2533_v32 = vpop.permute.xlu1 %2532  ;;  %vm5150_vm2 = vmmov %vm5119_vm0 }
 0x901   :  { %v2282_v21 = vsel %vm3725_vm13, %v2259_v47, 0.0  ;;  %v2283_v44 = vsel %vm3732_vm14, %v2259_v47, 0.0  ;;  %v2556_v38 = vsel %vm3675_vm9, %v2533_v32, 0.0  ;;  %vm5144_vm9 = vmmov %vm5119_vm0  ;;  %v2557_v27 = vsel %vm3680_vm10, %v2533_v32, 0.0 }
 0x902   :  { %v2314_v53 = vsel %vm5137_vm8, %v2282_v21, 0.0  ;;  %v2317_v35 = vsel %vm5142_vm7, %v2283_v44, 0.0  ;;  %vm5143_vm8 = vmmov %vm5119_vm0  ;;  %v1888_v63 = vadd.f32 %v1887_v43, %v1878_v13 }
 0x903   :  { %2303 = vadd.xlane.f32.xlu1 %v2302_v9  ;;  %2300 = vadd.xlane.f32.xlu0 %v2299_v12  ;;  %v2576_v39 = vsel %vm5143_vm8, %v2556_v38, 0.0  ;;  %vm5149_vm10 = vmmov %vm5119_vm0 }
 0x904   :  { %v2343_v15 = vpop.permute.xlu1 %2342  ;;  %v2347_v22 = vpop.permute.xlu0 %2346  ;;  %vm5151_vm7 = vmmov %vm5119_vm0  ;;  %v1898_v55 = vadd.f32 %v1897_v31, %v1888_v63 }
 0x905   :  { %v2366_v11 = vsel %vm3699_vm11, %v2343_v15, 0.0  ;;  %v2370_v40 = vsel %vm3725_vm13, %v2347_v22, 0.0  ;;  %v2367_v1 = vsel %vm3704_vm12, %v2343_v15, 0.0  ;;  %vm5153_vm8 = vmmov %vm5119_vm0  ;;  %v2371_v60 = vsel %vm3732_vm14, %v2347_v22, 0.0  ;;  %v5158_v15 = vld [vmem:[#allocation17_spill] sm:$0xff] }
 0x906   :  { %v2390_v20 = vsel %vm5144_vm9, %v2366_v11, 0.0  ;;  %v2402_v26 = vsel %vm5149_vm10, %v2370_v40, 0.0  ;;  %v2393_v9 = vsel %vm5150_vm2, %v2367_v1, 0.0  ;;  %vm5157_vm9 = vmmov %vm5119_vm0  ;;  %vm5159_vm3 = vnez %v5158_v15 }
 0x907   :  { %2495 = vadd.xlane.f32.xlu1 %v2494_v33  ;;  %2492 = vadd.xlane.f32.xlu0 %v2491_v14  ;;  %v1906_v14 = vrot.slane %v2987_v10, %v5107_v8  ;;  %vm5165_vm2 = vmmov %vm5119_vm0 }
 0x908   :  { %v2535_v58 = vpop.permute.xlu1 %2534 }
 0x909   :  { %v2558_v28 = vsel %vm3699_vm11, %v2535_v58, 0.0  ;;  %vm5148_vm11 = vmmov %vm5119_vm0  ;;  %v2559_v12 = vsel %vm3704_vm12, %v2535_v58, 0.0  ;;  %v1907_v4 = vmul.f32 %v1906_v14, %v4467_v49 }
 0x90a   :  { %v2582_v24 = vsel %vm5147_vm6, %v2558_v28, 0.0  ;;  %v2579_v52 = vsel %vm5148_vm11, %v2557_v27, 0.0  ;;  %v2585_v23 = vsel %vm5153_vm8, %v2559_v12, 0.0  ;;  %vm5154_vm12 = vmmov %vm5119_vm0 }
 0x90b   :  { %2315 = vadd.xlane.f32.xlu1 %v2314_v53  ;;  %2306 = vadd.xlane.f32.xlu0 %v2305_v46  ;;  %v2261_v46 = vpop.permute.xlu0 %2260  ;;  %v4582_v18 = vadd.f32 %v1907_v4, %v1898_v55  ;;  %vm5160_vm6 = vmmov %vm5119_vm0 }
 0x90c   :  { %v2539_v62 = vpop.permute.xlu1 %2538  ;;  %vm5162_vm11 = vmmov %vm5119_vm0 }
 0x90d   :  { %v2562_v34 = vsel %vm3725_vm13, %v2539_v62, 0.0  ;;  %vm5155_vm13 = vmmov %vm5119_vm0  ;;  %v2563_v8 = vsel %vm3732_vm14, %v2539_v62, 0.0  ;;  %v1910_v49 = vmin.f32 %v4582_v18, 20.0 }
 0x90e   :  { %v2594_v47 = vsel %vm5151_vm7, %v2562_v34, 0.0  ;;  %v2405_v53 = vsel %vm5155_vm13, %v2371_v60, 0.0  ;;  %v2597_v44 = vsel %vm5157_vm9, %v2563_v8, 0.0  ;;  %vm5161_vm14 = vmmov %vm5119_vm0 }
 0x90f   :  { %2507 = vadd.xlane.f32.xlu1 %v2506_v54  ;;  %2498 = vadd.xlane.f32.xlu0 %v2497_v42  ;;  %v2284_v42 = vsel %vm3808_vm4, %v2261_v46, 0.0  ;;  %v2263_v58 = vpop.permute.xlu0 %2262  ;;  %v1911_v10 = vmul.f32 1.442695, %v1910_v49  ;;  %vm5168_vm8 = vmmov %vm5119_vm0 }
 0x910   :  { %v2257_v16 = vpop.permute.xlu1 %2256  ;;  %v2320_v36 = vsel %vm5160_vm6, %v2284_v42, 0.0  ;;  %vm5170_vm13 = vmmov %vm5119_vm0 }
 0x911   :  { %v2280_v21 = vsel %vm3784_vm15, %v2257_v16, 0.0  ;;  %3324 = vpow2.f32 %v1911_v10  ;;  %vm5173_vm6 = vmmov %vm5119_vm0 }
 0x912   :  { %v2308_v32 = vsel %vm5154_vm12, %v2280_v21, 0.0  ;;  %vm5169_vm12 = vmmov %vm5119_vm0 }
 0x913   :  { %2385 = vadd.xlane.f32.xlu1 %v2384_v25  ;;  %2318 = vadd.xlane.f32.xlu0 %v2317_v35  ;;  %v2281_v25 = vsel %vm5159_vm3, %v2257_v16, 0.0  ;;  %v2345_v5 = vpop.permute.xlu0 %2344 }
 0x914   :  { %v2449_v61 = vpop.permute.xlu1 %2448  ;;  %v2311_v6 = vsel %vm5161_vm14, %v2281_v25, 0.0  ;;  %vm5174_vm14 = vmmov %vm5119_vm0 }
 0x915   :  { %v2472_v59 = vsel %vm3784_vm15, %v2449_v61, 0.0 }
 0x916   :  { %v2500_v54 = vsel %vm5119_vm0, %v2472_v59, 0.0 }
 0x917   :  { %2577 = vadd.xlane.f32.xlu1 %v2576_v39  ;;  %2510 = vadd.xlane.f32.xlu0 %v2509_v50  ;;  %v2473_v39 = vsel %vm5159_vm3, %v2449_v61, 0.0  ;;  %v5163_v50 = vld [vmem:[#allocation20_spill] sm:$0xff]  ;;  %v2349_v34 = vpop.permute.xlu0 %2348 }
 0x918   :  { %v2453_v38 = vpop.permute.xlu1 %2452  ;;  %vm5164_vm10 = vnez %v5163_v50  ;;  %v2503_v29 = vsel %vm5165_vm2, %v2473_v39, 0.0  ;;  %v2372_v63 = vsel %vm3808_vm4, %v2349_v34, 0.0  ;;  %vm5176_vm2 = vmmov %vm5119_vm0 }
 0x919   :  { %v2476_v35 = vsel %vm3808_vm4, %v2453_v38, 0.0  ;;  %v2286_v56 = vsel %vm5164_vm10, %v2263_v58, 0.0 }
 0x91a   :  { %v2512_v11 = vsel %vm5162_vm11, %v2476_v35, 0.0  ;;  %v2326_v27 = vsel %vm5168_vm8, %v2286_v56, 0.0  ;;  %vm5175_vm11 = vmmov %vm5119_vm0  ;;  %v5183_v35 = vld [vmem:[#allocation23_spill] sm:$0xff] }
 0x91b   :  { %2391 = vadd.xlane.f32.xlu1 %v2390_v20  ;;  %2388 = vadd.xlane.f32.xlu0 %v2387_v30  ;;  %v5166_v20 = vld [vmem:[#allocation19_spill] sm:$0xff]  ;;  %v2351_v21 = vpop.permute.xlu0 %2350  ;;  %vm5178_vm8 = vmmov %vm5119_vm0 }
 0x91c   :  { %vm5167_vm7 = vnez %v5166_v20  ;;  %v2455_v30 = vpop.permute.xlu1 %2454 }
 0x91d   :  { %v2285_v28 = vsel %vm5167_vm7, %v2261_v46, 0.0  ;;  %v2478_v22 = vsel %vm5164_vm10, %v2455_v30, 0.0  ;;  %v2477_v3 = vsel %vm5167_vm7, %v2453_v38, 0.0 }
 0x91e   :  { %v2323_v62 = vsel %vm5169_vm12, %v2285_v28, 0.0  ;;  %v2518_v57 = vsel %vm5170_vm13, %v2478_v22, 0.0  ;;  %v2515_v40 = vsel %vm5119_vm0, %v2477_v3, 0.0  ;;  %vm5179_vm12 = vmmov %vm5119_vm0  ;;  %v5190_v3 = vld [vmem:[#allocation24_spill] sm:$0xff] }
 0x91f   :  { %2583 = vadd.xlane.f32.xlu1 %v2582_v24  ;;  %2580 = vadd.xlane.f32.xlu0 %v2579_v52  ;;  %v2368_v24 = vsel %vm3784_vm15, %v2345_v5, 0.0  ;;  %v5171_v52 = vld [vmem:[#allocation21_spill] sm:$0xff]  ;;  %vm5180_vm13 = vmmov %vm5119_vm0  ;;  %v2265_v4 = vpop.permute.xlu0 %2264 }
 0x920   :  { %vm5172_vm9 = vnez %v5171_v52  ;;  %v2537_v1 = vpop.permute.xlu1 %2536  ;;  %v2396_v13 = vsel %vm5173_vm6, %v2368_v24, 0.0  ;;  %vm5184_vm6 = vnez %v5183_v35  ;;  %v3035_v35 = vld [vmem:[%s4953_s6 + $0x98] sm:$0xff] }
 0x921   :  { %v2287_v0 = vsel %vm5172_vm9, %v2263_v58, 0.0  ;;  %v2560_v48 = vsel %vm3784_vm15, %v2537_v1, 0.0  ;;  %vm5177_vm15 = vmmov %vm5119_vm0  ;;  %v2561_v61 = vsel %vm5159_vm3, %v2537_v1, 0.0  ;;  %v2375_v10 = vsel %vm5172_vm9, %v2351_v21, 0.0 }
 0x922   :  { %v2329_v16 = vsel %vm5174_vm14, %v2287_v0, 0.0  ;;  %v2588_v43 = vsel %vm5175_vm11, %v2560_v48, 0.0  ;;  %v2591_v59 = vsel %vm5180_vm13, %v2561_v61, 0.0  ;;  %vm5185_vm14 = vmmov %vm5119_vm0 }
 0x923   :  { %2403 = vadd.xlane.f32.xlu1 %v2402_v26  ;;  %2394 = vadd.xlane.f32.xlu0 %v2393_v9  ;;  %v3325_v26 = vpop.eup %3324  ;;  %v2479_v9 = vsel %vm5172_vm9, %v2455_v30, 0.0  ;;  %v2457_v38 = vpop.permute.xlu0 %2456  ;;  %vm5187_vm11 = vmmov %vm5119_vm0 }
 0x924   :  { %v1913_v12 = vadd.f32 1.0, %v3325_v26  ;;  %v2521_v31 = vsel %vm5176_vm2, %v2479_v9, 0.0  ;;  %v2541_v33 = vpop.permute.xlu1 %2540  ;;  %v1916_v8 = vmul.f32 -0.5, %v3325_v26  ;;  %v2480_v56 = vsel %vm5184_vm6, %v2457_v38, 0.0  ;;  %vm5193_vm13 = vmmov %vm5119_vm0 }
 0x925   :  { %v2564_v14 = vsel %vm3808_vm4, %v2541_v33, 0.0  ;;  %vm5181_vm4 = vmmov %vm5119_vm0  ;;  %vm1909_vm2 = vcmp.gt.f32.partialorder %v4582_v18, 20.0 }
 0x926   :  { %3326 = vlog2.f32 %v1913_v12  ;;  %v2600_v55 = vsel %vm5179_vm12, %v2564_v14, 0.0  ;;  %v1917_v25 = vadd.f32 1.0, %v1916_v8  ;;  %vm5191_vm12 = vnez %v5190_v3 }
 0x927   :  { %2595 = vadd.xlane.f32.xlu1 %v2594_v47  ;;  %2586 = vadd.xlane.f32.xlu0 %v2585_v23  ;;  %v2369_v47 = vsel %vm5159_vm3, %v2345_v5, 0.0  ;;  %v2408_v23 = vsel %vm5177_vm15, %v2372_v63, 0.0  ;;  %vm5182_vm3 = vmmov %vm5119_vm0  ;;  %v2353_v28 = vpop.permute.xlu0 %2352  ;;  %v2481_v1 = vsel %vm5191_vm12, %v2457_v38, 0.0  ;;  %v3036_v38 = vld [vmem:[%s4953_s6 + $0xa0] sm:$0xff] }
 0x928   :  { %v2399_v60 = vsel %vm5178_vm8, %v2369_v47, 0.0  ;;  %v2543_v46 = vpop.permute.xlu1 %2542  ;;  %vm5188_vm15 = vmmov %vm5119_vm0 }
 0x929   :  { %v2566_v17 = vsel %vm5164_vm10, %v2543_v46, 0.0  ;;  %v2567_v30 = vsel %vm5172_vm9, %v2543_v46, 0.0  ;;  %vm5189_vm8 = vmmov %vm5119_vm0 }
 0x92a   :  { %v2606_v49 = vsel %vm5119_vm0, %v2566_v17, 0.0  ;;  %v2609_v5 = vsel %vm5189_vm8, %v2567_v30, 0.0  ;;  %vm5192_vm9 = vmmov %vm5119_vm0  ;;  %v3260_v17 = vld [vmem:[%s4951_s4 + $0x40] sm:$0xff]  }
 0x92b   :  { %2309 = vadd.xlane.f32.xlu1 %v2308_v32  ;;  %2406 = vadd.xlane.f32.xlu0 %v2405_v53  ;;  %v2374_v32 = vsel %vm5164_vm10, %v2351_v21, 0.0  ;;  %v2373_v53 = vsel %vm5167_vm7, %v2349_v34, 0.0  ;;  %vm5186_vm10 = vmmov %vm5119_vm0 }
 0x92c   :  { %v2411_v42 = vsel %vm5182_vm3, %v2373_v53, 0.0  ;;  %v2545_v24 = vpop.permute.xlu1 %2544  ;;  %vm5195_vm3 = vmmov %vm5119_vm0  ;;  %3172 = vmatpush3.bf16.msra.mxu1 %v3260_v17 }
 0x92d   :  { %v2569_v12 = vsel %vm5191_vm12, %v2545_v24, 0.0  ;;  %3173 = vmatprep.subr.bf16.mxu1 %v5102_v37 }
 0x92f   :  { %2501 = vadd.xlane.f32.xlu1 %v2500_v54  ;;  %2598 = vadd.xlane.f32.xlu0 %v2597_v44  ;;  %v2414_v54 = vsel %vm5181_vm4, %v2374_v32, 0.0  ;;  %v2565_v44 = vsel %vm5167_vm7, %v2541_v33, 0.0  ;;  %vm5194_vm4 = vmmov %vm5119_vm0  ;;  %v3033_v33 = vld [vmem:[%s4953_s6 + $0x88] sm:$0xff]  ;;  %v3034_v32 = vld [vmem:[%s4953_s6 + $0x90] sm:$0xff] }
 0x930   :  { %v3327_v15 = vpop.eup %3326  ;;  %v2603_v58 = vsel %vm5185_vm14, %v2565_v44, 0.0  ;;  %vm5197_vm14 = vcmask 523264  }
 0x931   :  { %v1915_v39 = vmul.f32 0.6931472, %v3327_v15  ;;  %v3261_v15 = vld [vmem:[%s4951_s4 + $0x48] sm:$0xff]  }
 0x932   :  { %3174 = vmatpush3.bf16.msra.mxu1 %v3261_v15 }
 0x933   :  { %2321 = vadd.xlane.f32.xlu1 %v2320_v36  ;;  %2312 = vadd.xlane.f32.xlu0 %v2311_v6  ;;  %v1919_v36 = vand.u32 2147483647, %v3325_v26  ;;  %v2288_v6 = vsel %vm5184_vm6, %v2265_v4, 0.0 }
 0x934   :  { %v2332_v50 = vsel %vm5186_vm10, %v2288_v6, 0.0  ;;  %3175 = vmatprep.subr.bf16.mxu1 %v5102_v37  ;;  %vm5198_vm10 = vmmov %vm5197_vm14 }
 0x935   :  { %vm1920_vm7 = vcmp.lt.f32.partialorder %v1919_v36, 0.0004427343 }
 0x937   :  { %2513 = vadd.xlane.f32.xlu1 %v2512_v11  ;;  %2504 = vadd.xlane.f32.xlu0 %v2503_v29  ;;  %v1918_v11 = vmul.f32 %v3325_v26, %v1917_v25  ;;  %v2417_v29 = vsel %vm5187_vm11, %v2375_v10, 0.0  ;;  %v2377_v26 = vsel %vm5191_vm12, %v2353_v28, 0.0 }
 0x938   :  { %v2423_v9 = vsel %vm5119_vm0, %v2377_v26, 0.0 }
 0x939   :  { %v1921_v20 = vsel %vm1920_vm7, %v1918_v11, %v1915_v39  ;;  %vm5199_vm7 = vmmov %vm5198_vm10 }
 0x93a   :  { %v4660_v22 = vsel %vm1909_vm2, %v4582_v18, %v1921_v20  ;;  %v2568_v18 = vsel %vm5184_vm6, %v2545_v24, 0.0  ;;  %vm5200_vm11 = vmmov %vm5199_vm7 }
 0x93b   :  { %2327 = vadd.xlane.f32.xlu1 %v2326_v27  ;;  %2324 = vadd.xlane.f32.xlu0 %v2323_v62  ;;  %v2524_v27 = vsel %vm5188_vm15, %v2480_v56, 0.0  ;;  %v2376_v62 = vsel %vm5184_vm6, %v2353_v28, 0.0  ;;  %v2612_v48 = vsel %vm5194_vm4, %v2568_v18, 0.0  ;;  %vm5196_vm6 = vmmov %vm5119_vm0 }
 0x93c   :  { %v2420_v52 = vsel %vm5192_vm9, %v2376_v62, 0.0  ;;  %v2615_v47 = vsel %vm5196_vm6, %v2569_v12, 0.0  ;;  %vm5201_vm2 = vmmov %vm5199_vm7 }
 0x93d   :  { %vm5202_vm15 = vmmov %vm5201_vm2 }
 0x93e   :  { %vm5203_vm8 = vmmov %vm5201_vm2 }
 0x93f   :  { %2519 = vadd.xlane.f32.xlu1 %v2518_v57  ;;  %2516 = vadd.xlane.f32.xlu0 %v2515_v40  ;;  %v2289_v57 = vsel %vm5191_vm12, %v2265_v4, 0.0  ;;  %v1932_v40 = vrot.slane %v4660_v22, %v5115_v45  ;;  %vm5204_vm12 = vmmov %vm5201_vm2 }
 0x940   :  { %v2335_v0 = vsel %vm5193_vm13, %v2289_v57, 0.0  ;;  %vm5205_vm9 = vmmov %vm5201_vm2 }
 0x941   :  { %vm5206_vm13 = vmmov %vm5201_vm2 }
 0x942   :  { %vm5207_vm4 = vmmov %vm5201_vm2 }
 0x943   :  { %2397 = vadd.xlane.f32.xlu1 %v2396_v13  ;;  %2330 = vadd.xlane.f32.xlu0 %v2329_v16  ;;  %v1948_v13 = vrot.slane %v1932_v40, %v5115_v45  ;;  %v2527_v16 = vsel %vm5195_vm3, %v2481_v1, 0.0  ;;  %vm5208_vm3 = vmmov %vm5201_vm2 }
 0x944   :  { %vm5209_vm0 = vmmov %vm5201_vm2 }
 0x945   :  { %v1977_v34 = vrot.slane %v1948_v13, %v3535_v41  ;;  %v1970_v53 = vcombine.high %v1948_v13, %v1948_v13  ;;  %v3037_v13 = vld [vmem:[%s4953_s6 + $0xa8] sm:$0xff]  ;;  %vm5210_vm6 = vmmov %vm5209_vm0 }
 0x947   :  { %2589 = vadd.xlane.f32.xlu1 %v2588_v43  ;;  %2522 = vadd.xlane.f32.xlu0 %v2521_v31  ;;  %v3032_v43 = vld [vmem:[%s4953_s6 + $0x80] sm:$0xff]  ;;  %v1940_v31 = vcombine.high %v1932_v40, %v1932_v40 }
 0x948   :  { %v2121_v63 = vmul.f32 %v3032_v43, %v1977_v34 }
 0x949   :  { %v4692_v14 = vrot.slane %v1940_v31, %v5115_v45 }
 0x94a   :  { %v2137_v21 = vmul.f32 1.442695, %v2121_v63 }
 0x94b   :  { %2409 = vadd.xlane.f32.xlu1 %v2408_v23  ;;  %2400 = vadd.xlane.f32.xlu0 %v2399_v60  ;;  %v2122_v23 = vmul.f32 %v3033_v33, %v1977_v34  ;;  %v4696_v60 = vmul.f32 %v4660_v22, %v4409_v2 }
 0x94c   :  { %3328 = vpow2.f32 %v2137_v21  ;;  %v3262_v21 = vld [vmem:[%s4951_s4 + $0x50] sm:$0xff]  }
 0x94d   :  { %v2139_v61 = vmul.f32 1.442695, %v2122_v23  ;;  %3176 = vmatpush3.bf16.msra.mxu1 %v3262_v21 }
 0x94e   :  { %3177 = vmatprep.subr.bf16.mxu1 %v5102_v37 }
 0x94f   :  { %2601 = vadd.xlane.f32.xlu1 %v2600_v55  ;;  %2592 = vadd.xlane.f32.xlu0 %v2591_v59  ;;  %v1981_v55 = vrot.slane %v4692_v14, %v3535_v41  ;;  %v2022_v59 = vrot.slane %v4696_v60, %v5115_v45  ;;  %3330 = vpow2.f32 %v2139_v61 }
 0x951   :  { %v2123_v4 = vmul.f32 %v3034_v32, %v1981_v55  ;;  %v4706_v46 = vrot.slane %v2022_v59, %v5115_v45 }
 0x953   :  { %2415 = vadd.xlane.f32.xlu1 %v2414_v54  ;;  %2412 = vadd.xlane.f32.xlu0 %v2411_v42  ;;  %v1985_v42 = vrot.slane %v1970_v53, %v3535_v41  ;;  %v2141_v44 = vmul.f32 1.442695, %v2123_v4  ;;  %v3263_v53 = vld [vmem:[%s4951_s4 + $0x58] sm:$0xff]  }
 0x954   :  { %3178 = vmatpush3.bf16.msra.mxu1 %v3263_v53 }
 0x955   :  { %v2125_v11 = vmul.f32 %v3036_v38, %v1985_v42  ;;  %3332 = vpow2.f32 %v2141_v44  ;;  %v2126_v43 = vmul.f32 %v3037_v13, %v1985_v42  ;;  %3179 = vmatprep.subr.bf16.mxu1 %v5102_v37 }
 0x956   :  { %v3329_v25 = vpop.eup %3328 }
 0x957   :  { %2607 = vadd.xlane.f32.xlu1 %v2606_v49  ;;  %2604 = vadd.xlane.f32.xlu0 %v2603_v58  ;;  %v2067_v49 = vrot.slane %v4706_v46, %v3535_v41  ;;  %v2030_v58 = vcombine.high %v2022_v59, %v2022_v59  ;;  %v2060_v59 = vcombine.high %v4706_v46, %v4706_v46  ;;  %v2147_v17 = vmul.f32 1.442695, %v2126_v43  ;;  %v3264_v46 = vld [vmem:[%s4951_s4 + $0x60] sm:$0xff]  }
 0x958   :  { %3180 = vmatpush3.bf16.msra.mxu1 %v3264_v46 }
 0x959   :  { %v3331_v56 = vpop.eup %3330  ;;  %v4727_v62 = vrot.slane %v2030_v58, %v5115_v45  ;;  %v2075_v44 = vrot.slane %v2060_v59, %v3535_v41  ;;  %3181 = vmatprep.subr.bf16.mxu1 %v5102_v37 }
 0x95a   :  { %v2651_v40 = vmul.f32 0.0, %v3331_v56 }
 0x95b   :  { %2333 = vadd.xlane.f32.xlu1 %v2332_v50  ;;  %2418 = vadd.xlane.f32.xlu0 %v2417_v29  ;;  %v2650_v50 = vmul.f32 0.0, %v3329_v25  ;;  %v2124_v29 = vmul.f32 %v3035_v35, %v1981_v55  ;;  %v2071_v34 = vrot.slane %v4727_v62, %v3535_v41  ;;  %v2015_v55 = vcombine.high %v4696_v60, %v4696_v60 }
 0x95d   :  { %v2143_v1 = vmul.f32 1.442695, %v2124_v29  ;;  %v4753_v15 = vrot.slane %v2015_v55, %v5115_v45  ;;  %v3265_v29 = vld [vmem:[%s4951_s4 + $0x68] sm:$0xff]  }
 0x95e   :  { %3182 = vmatpush3.bf16.msra.mxu1 %v3265_v29 }
 0x95f   :  { %2525 = vadd.xlane.f32.xlu1 %v2524_v27  ;;  %2610 = vadd.xlane.f32.xlu0 %v2609_v5  ;;  %v3333_v63 = vpop.eup %3332 }
 0x960   :  { %3183 = vmatprep.subr.bf16.mxu1 %v5102_v37 }
 0x963   :  { %2421 = vadd.xlane.f32.xlu1 %v2420_v52  ;;  %2336 = vadd.xlane.f32.xlu0 %v2335_v0  ;;  %v2145_v52 = vmul.f32 1.442695, %v2125_v11 }
 0x965   :  { %3334 = vpow2.f32 %v2145_v52 }
 0x966   :  { %3336 = vpow2.f32 %v2143_v1 }
 0x967   :  { %2613 = vadd.xlane.f32.xlu1 %v2612_v48  ;;  %2528 = vadd.xlane.f32.xlu0 %v2527_v16  ;;  %3338 = vpow2.f32 %v2147_v17 }
 0x96b   :  { %2424 = vadd.xlane.f32.xlu0 %v2423_v9 }
 0x96f   :  { %2616 = vadd.xlane.f32.xlu0 %v2615_v47  ;;  %v3335_v38 = vpop.eup %3334 }
 0x97c   :  { %v2295_v8 = vpop.xlane.xlu1 %2294  ;;  %v2292_v54 = vpop.xlane.xlu0 %2291 }
 0x97d   :  { %v2426_v39 = vmul.f32 %v2292_v54, %v2067_v49  ;;  %v2427_v5 = vmul.f32 %v2295_v8, %v2067_v49 }
 0x980   :  { %v2380_v36 = vpop.xlane.xlu1 %2379  ;;  %v2484_v6 = vpop.xlane.xlu0 %2483 }
 0x981   :  { %v2618_v10 = vmul.f32 %v2484_v6, %v2067_v49  ;;  %v3337_v6 = vpop.eup %3336 }
 0x983   :  { %v2634_v20 = vsel %vm5197_vm14, %v2426_v39, %v2618_v10  ;;  %vm5211_vm14 = vcmask 1040384  }
 0x984   :  { %v2572_v28 = vpop.xlane.xlu1 %2571  ;;  %v2652_v30 = vadd.f32 %v2650_v50, %v2634_v20  ;;  %v2487_v27 = vpop.xlane.xlu0 %2486  ;;  %v4762_v50 = vrot.slane %v4753_v15, %v5115_v45 }
 0x985   :  { %v2619_v3 = vmul.f32 %v2487_v27, %v2067_v49 }
 0x986   :  { %v2682_v57 = vmul.f32 %v2652_v30, %v2380_v36  ;;  %v2698_v24 = vmul.f32 %v2652_v30, %v2572_v28  ;;  %v2654_v61 = vmul.f32 %v3333_v63, %v2652_v30 }
 0x987   :  { %v2635_v18 = vsel %vm5198_vm10, %v2427_v5, %v2619_v3  ;;  %v2083_v3 = vrot.slane %v4762_v50, %v3535_v41  ;;  %vm5212_vm10 = vmmov %vm5209_vm0 }
 0x988   :  { %v2298_v0 = vpop.xlane.xlu1 %2297  ;;  %v2714_v48 = vsel %vm5199_vm7, %v2682_v57, %v2698_v24  ;;  %v2653_v16 = vadd.f32 %v2651_v40, %v2635_v18  ;;  %v2383_v26 = vpop.xlane.xlu0 %2382  ;;  %v3266_v57 = vld [vmem:[%s4951_s4 + $0x70] sm:$0xff]   ;;  %vm5213_vm7 = vmmov %vm5209_vm0 }
 0x989   :  { %v2428_v31 = vmul.f32 %v2298_v0, %v2071_v34  ;;  %v3339_v0 = vpop.eup %3338  ;;  %3184 = vmatpush3.bf16.msra.mxu1 %v3266_v57 }
 0x98a   :  { %v2683_v9 = vmul.f32 %v2653_v16, %v2383_v26  ;;  %v2655_v56 = vmul.f32 %v3337_v6, %v2653_v16  ;;  %3185 = vmatprep.subr.bf16.mxu1 %v5102_v37 }
 0x98c   :  { %v2490_v12 = vpop.xlane.xlu1 %2489  ;;  %v2575_v33 = vpop.xlane.xlu0 %2574 }
 0x98d   :  { %v2620_v47 = vmul.f32 %v2490_v12, %v2071_v34  ;;  %v2699_v23 = vmul.f32 %v2653_v16, %v2575_v33 }
 0x98f   :  { %v2636_v32 = vsel %vm5200_vm11, %v2428_v31, %v2620_v47  ;;  %v2715_v4 = vsel %vm5201_vm2, %v2683_v9, %v2699_v23  ;;  %v1972_v47 = vcombine.high %v4692_v14, %v4692_v14  ;;  %vm5214_vm11 = vmmov %vm5209_vm0 }
 0x990   :  { %v2304_v8 = vpop.xlane.xlu1 %2303  ;;  %v2656_v54 = vadd.f32 %v2654_v61, %v2636_v32  ;;  %v4749_v42 = vadd.f32 %v2715_v4, %v2714_v48  ;;  %v2301_v60 = vpop.xlane.xlu0 %2300  ;;  %v1925_v48 = vcombine.high %v4660_v22, %v4660_v22  ;;  %vm5216_vm2 = vmmov %vm5209_vm0 }
 0x991   :  { %v2430_v49 = vmul.f32 %v2304_v8, %v2075_v44  ;;  %v2429_v58 = vmul.f32 %v2301_v60, %v2071_v34  ;;  %v1989_v37 = vrot.slane %v1972_v47, %v3535_v41  ;;  %v3038_v8 = vld [vmem:[%s4953_s6 + $0xb0] sm:$0xff] }
 0x992   :  { %v2658_v10 = vmul.f32 %v3335_v38, %v2656_v54  ;;  %v4790_v22 = vrot.slane %v1925_v48, %v5115_v45  ;;  %v2731_v53 = vrot.slane %v4749_v42, 4  ;;  %v2062_v48 = vcombine.high %v4727_v62, %v4727_v62 }
 0x993   :  { %v2127_v46 = vmul.f32 %v3038_v8, %v1989_v37 }
 0x994   :  { %v2496_v25 = vpop.xlane.xlu1 %2495  ;;  %v2493_v35 = vpop.xlane.xlu0 %2492  ;;  %v4796_v32 = vrot.slane %v4790_v22, %v5115_v45  ;;  %v2732_v38 = vadd.f32 %v2731_v53, %v4749_v42 }
 0x995   :  { %v2622_v36 = vmul.f32 %v2496_v25, %v2075_v44  ;;  %v2621_v39 = vmul.f32 %v2493_v35, %v2071_v34  ;;  %v3267_v34 = vld [vmem:[%s4951_s4 + $0x78] sm:$0xff]   ;;  %v3040_v25 = vld [vmem:[%s4953_s6 + $0xc0] sm:$0xff] }
 0x996   :  { %3186 = vmatpush3.bf16.msra.mxu1 %v3267_v34 }
 0x997   :  { %v2638_v11 = vsel %vm5202_vm15, %v2430_v49, %v2622_v36  ;;  %v2637_v20 = vsel %vm5203_vm8, %v2429_v58, %v2621_v39  ;;  %vm5217_vm15 = vmmov %vm5209_vm0 }
 0x998   :  { %v2316_v28 = vpop.xlane.xlu1 %2315  ;;  %v4768_v30 = vadd.f32 %v2658_v10, %v2638_v11  ;;  %v2307_v27 = vpop.xlane.xlu0 %2306  ;;  %v2657_v5 = vadd.f32 %v2655_v56, %v2637_v20  ;;  %v2149_v10 = vmul.f32 1.442695, %v2127_v46  ;;  %v2733_v11 = vrot.slane %v2732_v38, 2  ;;  %vm5218_vm8 = vmmov %vm5209_vm0 }
 0x999   :  { %v2434_v40 = vmul.f32 %v2316_v28, %v2083_v3  ;;  %v2431_v1 = vmul.f32 %v2307_v27, %v2075_v44  ;;  %v3039_v27 = vld [vmem:[%s4953_s6 + $0xb8] sm:$0xff] }
 0x99a   :  { %v2659_v26 = vmul.f32 %v3339_v0, %v2657_v5  ;;  %3340 = vpow2.f32 %v2149_v10 }
 0x99c   :  { %v2508_v24 = vpop.xlane.xlu1 %2507  ;;  %v2499_v18 = vpop.xlane.xlu0 %2498 }
 0x99d   :  { %v2626_v52 = vmul.f32 %v2508_v24, %v2083_v3  ;;  %v2623_v13 = vmul.f32 %v2499_v18, %v2075_v44  ;;  %v1993_v44 = vrot.slane %v4796_v32, %v3535_v41 }
 0x99f   :  { %v4780_v16 = vsel %vm5204_vm12, %v2434_v40, %v2626_v52  ;;  %v2639_v9 = vsel %vm5205_vm9, %v2431_v1, %v2623_v13  ;;  %v2129_v58 = vmul.f32 %v3040_v25, %v1993_v44  ;;  %v2128_v40 = vmul.f32 %v3039_v27, %v1989_v37  ;;  %v3041_v52 = vld [vmem:[%s4953_s6 + $0xc8] sm:$0xff]  ;;  %vm5219_vm12 = vmmov %vm5209_vm0 }
 0x9a0   :  { %v2386_v43 = vpop.xlane.xlu1 %2385  ;;  %v2319_v63 = vpop.xlane.xlu0 %2318  ;;  %v4787_v31 = vadd.f32 %v2659_v26, %v2639_v9  ;;  %v2130_v26 = vmul.f32 %v3041_v52, %v1993_v44  ;;  %v3042_v52 = vld [vmem:[%s4953_s6 + $0xd0] sm:$0xff]  ;;  %vm5220_vm9 = vmmov %vm5209_vm0 }
 0x9a1   :  { %v2684_v12 = vmul.f32 %v2656_v54, %v2386_v43  ;;  %v2435_v61 = vmul.f32 %v2319_v63, %v2083_v3 }
 0x9a2   :  { %v2155_v37 = vmul.f32 1.442695, %v2130_v26 }
 0x9a4   :  { %v2578_v33 = vpop.xlane.xlu1 %2577  ;;  %v2511_v23 = vpop.xlane.xlu0 %2510 }
 0x9a5   :  { %v2700_v21 = vmul.f32 %v2656_v54, %v2578_v33  ;;  %v2627_v55 = vmul.f32 %v2511_v23, %v2083_v3  ;;  %v2153_v3 = vmul.f32 1.442695, %v2129_v58  ;;  %v3341_v62 = vpop.eup %3340 }
 0x9a6   :  { %v2662_v44 = vmul.f32 %v3341_v62, %v4768_v30 }
 0x9a7   :  { %v2716_v59 = vsel %vm5206_vm13, %v2684_v12, %v2700_v21  ;;  %v4802_v4 = vsel %vm5207_vm4, %v2435_v61, %v2627_v55  ;;  %3342 = vpow2.f32 %v2153_v3  ;;  %v2151_v12 = vmul.f32 1.442695, %v2128_v40  ;;  %vm5221_vm13 = vmmov %vm5209_vm0 }
 0x9a8   :  { %v2392_v14 = vpop.xlane.xlu1 %2391  ;;  %v2389_v17 = vpop.xlane.xlu0 %2388  ;;  %v2079_v61 = vrot.slane %v2062_v48, %v3535_v41  ;;  %v1941_v55 = vcombine.high %v4790_v22, %v4790_v22  ;;  %vm5222_vm4 = vmmov %vm5209_vm0 }
 0x9a9   :  { %v2686_v54 = vmul.f32 %v4768_v30, %v2392_v14  ;;  %v2685_v60 = vmul.f32 %v2657_v5, %v2389_v17  ;;  %3344 = vpow2.f32 %v2151_v12 }
 0x9aa   :  { %3346 = vpow2.f32 %v2155_v37  ;;  %v2031_v37 = vcombine.high %v4753_v15, %v4753_v15 }
 0x9ac   :  { %v2584_v49 = vpop.xlane.xlu1 %2583  ;;  %v2581_v35 = vpop.xlane.xlu0 %2580 }
 0x9ad   :  { %v2702_v36 = vmul.f32 %v4768_v30, %v2584_v49  ;;  %v2701_v6 = vmul.f32 %v2657_v5, %v2581_v35  ;;  %v2734_v5 = vadd.f32 %v2733_v11, %v2732_v38  ;;  %v4839_v35 = vrot.slane %v1941_v55, %v5115_v45 }
 0x9af   :  { %v2718_v39 = vsel %vm5208_vm3, %v2686_v54, %v2702_v36  ;;  %v2717_v56 = vsel %vm5209_vm0, %v2685_v60, %v2701_v6  ;;  %v2735_v34 = vrot.slane %v2734_v5, 1  ;;  %vm5223_vm3 = vmmov %vm5209_vm0 }
 0x9b0   :  { %v2404_v29 = vpop.xlane.xlu1 %2403  ;;  %v2737_v20 = vadd.f32 %v2717_v56, %v2716_v59  ;;  %v2395_v28 = vpop.xlane.xlu0 %2394  ;;  %v1997_v56 = vrot.slane %v4839_v35, %v3535_v41 }
 0x9b1   :  { %v2687_v42 = vmul.f32 %v4787_v31, %v2395_v28  ;;  %v2736_v59 = vadd.f32 %v2735_v34, %v2734_v5  ;;  %v3343_v36 = vpop.eup %3342 }
 0x9b2   :  { %v2738_v57 = vrot.slane %v2737_v20, 4 }
 0x9b3   :  { %v3345_v27 = vpop.eup %3344 }
 0x9b4   :  { %v2596_v24 = vpop.xlane.xlu1 %2595  ;;  %v2739_v18 = vadd.f32 %v2738_v57, %v2737_v20  ;;  %v2587_v0 = vpop.xlane.xlu0 %2586 }
 0x9b5   :  { %v2703_v1 = vmul.f32 %v4787_v31, %v2587_v0  ;;  %v3347_v26 = vpop.eup %3346 }
 0x9b6   :  { %v2740_v13 = vrot.slane %v2739_v18, 2 }
 0x9b7   :  { %v2719_v9 = vsel %vm5210_vm6, %v2687_v42, %v2703_v1 }
 0x9b8   :  { %v2310_v43 = vpop.xlane.xlu1 %2309  ;;  %v2741_v63 = vadd.f32 %v2740_v13, %v2739_v18  ;;  %v2744_v47 = vadd.f32 %v2719_v9, %v2718_v39  ;;  %v2407_v33 = vpop.xlane.xlu0 %2406  ;;  %v2663_v18 = vmul.f32 %v3345_v27, %v4787_v31 }
 0x9b9   :  { %v2432_v54 = vmul.f32 %v2310_v43, %v2079_v61  ;;  %v1971_v43 = vcombine.high %v4796_v32, %v4796_v32  ;;  %v3044_v32 = vld [vmem:[%s4953_s6 + $0xe0] sm:$0xff] }
 0x9ba   :  { %v2742_v21 = vrot.slane %v2741_v63, 1  ;;  %v2745_v23 = vrot.slane %v2744_v47, 4 }
 0x9bb   :  { %v2001_v55 = vrot.slane %v1971_v43, %v3535_v41  ;;  %v3047_v43 = vld [vmem:[%s4953_s6 + $0xf8] sm:$0xff] }
 0x9bc   :  { %v2502_v53 = vpop.xlane.xlu1 %2501  ;;  %v2743_v14 = vadd.f32 %v2742_v21, %v2741_v63  ;;  %v2746_v8 = vadd.f32 %v2745_v23, %v2744_v47  ;;  %v2599_v60 = vpop.xlane.xlu0 %2598 }
 0x9bd   :  { %v2624_v17 = vmul.f32 %v2502_v53, %v2079_v61 }
 0x9be   :  { %v2786_v46 = vsel %vm5211_vm14, %v2736_v59, %v2743_v14  ;;  %v2747_v25 = vrot.slane %v2746_v8, 2 }
 0x9bf   :  { %v2640_v38 = vsel %vm5212_vm10, %v2432_v54, %v2624_v17  ;;  %v2133_v54 = vmul.f32 %v3044_v32, %v2001_v55  ;;  %vm5228_vm10 = vcmask 1044480  }
 0x9c0   :  { %v4834_v49 = vpop.xlane.xlu1 %2321  ;;  %v4836_v22 = vadd.f32 %v2662_v44, %v2640_v38  ;;  %v2748_v6 = vadd.f32 %v2747_v25, %v2746_v8  ;;  %v2313_v58 = vpop.xlane.xlu0 %2312  ;;  %v4875_v8 = vrot.slane %v2031_v37, %v5115_v45  ;;  %v2061_v45 = vcombine.high %v4762_v50, %v4762_v50 }
 0x9c1   :  { %v2433_v42 = vmul.f32 %v2313_v58, %v2079_v61  ;;  %v2161_v25 = vmul.f32 1.442695, %v2133_v54 }
 0x9c2   :  { %v2666_v39 = vmul.f32 %v3343_v36, %v4836_v22  ;;  %v2749_v10 = vrot.slane %v2748_v6, 1  ;;  %v2087_v44 = vrot.slane %v4875_v8, %v3535_v41 }
 0x9c4   :  { %v2514_v30 = vpop.xlane.xlu1 %2513  ;;  %v2668_v11 = vadd.f32 %v2666_v39, %v4780_v16  ;;  %v2750_v20 = vadd.f32 %v2749_v10, %v2748_v6  ;;  %v2505_v28 = vpop.xlane.xlu0 %2504  ;;  %v1973_v39 = vcombine.high %v4839_v35, %v4839_v35 }
 0x9c5   :  { %v2625_v3 = vmul.f32 %v2505_v28, %v2079_v61  ;;  %v2628_v36 = vmul.f32 %v2514_v30, %v2087_v44 }
 0x9c6   :  { %v2690_v57 = vmul.f32 %v2668_v11, %v2404_v29  ;;  %v2706_v5 = vmul.f32 %v2668_v11, %v2596_v24  ;;  %v4846_v40 = vsel %vm1458_vm1, %v2786_v46, %v2750_v20  ;;  %v2131_v29 = vmul.f32 %v3042_v52, %v1997_v56  ;;  %v3043_v24 = vld [vmem:[%s4953_s6 + $0xd8] sm:$0xff]  ;;  %vm5215_vm1 = vmmov %vm5209_vm0 }
 0x9c7   :  { %v2641_v16 = vsel %vm5213_vm7, %v2433_v42, %v2625_v3  ;;  %v2132_v12 = vmul.f32 %v3043_v24, %v1997_v56  ;;  %v2436_v20 = vmul.f32 %v4834_v49, %v2087_v44  ;;  %v3046_v24 = vld [vmem:[%s4953_s6 + $0xf0] sm:$0xff]  ;;  %vm5224_vm0 = vcmask 1042432   ;;  %vm5225_vm6 = vmmov %vm5215_vm1 }
 0x9c8   :  { %v4853_v0 = vpop.xlane.xlu1 %2327  ;;  %v2722_v1 = vsel %vm5214_vm11, %v2690_v57, %v2706_v5  ;;  %v2325_v13 = vpop.xlane.xlu0 %2324  ;;  %v2665_v48 = vadd.f32 %v2663_v18, %v2641_v16  ;;  %v2157_v47 = vmul.f32 1.442695, %v2131_v29  ;;  %vm5226_vm14 = vmmov %vm5215_vm1  ;;  %vm5230_vm11 = vcmask 1045504  }
 0x9c9   :  { %v2159_v53 = vmul.f32 1.442695, %v2132_v12  ;;  %v2644_v35 = vsel %vm5216_vm2, %v2436_v20, %v2628_v36  ;;  %v2437_v18 = vmul.f32 %v2325_v13, %v2087_v44  ;;  %vm5229_vm7 = vmmov %vm5215_vm1 }
 0x9ca   :  { %v2667_v34 = vmul.f32 %v3347_v26, %v2665_v48  ;;  %3348 = vpow2.f32 %v2157_v47  ;;  %v2091_v26 = vrot.slane %v2061_v45, %v3535_v41  ;;  %vm5231_vm2 = vmmov %vm5215_vm1 }
 0x9cb   :  { %3350 = vpow2.f32 %v2159_v53 }
 0x9cc   :  { %v2520_v9 = vpop.xlane.xlu1 %2519  ;;  %v2517_v31 = vpop.xlane.xlu0 %2516  ;;  %v2669_v63 = vadd.f32 %v2667_v34, %v4802_v4  ;;  %3352 = vpow2.f32 %v2161_v25 }
 0x9cd   :  { %v2629_v28 = vmul.f32 %v2517_v31, %v2087_v44  ;;  %v2630_v31 = vmul.f32 %v2520_v9, %v2091_v26 }
 0x9ce   :  { %v2691_v21 = vmul.f32 %v2669_v63, %v2407_v33  ;;  %v2707_v23 = vmul.f32 %v2669_v63, %v2599_v60  ;;  %v3045_v33 = vld [vmem:[%s4953_s6 + $0xe8] sm:$0xff] }
 0x9cf   :  { %v2134_v17 = vmul.f32 %v3045_v33, %v2001_v55 }
 0x9d0   :  { %v2398_v61 = vpop.xlane.xlu1 %2397  ;;  %v4865_v59 = vpop.xlane.xlu0 %2330  ;;  %v2723_v62 = vsel %vm5215_vm1, %v2691_v21, %v2707_v23 }
 0x9d1   :  { %v2758_v4 = vadd.f32 %v2723_v62, %v2722_v1  ;;  %v2163_v6 = vmul.f32 1.442695, %v2134_v17  ;;  %v2688_v3 = vmul.f32 %v4836_v22, %v2398_v61  ;;  %v2438_v61 = vmul.f32 %v4853_v0, %v2091_v26 }
 0x9d2   :  { %v2439_v9 = vmul.f32 %v4865_v59, %v2091_v26 }
 0x9d3   :  { %v2759_v38 = vrot.slane %v2758_v4, 4  ;;  %3354 = vpow2.f32 %v2163_v6  ;;  %v2646_v17 = vsel %vm5220_vm9, %v2438_v61, %v2630_v31 }
 0x9d4   :  { %v2590_v14 = vpop.xlane.xlu1 %2589  ;;  %v2523_v15 = vpop.xlane.xlu0 %2522 }
 0x9d5   :  { %v3349_v58 = vpop.eup %3348  ;;  %v2704_v10 = vmul.f32 %v4836_v22, %v2590_v14  ;;  %v2760_v5 = vadd.f32 %v2759_v38, %v2758_v4  ;;  %v2645_v22 = vsel %vm5219_vm12, %v2437_v18, %v2629_v28  ;;  %v2631_v55 = vmul.f32 %v2523_v15, %v2091_v26 }
 0x9d6   :  { %v2670_v27 = vmul.f32 %v3349_v58, %v2668_v11  ;;  %v3351_v52 = vpop.eup %3350  ;;  %v2005_v11 = vrot.slane %v1973_v39, %v3535_v41 }
 0x9d7   :  { %v2720_v50 = vsel %vm5217_vm15, %v2688_v3, %v2704_v10  ;;  %v2671_v49 = vmul.f32 %v3351_v52, %v2669_v63  ;;  %v2761_v34 = vrot.slane %v2760_v5, 2  ;;  %v3353_v54 = vpop.eup %3352  ;;  %v2647_v6 = vsel %vm5223_vm3, %v2439_v9, %v2631_v55 }
 0x9d8   :  { %v2410_v60 = vpop.xlane.xlu1 %2409  ;;  %v2401_v46 = vpop.xlane.xlu0 %2400  ;;  %v2672_v13 = vadd.f32 %v2670_v27, %v2644_v35  ;;  %v2135_v23 = vmul.f32 %v3046_v24, %v2005_v11  ;;  %v2136_v62 = vmul.f32 %v3047_v43, %v2005_v11  ;;  %v3048_v27 = vmul.f32 -1.442695, %v4390_v7 }
 0x9d9   :  { %v2689_v30 = vmul.f32 %v2665_v48, %v2401_v46  ;;  %v2673_v47 = vadd.f32 %v2671_v49, %v2645_v22  ;;  %v2762_v33 = vadd.f32 %v2761_v34, %v2760_v5  ;;  %v2063_v5 = vcombine.high %v4875_v8, %v4875_v8 }
 0x9da   :  { %v2692_v32 = vmul.f32 %v2672_v13, %v2410_v60  ;;  %v2674_v25 = vmul.f32 %v3353_v54, %v2672_v13  ;;  %v2165_v15 = vmul.f32 1.442695, %v2135_v23  ;;  %v2167_v45 = vmul.f32 1.442695, %v2136_v62 }
 0x9db   :  { %v2763_v20 = vrot.slane %v2762_v33, 1  ;;  %v2095_v8 = vrot.slane %v2063_v5, %v3535_v41  ;;  %vm5232_vm15 = vcmask 1046528  }
 0x9dc   :  { %v2602_v56 = vpop.xlane.xlu1 %2601  ;;  %v2593_v42 = vpop.xlane.xlu0 %2592  ;;  %v2676_v10 = vadd.f32 %v2674_v25, %v2646_v17  ;;  %3356 = vpow2.f32 %v2165_v15 }
 0x9dd   :  { %v2705_v57 = vmul.f32 %v2665_v48, %v2593_v42  ;;  %v2708_v63 = vmul.f32 %v2672_v13, %v2602_v56  ;;  %v3355_v36 = vpop.eup %3354  ;;  %3358 = vpow2.f32 %v2167_v45  ;;  %v2764_v49 = vadd.f32 %v2763_v20, %v2762_v33 }
 0x9de   :  { %v2675_v56 = vmul.f32 %v3355_v36, %v2673_v47  ;;  %3360 = vpow2.f32 %v3048_v27 }
 0x9df   :  { %v2721_v16 = vsel %vm5218_vm8, %v2689_v30, %v2705_v57  ;;  %v2724_v46 = vsel %vm5221_vm13, %v2692_v32, %v2708_v63  ;;  %vm5233_vm8 = vcmask 261120   ;;  %vm5236_vm13 = vmmov %vm5215_vm1 }
 0x9e0   :  { %v2416_v1 = vpop.xlane.xlu1 %2415  ;;  %v2751_v29 = vadd.f32 %v2721_v16, %v2720_v50  ;;  %v2413_v48 = vpop.xlane.xlu0 %2412  ;;  %v2677_v3 = vadd.f32 %v2675_v56, %v2647_v6  ;;  %vm5234_vm12 = vmmov %vm5233_vm8 }
 0x9e1   :  { %v2693_v4 = vmul.f32 %v2673_v47, %v2413_v48  ;;  %v2694_v18 = vmul.f32 %v2676_v10, %v2416_v1  ;;  %vm5235_vm9 = vmmov %vm5233_vm8 }
 0x9e2   :  { %v2752_v12 = vrot.slane %v2751_v29, 4 }
 0x9e4   :  { %v2608_v21 = vpop.xlane.xlu1 %2607  ;;  %v2753_v37 = vadd.f32 %v2752_v12, %v2751_v29  ;;  %v2605_v53 = vpop.xlane.xlu0 %2604 }
 0x9e5   :  { %v2709_v14 = vmul.f32 %v2673_v47, %v2605_v53  ;;  %v2710_v42 = vmul.f32 %v2676_v10, %v2608_v21 }
 0x9e6   :  { %v2754_v44 = vrot.slane %v2753_v37, 2  ;;  %v3357_v23 = vpop.eup %3356 }
 0x9e7   :  { %v2725_v38 = vsel %vm5222_vm4, %v2693_v4, %v2709_v14  ;;  %v2726_v22 = vsel %vm5225_vm6, %v2694_v18, %v2710_v42  ;;  %v2678_v32 = vmul.f32 %v3357_v23, %v2676_v10  ;;  %v3370_v42 = vld [vmem:[%s4954_s7 + $0x8] sm:$0x7f] }
 0x9e8   :  { %v2334_v0 = vpop.xlane.xlu1 %2333  ;;  %v2755_v60 = vadd.f32 %v2754_v44, %v2753_v37  ;;  %v2765_v58 = vadd.f32 %v2725_v38, %v2724_v46  ;;  %v2419_v39 = vpop.xlane.xlu0 %2418 }
 0x9e9   :  { %v2695_v50 = vmul.f32 %v2677_v3, %v2419_v39  ;;  %v2440_v47 = vmul.f32 %v2334_v0, %v2095_v8  ;;  %v3359_v37 = vpop.eup %3358 }
 0x9ea   :  { %v2756_v28 = vrot.slane %v2755_v60, 1  ;;  %v2766_v59 = vrot.slane %v2765_v58, 4  ;;  %v2679_v14 = vmul.f32 %v3359_v37, %v2677_v3  ;;  %v3361_v25 = vpop.eup %3360 }
 0x9ec   :  { %v2757_v30 = vadd.f32 %v2756_v28, %v2755_v60  ;;  %v2767_v57 = vadd.f32 %v2766_v59, %v2765_v58  ;;  %v2526_v52 = vpop.xlane.xlu1 %2525  ;;  %v2611_v35 = vpop.xlane.xlu0 %2610  ;;  %v2802_v58 = vadd.f32 1.0, %v3361_v25 }
 0x9ed   :  { %v2711_v16 = vmul.f32 %v2677_v3, %v2611_v35  ;;  %v2632_v43 = vmul.f32 %v2526_v52, %v2095_v8  ;;  %v2796_v3 = vrot.slane %v3370_v42, %v3910_v51 }
 0x9ee   :  { %v2788_v11 = vsel %vm5224_vm0, %v4846_v40, %v2757_v30  ;;  %v2768_v26 = vrot.slane %v2767_v57, 2  ;;  %3362 = vrcp.f32 %v2802_v58 }
 0x9ef   :  { %v2727_v29 = vsel %vm5226_vm14, %v2695_v50, %v2711_v16  ;;  %v2789_v48 = vsel %vm1462_vm5, %v2788_v11, %v2764_v49  ;;  %vm5227_vm5 = vmmov %vm5215_vm1  ;;  %v2797_v52 = vmul.f32 %v2796_v3, %v4409_v2 }
 0x9f0   :  { %v2769_v24 = vadd.f32 %v2768_v26, %v2767_v57  ;;  %v2772_v13 = vadd.f32 %v2727_v29, %v2726_v22  ;;  %v2337_v34 = vpop.xlane.xlu0 %2336  ;;  %v2422_v12 = vpop.xlane.xlu1 %2421  ;;  %v2648_v62 = vsel %vm5227_vm5, %v2440_v47, %v2632_v43 }
 0x9f1   :  { %v2441_v61 = vmul.f32 %v2337_v34, %v2095_v8  ;;  %v2680_v9 = vadd.f32 %v2678_v32, %v2648_v62 }
 0x9f2   :  { %v2770_v1 = vrot.slane %v2769_v24, 1  ;;  %v2773_v31 = vrot.slane %v2772_v13, 4 }
 0x9f3   :  { %v2696_v36 = vmul.f32 %v2680_v9, %v2422_v12 }
 0x9f4   :  { %v2771_v63 = vadd.f32 %v2770_v1, %v2769_v24  ;;  %v2774_v40 = vadd.f32 %v2773_v31, %v2772_v13  ;;  %v2529_v21 = vpop.xlane.xlu0 %2528  ;;  %v2614_v54 = vpop.xlane.xlu1 %2613 }
 0x9f5   :  { %v2633_v55 = vmul.f32 %v2529_v21, %v2095_v8  ;;  %v2712_v38 = vmul.f32 %v2680_v9, %v2614_v54 }
 0x9f6   :  { %v2775_v53 = vrot.slane %v2774_v40, 2  ;;  %v2790_v41 = vsel %vm5228_vm10, %v2789_v48, %v2771_v63  ;;  %v3074_v63 = vld [vmem:[%s4948_s1 + $0x2] ss:$0 sm:$0xff] }
 0x9f7   :  { %v2649_v4 = vsel %vm5229_vm7, %v2441_v61, %v2633_v55  ;;  %v2728_v45 = vsel %vm5215_vm1, %v2696_v36, %v2712_v38 }
 0x9f8   :  { %v2776_v33 = vadd.f32 %v2775_v53, %v2774_v40  ;;  %v2425_v17 = vpop.xlane.xlu0 %2424  ;;  %v2681_v44 = vadd.f32 %v2679_v14, %v2649_v4  ;;  %v3363_v57 = vpop.eup %3362 }
 0x9f9   :  { %v2805_v18 = vmul.f32 %v3363_v57, %v4390_v7 }
 0x9fa   :  { %v2777_v46 = vrot.slane %v2776_v33, 1  ;;  %v2697_v6 = vmul.f32 %v2681_v44, %v2425_v17 }
 0x9fc   :  { %v2778_v0 = vadd.f32 %v2777_v46, %v2776_v33  ;;  %v2617_v15 = vpop.xlane.xlu0 %2616 }
 0x9fd   :  { %v2713_v60 = vmul.f32 %v2681_v44, %v2617_v15 }
 0x9fe   :  { %v2791_v39 = vsel %vm5230_vm11, %v2790_v41, %v2778_v0 }
 0x9ff   :  { %v2729_v10 = vsel %vm5231_vm2, %v2697_v6, %v2713_v60 }
 0xa00   :  { %v2779_v56 = vadd.f32 %v2729_v10, %v2728_v45 }
 0xa02   :  { %v2780_v20 = vrot.slane %v2779_v56, 4 }
 0xa04   :  { %v2781_v28 = vadd.f32 %v2780_v20, %v2779_v56 }
 0xa06   :  { %v2782_v59 = vrot.slane %v2781_v28, 2 }
 0xa08   :  { %v2783_v27 = vadd.f32 %v2782_v59, %v2781_v28 }
 0xa0a   :  { %v2784_v30 = vrot.slane %v2783_v27, 1 }
 0xa0c   :  { %v2785_v5 = vadd.f32 %v2784_v30, %v2783_v27 }
 0xa0e   :  { %v2792_v35 = vsel %vm5232_vm15, %v2791_v39, %v2785_v5 }
 0xa0f   :  { %v2798_v50 = vadd.f32 %v2797_v52, %v2792_v35 }
 0xa11   :  { %v2806_v16 = vmul.f32 %v2805_v18, %v2798_v50 }
 0xa13   :  { %v2807_v49 = vpack.c.bf16 %v2806_v16, %v2806_v16 }
 0xa15   :  { %3188 = vmatmul.mubr.bf16.vlgmr.msra.gmra.mrb[8].mxu1 %v2807_v49 }
 0xae8   :  { %v2907_v11 = vpop.f32.mrb[8].mxu1 }
 0xae9   :  { %v2913_v26 = vadd.f32 %v2907_v11, %v4311_v19  ;;  %v3189_v22 = vpop.f32.mrb[9].mxu1 }
 0xaea   :  { %v2910_v29 = vpop.f32.mrb[10].mxu1 }
 0xaeb   :  { %v2916_v48 = vmul.f32 %v2913_v26, %v2913_v26  ;;  %v3190_v51 = vpop.f32.mrb[11].mxu1 }
 0xaed   :  { %2925 = vrot.lane.b32.xlu0 %v2916_v48, %s3395_s29  ;;  %v2917_v24 = vsel %vm5233_vm8, %v2916_v48, 0.0  ;;  %s3407_s29 = smov [#allocation2]  }
 0xaee   :  { %2918 = vadd.xlane.f32.xlu1 %v2917_v24  ;;  %s2950_s23 = sshll.u32 %s3407_s29, 4  ;;  %s2951_s23 = int_to_ptr.vmem [resolvable:$true] %s2950_s23 }
 0xaef   :  { %s3371_s5 = scalar_lea.vmem %s2951_s23, 128  ;;  %p3376_p1 = scmp.lt.s32.totalorder %s2951_s23, %s2951_s23 }
 0xaf0   :  { %p3372_p0 = scmp.ne.s32.totalorder %s2951_s23, %s3371_s5  ;;  %p3377_p2 = scmp.lt.s32.totalorder %s3371_s5, %s3371_s5 }
 0xaf2   :  { %p3378_p3 = por %p3377_p2, %p3376_p1 }
 0xaf4   :  { %p3379_p4 = pnand %p3378_p3, %p3372_p0 }
 0xb5f   :  { %v2926_v2 = vpop.permute.xlu0 %2925 }
 0xb60   :  { %v2928_v8 = vsel %vm5234_vm12, %v2926_v2, 0.0 }
 0xb61   :  { %2929 = vadd.xlane.f32.xlu1 %v2928_v8 }
 0xb7b   :  { %v2919_v7 = vpop.xlane.xlu1 %2918 }
 0xb7c   :  { %v2920_v13 = vmul.f32 0.03125, %v2919_v7 }
 0xb7e   :  { %v2921_v34 = vadd.f32 1e-05, %v2920_v13 }
 0xb80   :  { %3364 = vrsqrt.f32 %v2921_v34 }
 0xb8a   :  { %v3365_v31 = vpop.eup %3364 }
 0xb8b   :  { %v2923_v47 = vmul.f32 %v3365_v31, %v2913_v26 }
 0xbee   :  { %v2930_v1 = vpop.xlane.xlu1 %2929 }
 0xbef   :  { %v2931_v43 = vmul.f32 0.03125, %v2930_v1 }
 0xbf1   :  { %v2932_v19 = vadd.f32 1e-05, %v2931_v43 }
 0xbf3   :  { %3366 = vrsqrt.f32 %v2932_v19 }
 0xbfd   :  { %v3367_v12 = vpop.eup %3366 }
 0xbfe   :  { %v2934_v40 = vmul.f32 %v3367_v12, %v2913_v26 }
 0xc00   :  { %v2935_v21 = vsel %vm5235_vm9, %v2923_v47, %v2934_v40 }
 0xc01   :  { %v2942_v23 = vmul.f32 %v3074_v63, %v2935_v21 }
 0xc03   :  { %2943 = vst.msk [vmem:[#allocation2] sm:$0xff] %vm5236_vm13, %v2942_v23 }
 0xc04   :  { %3382 = shalt.err (!%p3379_p4)
}
 0xc05   :  { %s3383_s1 = scalar_lea.hbm %s4955_s8, 128 }
 0xc06   :  { %p3384_p5 = scmp.ne.s32.totalorder %s4955_s8, %s3383_s1  ;;  %p3387_p6 = scmp.lt.u32.totalorder %s3383_s1, %s4955_s8 }
 0xc08   :  { %p3389_p7 = pnand %p3387_p6, %p3384_p5 }
 0xc0a   :  { %3392 = shalt.err (!%p3389_p7)
}
 0xc0b   :  { %2953 = dma.vmem_to_hbm [thread:$0]  %s2951_s23, 128, %s4955_s8, [#allocation3]  }
 0xc0c   :  { %3393 = dma.done.wait [#allocation3], 128  }
 0xc0d   :  { %3394 = vsyncadd [#allocation3], 4294967168 }
 0xc0e   :  { %2957 = vsyncpa [#allocation3], 1 }

</bundles_post_ra>
